<compile_context>
chip_gen: v6e
topology: v6e:2x2x1
jax: 0.10.0
libtpu: 0.0.40
codegen_flags: <defaults>
</compile_context>

<pallas_src>
import functools

import numpy as np
import jax
import jax.numpy as jnp
from jax.experimental import pallas as pl
from jax.experimental.pallas import tpu as pltpu

LATENT_DIM = 2


def _mosaic_params(*dims):
    cls = getattr(pltpu, "CompilerParams", None) or getattr(pltpu, "TPUCompilerParams", None)
    return cls(dimension_semantics=tuple(dims)) if cls is not None else None


# ----------------------------------------------------------------------------
# Pallas kernels
# ----------------------------------------------------------------------------
def _gemm_bias_kernel(x_ref, w_ref, b_ref, o_ref, *, relu):
    """(TM,K)x(K,N) block GEMM: bf16/f32 operands, f32 accumulate, f32 bias+ReLU."""
    acc = jnp.dot(x_ref[...], w_ref[...], preferred_element_type=jnp.float32)
    acc = acc + b_ref[...]                      # (1, N) broadcasts over rows
    if relu:
        acc = jnp.maximum(acc, 0.0)
    o_ref[...] = acc.astype(o_ref.dtype)


def gemm_bias(x, w, b, relu=False, out_dtype=jnp.float32, tm=256):
    """y = relu?(x @ w + b), M-tiled Pallas GEMM (pipelined / megacore-parallel)."""
    M, K = x.shape
    K2, N = w.shape
    assert K == K2
    TM = M if M <= tm else tm                   # full-dim block when small
    kern = functools.partial(_gemm_bias_kernel, relu=relu)
    return pl.pallas_call(
        kern,
        out_shape=jax.ShapeDtypeStruct((M, N), out_dtype),
        grid=(pl.cdiv(M, TM),),
        in_specs=[
            pl.BlockSpec((TM, K), lambda i: (i, 0)),
            pl.BlockSpec((K, N), lambda i: (0, 0)),
            pl.BlockSpec((1, N), lambda i: (0, 0)),
        ],
        out_specs=pl.BlockSpec((TM, N), lambda i: (i, 0)),
        compiler_params=_mosaic_params("parallel"),
    )(x, w, b.reshape(1, N).astype(jnp.float32))


def _latent_kernel(flat_ref, wmu_ref, bmu_ref, wsg_ref, bsg_ref,
                   eps_ref, wdec_ref, bdec_ref, o_ref):
    """Fused latent path: fc_enc(mu,sigma) -> z = mu + sigma*eps -> fc_dec -> ReLU."""
    flat = flat_ref[...]
    mu = jnp.dot(flat, wmu_ref[...], preferred_element_type=jnp.float32) + bmu_ref[...]
    sg = jnp.dot(flat, wsg_ref[...], preferred_element_type=jnp.float32) + bsg_ref[...]
    z = mu + sg * eps_ref[...]
    d = jnp.dot(z, wdec_ref[...], preferred_element_type=jnp.float32) + bdec_ref[...]
    o_ref[...] = jnp.maximum(d, 0.0)


def latent_path(flat, w_mu, b_mu, w_sg, b_sg, eps, w_dec, b_dec, tb=256):
    B, K = flat.shape
    L = w_mu.shape[1]
    N = w_dec.shape[1]
    TB = B if B <= tb else tb
    return pl.pallas_call(
        _latent_kernel,
        out_shape=jax.ShapeDtypeStruct((B, N), jnp.float32),
        grid=(pl.cdiv(B, TB),),
        in_specs=[
            pl.BlockSpec((TB, K), lambda i: (i, 0)),
            pl.BlockSpec((K, L), lambda i: (0, 0)),
            pl.BlockSpec((1, L), lambda i: (0, 0)),
            pl.BlockSpec((K, L), lambda i: (0, 0)),
            pl.BlockSpec((1, L), lambda i: (0, 0)),
            pl.BlockSpec((TB, L), lambda i: (i, 0)),
            pl.BlockSpec((L, N), lambda i: (0, 0)),
            pl.BlockSpec((1, N), lambda i: (0, 0)),
        ],
        out_specs=pl.BlockSpec((TB, N), lambda i: (i, 0)),
        compiler_params=_mosaic_params("parallel"),
    )(flat.astype(jnp.float32),
      w_mu, b_mu.reshape(1, L).astype(jnp.float32),
      w_sg, b_sg.reshape(1, L).astype(jnp.float32),
      eps.astype(jnp.float32),
      w_dec, b_dec.reshape(1, N).astype(jnp.float32))


# ----------------------------------------------------------------------------
# Glue: NHWC im2col (channels stay on the lane axis) + conv-as-GEMM
# ----------------------------------------------------------------------------
def im2col_nhwc(x, k, stride, pad):
    """x: [B,H,W,C] -> patches [B*Ho*Wo, k*k*C], K ordered (ky, kx, c)."""
    B, H, W, C = x.shape
    xp = jnp.pad(x, ((0, 0), (pad, pad), (pad, pad), (0, 0)))
    Ho = (H + 2 * pad - k) // stride + 1
    Wo = (W + 2 * pad - k) // stride + 1
    cols = []
    for ky in range(k):
        for kx in range(k):
            cols.append(xp[:, ky: ky + stride * (Ho - 1) + 1: stride,
                           kx: kx + stride * (Wo - 1) + 1: stride, :])
    patches = jnp.concatenate(cols, axis=-1)          # [B, Ho, Wo, k*k*C]
    return patches.reshape(B * Ho * Wo, k * k * C), Ho, Wo


def conv2d_nhwc(x, wmat, b, k, stride, pad, relu=False):
    """x: [B,H,W,C], wmat: [k*k*C, Cout] (matches im2col_nhwc K ordering)."""
    # TODO(synk): pull the im2col into the Pallas kernel (shifted VMEM reads)
    # to avoid materializing the patch matrix in HBM at large batch sizes.
    B = x.shape[0]
    patches, Ho, Wo = im2col_nhwc(x, k, stride, pad)
    y = gemm_bias(patches.astype(wmat.dtype), wmat, b, relu=relu)
    return y.reshape(B, Ho, Wo, -1)


def deconv_pixelshuffle_nhwc(x, wmat, b4, relu=False):
    """ConvTranspose2d(Cin,Cout,4,stride=2,pad=1) as a stride-1 3x3 conv that
    emits Cout*4 phase channels + depth-to-space.  No zero-dilation, no wasted
    MACs, lane-dense GEMM output."""
    B, H, W, _ = x.shape
    y = conv2d_nhwc(x, wmat, b4, k=3, stride=1, pad=1, relu=relu)   # [B,H,W,Cout*4]
    Cout = y.shape[-1] // 4
    y = y.reshape(B, H, W, Cout, 2, 2)
    y = y.transpose(0, 1, 4, 2, 5, 3).reshape(B, 2 * H, 2 * W, Cout)
    return y


# ----------------------------------------------------------------------------
# One-time weight preparation (layout permutes / bf16 casts outside forward)
# ----------------------------------------------------------------------------
def _conv_wmat(w):
    """torch Conv2d weight [Cout,Cin,k,k] -> [k*k*Cin, Cout] (NHWC im2col)."""
    Cout, Cin, k, _ = w.shape
    return jnp.transpose(w, (2, 3, 1, 0)).reshape(k * k * Cin, Cout)


def _deconv_wmat(w):
    """torch ConvTranspose2d weight [Cin,Cout,4,4] (stride 2, pad 1) ->
    equivalent stride-1 3x3 conv GEMM matrix [9*Cin, Cout*4]; column (co,r,c)
    holds output phase (r,c):  out[2q+r, 2p+c] = conv3x3(x)[q, p, (co,r,c)]."""
    Cin, Cout, k, _ = w.shape
    assert k == 4
    weq = jnp.zeros((3, 3, Cin, Cout, 2, 2), w.dtype)
    for r in range(2):
        for c in range(2):
            for ty in range(3):
                for tx in range(3):
                    ky = r + 3 - 2 * ty           # transposed-conv kernel index
                    kx = c + 3 - 2 * tx
                    if 0 <= ky < 4 and 0 <= kx < 4:
                        weq = weq.at[ty, tx, :, :, r, c].set(w[:, :, ky, kx])
    return weq.reshape(9 * Cin, Cout * 4)


def prepare_params(p):
    f7 = 64 * 7 * 7
    prep = {
        "conv1_wm": _conv_wmat(p["conv1_w"]).astype(jnp.bfloat16),
        "conv1_b": p["conv1_b"].astype(jnp.float32),
        "conv2_wm": _conv_wmat(p["conv2_w"]).astype(jnp.bfloat16),
        "conv2_b": p["conv2_b"].astype(jnp.float32),
        "deconv1_wm": _deconv_wmat(p["deconv1_w"]).astype(jnp.bfloat16),
        "deconv1_b": jnp.repeat(p["deconv1_b"], 4).astype(jnp.float32),
        "deconv2_wm": _deconv_wmat(p["deconv2_w"]).astype(jnp.bfloat16),
        "deconv2_b": jnp.repeat(p["deconv2_b"], 4).astype(jnp.float32),
    }
    # fc_enc consumes our NHWC flatten (h,w,c): permute rows, pre-split heads.
    w_enc = p["fc_enc_w"].reshape(2 * LATENT_DIM, 64, 7, 7)
    w_enc = jnp.transpose(w_enc, (2, 3, 1, 0)).reshape(f7, 2 * LATENT_DIM)
    prep["w_mu"] = w_enc[:, :LATENT_DIM].astype(jnp.float32)
    prep["w_sg"] = w_enc[:, LATENT_DIM:].astype(jnp.float32)
    prep["b_mu"] = p["fc_enc_b"][:LATENT_DIM].astype(jnp.float32)
    prep["b_sg"] = p["fc_enc_b"][LATENT_DIM:].astype(jnp.float32)
    # fc_dec produces an NHWC flatten (h,w,c): permute columns / bias to match.
    w_dec = p["fc_dec_w"].reshape(64, 7, 7, LATENT_DIM)
    prep["w_dec"] = jnp.transpose(w_dec, (1, 2, 0, 3)).reshape(f7, LATENT_DIM).T.astype(jnp.float32)
    prep["b_dec"] = jnp.transpose(p["fc_dec_b"].reshape(64, 7, 7), (1, 2, 0)).reshape(f7).astype(jnp.float32)
    return prep


# ----------------------------------------------------------------------------
# Parameters (deterministic synthetic init, PyTorch-default-like scaling)
# ----------------------------------------------------------------------------
def init_params(key):
    ks = jax.random.split(key, 12)

    def u(k, shape, fan_in):
        bound = 1.0 / np.sqrt(fan_in)
        return jax.random.uniform(k, shape, jnp.float32, -bound, bound)

    p = {}
    p["conv1_w"] = u(ks[0], (32, 1, 3, 3), 1 * 3 * 3)
    p["conv1_b"] = u(ks[1], (32,), 1 * 3 * 3)
    p["conv2_w"] = u(ks[2], (64, 32, 3, 3), 32 * 3 * 3)
    p["conv2_b"] = u(ks[3], (64,), 32 * 3 * 3)
    p["fc_enc_w"] = u(ks[4], (2 * LATENT_DIM, 64 * 7 * 7), 64 * 7 * 7)  # [out,in]
    p["fc_enc_b"] = u(ks[5], (2 * LATENT_DIM,), 64 * 7 * 7)
    p["fc_dec_w"] = u(ks[6], (64 * 7 * 7, LATENT_DIM), LATENT_DIM)      # [out,in]
    p["fc_dec_b"] = u(ks[7], (64 * 7 * 7,), LATENT_DIM)
    p["deconv1_w"] = u(ks[8], (64, 32, 4, 4), 64 * 4 * 4)
    p["deconv1_b"] = u(ks[9], (32,), 64 * 4 * 4)
    p["deconv2_w"] = u(ks[10], (32, 1, 4, 4), 32 * 4 * 4)
    p["deconv2_b"] = u(ks[11], (1,), 32 * 4 * 4)
    return p


# ----------------------------------------------------------------------------
# VAE forward (Pallas path) and pure-lax f32 reference
# ----------------------------------------------------------------------------
def vae_forward(prep, x, eps):
    B = x.shape[0]
    h = jnp.transpose(x, (0, 2, 3, 1))                                            # NCHW->NHWC
    h = conv2d_nhwc(h, prep["conv1_wm"], prep["conv1_b"], 3, 2, 1, relu=True)     # [B,14,14,32]
    h = conv2d_nhwc(h, prep["conv2_wm"], prep["conv2_b"], 3, 2, 1, relu=True)     # [B,7,7,64]
    flat = h.reshape(B, 64 * 7 * 7)                                               # NHWC flatten
    d = latent_path(flat, prep["w_mu"], prep["b_mu"], prep["w_sg"], prep["b_sg"],
                    eps, prep["w_dec"], prep["b_dec"])                            # [B,3136] ReLU'd
    d = d.reshape(B, 7, 7, 64)
    d = deconv_pixelshuffle_nhwc(d, prep["deconv1_wm"], prep["deconv1_b"], relu=True)   # [B,14,14,32]
    d = deconv_pixelshuffle_nhwc(d, prep["deconv2_wm"], prep["deconv2_b"], relu=False)  # [B,28,28,1]
    return jnp.transpose(d, (0, 3, 1, 2))     # generating=False -> no sigmoid


def vae_reference(params, x, eps):
    dn = ("NCHW", "OIHW", "NCHW")
    h = jax.lax.conv_general_dilated(x, params["conv1_w"], (2, 2),
                                     [(1, 1), (1, 1)], dimension_numbers=dn)
    h = jax.nn.relu(h + params["conv1_b"][None, :, None, None])
    h = jax.lax.conv_general_dilated(h, params["conv2_w"], (2, 2),
                                     [(1, 1), (1, 1)], dimension_numbers=dn)
    h = jax.nn.relu(h + params["conv2_b"][None, :, None, None])
    flat = h.reshape(x.shape[0], -1)
    lat = flat @ params["fc_enc_w"].T + params["fc_enc_b"]
    mu, sigma = lat[:, :LATENT_DIM], lat[:, LATENT_DIM:]
    z = mu + sigma * eps
    d = jax.nn.relu(z @ params["fc_dec_w"].T + params["fc_dec_b"])
    d = d.reshape(x.shape[0], 64, 7, 7)
    w1 = jnp.transpose(params["deconv1_w"], (1, 0, 2, 3))[:, :, ::-1, ::-1]
    d = jax.lax.conv_general_dilated(d, w1, (1, 1), [(2, 2), (2, 2)],
                                     lhs_dilation=(2, 2), dimension_numbers=dn)
    d = jax.nn.relu(d + params["deconv1_b"][None, :, None, None])
    w2 = jnp.transpose(params["deconv2_w"], (1, 0, 2, 3))[:, :, ::-1, ::-1]
    out = jax.lax.conv_general_dilated(d, w2, (1, 1), [(2, 2), (2, 2)],
                                       lhs_dilation=(2, 2), dimension_numbers=dn)
    return out + params["deconv2_b"][None, :, None, None]


if __name__ == "__main__":
    key = jax.random.PRNGKey(0)
    k_x, k_eps, k_par = jax.random.split(key, 3)

    B = 2
    x = jax.random.uniform(k_x, (B, 1, 28, 28), jnp.float32)       # MNIST-sized input
    eps = jax.random.uniform(k_eps, (B, LATENT_DIM), jnp.float32)  # torch.rand equivalent
    params = init_params(k_par)
    prep = prepare_params(params)                                  # one-time weight prep

    out = jax.jit(vae_forward)(prep, x, eps)
    out = jax.block_until_ready(out)
    assert out.shape == (B, 1, 28, 28), out.shape

    ref = vae_reference(params, x, eps)
    np.testing.assert_allclose(np.asarray(out), np.asarray(ref),
                               rtol=2e-2, atol=2e-2)
    print("KERNEL_OK")
</pallas_src>

<mosaic_0001>
module attributes {stable_mosaic.version = 11 : i64} {
  func.func @_gemm_bias_kernel(%arg0: i32, %arg1: memref<256x9xbf16, #tpu.memory_space<vmem>>, %arg2: memref<9x32xbf16, #tpu.memory_space<vmem>>, %arg3: memref<1x32xf32, #tpu.memory_space<vmem>>, %arg4: memref<256x32xf32, #tpu.memory_space<vmem>>) attributes {dimension_semantics = [#tpu.dimension_semantics<parallel>], iteration_bounds = array<i64: 2>, scalar_prefetch = 0 : i64, scratch_operands = 0 : i64, tpu.core_type = #tpu.core_type<tc>, window_params = [{transform_indices = @transform_0, window_bounds = array<i64: 256, 9>}, {pipeline_mode = #tpu.pipeline_mode<synchronous>, transform_indices = @transform_1, window_bounds = array<i64: 9, 32>}, {pipeline_mode = #tpu.pipeline_mode<synchronous>, transform_indices = @transform_2, window_bounds = array<i64: 1, 32>}, {transform_indices = @transform_3, window_bounds = array<i64: 256, 32>}]} {
    %c0 = arith.constant 0 : index
    %c0_0 = arith.constant 0 : index
    %0 = vector.load %arg1[%c0, %c0_0] : memref<256x9xbf16, #tpu.memory_space<vmem>>, vector<256x9xbf16>
    %c0_1 = arith.constant 0 : index
    %c0_2 = arith.constant 0 : index
    %1 = vector.load %arg2[%c0_1, %c0_2] : memref<9x32xbf16, #tpu.memory_space<vmem>>, vector<9x32xbf16>
    %cst = arith.constant dense<0.000000e+00> : vector<256x32xf32>
    %2 = tpu.matmul %0, %1, %cst {dimension_numbers = #tpu.dot_dimension_numbers<[1], [0], [0], [1], [0, 0, 1, 1], [], []>} : vector<256x9xbf16>, vector<9x32xbf16>, vector<256x32xf32> -> vector<256x32xf32>
    %c0_3 = arith.constant 0 : index
    %c0_4 = arith.constant 0 : index
    %3 = vector.load %arg3[%c0_3, %c0_4] : memref<1x32xf32, #tpu.memory_space<vmem>>, vector<1x32xf32>
    %4 = vector.broadcast %3 : vector<1x32xf32> to vector<256x32xf32>
    %5 = arith.addf %2, %4 : vector<256x32xf32>
    %cst_5 = arith.constant 0.000000e+00 : f32
    %6 = vector.broadcast %cst_5 : f32 to vector<256x32xf32>
    %7 = arith.maximumf %5, %6 : vector<256x32xf32>
    %c0_6 = arith.constant 0 : index
    %c0_7 = arith.constant 0 : index
    %8 = vector.load %arg4[%c0_6, %c0_7] : memref<256x32xf32, #tpu.memory_space<vmem>>, vector<256x32xf32>
    tpu.vector_store %arg4[%c0_6, %c0_7], %7 {strides = array<i32>} : memref<256x32xf32, #tpu.memory_space<vmem>>, vector<256x32xf32>,
    return
  }
  func.func @transform_0(%arg0: i32) -> (i32, i32) {
    %c0_i32 = arith.constant 0 : i32
    %c0_i32_0 = arith.constant 0 : i32
    return %arg0, %c0_i32 : i32, i32
  }
  func.func @transform_1(%arg0: i32) -> (i32, i32) {
    %c0_i32 = arith.constant 0 : i32
    %c0_i32_0 = arith.constant 0 : i32
    %c0_i32_1 = arith.constant 0 : i32
    return %c0_i32, %c0_i32_0 : i32, i32
  }
  func.func @transform_2(%arg0: i32) -> (i32, i32) {
    %c0_i32 = arith.constant 0 : i32
    %c0_i32_0 = arith.constant 0 : i32
    %c0_i32_1 = arith.constant 0 : i32
    return %c0_i32, %c0_i32_0 : i32, i32
  }
  func.func @transform_3(%arg0: i32) -> (i32, i32) {
    %c0_i32 = arith.constant 0 : i32
    %c0_i32_0 = arith.constant 0 : i32
    return %arg0, %c0_i32 : i32, i32
  }
}

module attributes {stable_mosaic.version = 11 : i64} {
  func.func @_gemm_bias_kernel(%arg0: i32, %arg1: memref<98x288xbf16, #tpu.memory_space<vmem>>, %arg2: memref<288x64xbf16, #tpu.memory_space<vmem>>, %arg3: memref<1x64xf32, #tpu.memory_space<vmem>>, %arg4: memref<98x64xf32, #tpu.memory_space<vmem>>) attributes {dimension_semantics = [#tpu.dimension_semantics<parallel>], iteration_bounds = array<i64: 1>, scalar_prefetch = 0 : i64, scratch_operands = 0 : i64, tpu.core_type = #tpu.core_type<tc>, window_params = [{transform_indices = @transform_0, window_bounds = array<i64: 98, 288>}, {pipeline_mode = #tpu.pipeline_mode<synchronous>, transform_indices = @transform_1, window_bounds = array<i64: 288, 64>}, {pipeline_mode = #tpu.pipeline_mode<synchronous>, transform_indices = @transform_2, window_bounds = array<i64: 1, 64>}, {transform_indices = @transform_3, window_bounds = array<i64: 98, 64>}]} {
    %c0 = arith.constant 0 : index
    %c0_0 = arith.constant 0 : index
    %0 = vector.load %arg1[%c0, %c0_0] : memref<98x288xbf16, #tpu.memory_space<vmem>>, vector<98x288xbf16>
    %c0_1 = arith.constant 0 : index
    %c0_2 = arith.constant 0 : index
    %1 = vector.load %arg2[%c0_1, %c0_2] : memref<288x64xbf16, #tpu.memory_space<vmem>>, vector<288x64xbf16>
    %cst = arith.constant dense<0.000000e+00> : vector<98x64xf32>
    %2 = tpu.matmul %0, %1, %cst {dimension_numbers = #tpu.dot_dimension_numbers<[1], [0], [0], [1], [0, 0, 1, 1], [], []>} : vector<98x288xbf16>, vector<288x64xbf16>, vector<98x64xf32> -> vector<98x64xf32>
    %c0_3 = arith.constant 0 : index
    %c0_4 = arith.constant 0 : index
    %3 = vector.load %arg3[%c0_3, %c0_4] : memref<1x64xf32, #tpu.memory_space<vmem>>, vector<1x64xf32>
    %4 = vector.broadcast %3 : vector<1x64xf32> to vector<98x64xf32>
    %5 = arith.addf %2, %4 : vector<98x64xf32>
    %cst_5 = arith.constant 0.000000e+00 : f32
    %6 = vector.broadcast %cst_5 : f32 to vector<98x64xf32>
    %7 = arith.maximumf %5, %6 : vector<98x64xf32>
    %c0_6 = arith.constant 0 : index
    %c0_7 = arith.constant 0 : index
    %8 = vector.load %arg4[%c0_6, %c0_7] : memref<98x64xf32, #tpu.memory_space<vmem>>, vector<98x64xf32>
    tpu.vector_store %arg4[%c0_6, %c0_7], %7 {strides = array<i32>} : memref<98x64xf32, #tpu.memory_space<vmem>>, vector<98x64xf32>,
    return
  }
  func.func @transform_0(%arg0: i32) -> (i32, i32) {
    %c0_i32 = arith.constant 0 : i32
    %c0_i32_0 = arith.constant 0 : i32
    return %arg0, %c0_i32 : i32, i32
  }
  func.func @transform_1(%arg0: i32) -> (i32, i32) {
    %c0_i32 = arith.constant 0 : i32
    %c0_i32_0 = arith.constant 0 : i32
    %c0_i32_1 = arith.constant 0 : i32
    return %c0_i32, %c0_i32_0 : i32, i32
  }
  func.func @transform_2(%arg0: i32) -> (i32, i32) {
    %c0_i32 = arith.constant 0 : i32
    %c0_i32_0 = arith.constant 0 : i32
    %c0_i32_1 = arith.constant 0 : i32
    return %c0_i32, %c0_i32_0 : i32, i32
  }
  func.func @transform_3(%arg0: i32) -> (i32, i32) {
    %c0_i32 = arith.constant 0 : i32
    %c0_i32_0 = arith.constant 0 : i32
    return %arg0, %c0_i32 : i32, i32
  }
}

module attributes {stable_mosaic.version = 11 : i64} {
  func.func @_latent_kernel(%arg0: i32, %arg1: memref<2x3136xf32, #tpu.memory_space<vmem>>, %arg2: memref<3136x2xf32, #tpu.memory_space<vmem>>, %arg3: memref<1x2xf32, #tpu.memory_space<vmem>>, %arg4: memref<3136x2xf32, #tpu.memory_space<vmem>>, %arg5: memref<1x2xf32, #tpu.memory_space<vmem>>, %arg6: memref<2x2xf32, #tpu.memory_space<vmem>>, %arg7: memref<2x3136xf32, #tpu.memory_space<vmem>>, %arg8: memref<1x3136xf32, #tpu.memory_space<vmem>>, %arg9: memref<2x3136xf32, #tpu.memory_space<vmem>>) attributes {dimension_semantics = [#tpu.dimension_semantics<parallel>], iteration_bounds = array<i64: 1>, scalar_prefetch = 0 : i64, scratch_operands = 0 : i64, tpu.core_type = #tpu.core_type<tc>, window_params = [{transform_indices = @transform_0, window_bounds = array<i64: 2, 3136>}, {pipeline_mode = #tpu.pipeline_mode<synchronous>, transform_indices = @transform_1, window_bounds = array<i64: 3136, 2>}, {pipeline_mode = #tpu.pipeline_mode<synchronous>, transform_indices = @transform_2, window_bounds = array<i64: 1, 2>}, {pipeline_mode = #tpu.pipeline_mode<synchronous>, transform_indices = @transform_3, window_bounds = array<i64: 3136, 2>}, {pipeline_mode = #tpu.pipeline_mode<synchronous>, transform_indices = @transform_4, window_bounds = array<i64: 1, 2>}, {transform_indices = @transform_5, window_bounds = array<i64: 2, 2>}, {pipeline_mode = #tpu.pipeline_mode<synchronous>, transform_indices = @transform_6, window_bounds = array<i64: 2, 3136>}, {pipeline_mode = #tpu.pipeline_mode<synchronous>, transform_indices = @transform_7, window_bounds = array<i64: 1, 3136>}, {transform_indices = @transform_8, window_bounds = array<i64: 2, 3136>}]} {
    %c0 = arith.constant 0 : index
    %c0_0 = arith.constant 0 : index
    %0 = vector.load %arg1[%c0, %c0_0] : memref<2x3136xf32, #tpu.memory_space<vmem>>, vector<2x3136xf32>
    %c0_1 = arith.constant 0 : index
    %c0_2 = arith.constant 0 : index
    %1 = vector.load %arg2[%c0_1, %c0_2] : memref<3136x2xf32, #tpu.memory_space<vmem>>, vector<3136x2xf32>
    %cst = arith.constant dense<0.000000e+00> : vector<2x2xf32>
    %2 = tpu.matmul %0, %1, %cst {dimension_numbers = #tpu.dot_dimension_numbers<[1], [0], [0], [1], [0, 0, 1, 1], [], []>} : vector<2x3136xf32>, vector<3136x2xf32>, vector<2x2xf32> -> vector<2x2xf32>
    %c0_3 = arith.constant 0 : index
    %c0_4 = arith.constant 0 : index
    %3 = vector.load %arg3[%c0_3, %c0_4] : memref<1x2xf32, #tpu.memory_space<vmem>>, vector<1x2xf32>
    %4 = vector.broadcast %3 : vector<1x2xf32> to vector<2x2xf32>
    %5 = arith.addf %2, %4 : vector<2x2xf32>
    %c0_5 = arith.constant 0 : index
    %c0_6 = arith.constant 0 : index
    %6 = vector.load %arg4[%c0_5, %c0_6] : memref<3136x2xf32, #tpu.memory_space<vmem>>, vector<3136x2xf32>
    %cst_7 = arith.constant dense<0.000000e+00> : vector<2x2xf32>
    %7 = tpu.matmul %0, %6, %cst_7 {dimension_numbers = #tpu.dot_dimension_numbers<[1], [0], [0], [1], [0, 0, 1, 1], [], []>} : vector<2x3136xf32>, vector<3136x2xf32>, vector<2x2xf32> -> vector<2x2xf32>
    %c0_8 = arith.constant 0 : index
    %c0_9 = arith.constant 0 : index
    %8 = vector.load %arg5[%c0_8, %c0_9] : memref<1x2xf32, #tpu.memory_space<vmem>>, vector<1x2xf32>
    %9 = vector.broadcast %8 : vector<1x2xf32> to vector<2x2xf32>
    %10 = arith.addf %7, %9 : vector<2x2xf32>
    %c0_10 = arith.constant 0 : index
    %c0_11 = arith.constant 0 : index
    %11 = vector.load %arg6[%c0_10, %c0_11] : memref<2x2xf32, #tpu.memory_space<vmem>>, vector<2x2xf32>
    %12 = arith.mulf %10, %11 : vector<2x2xf32>
    %13 = arith.addf %5, %12 : vector<2x2xf32>
    %c0_12 = arith.constant 0 : index
    %c0_13 = arith.constant 0 : index
    %14 = vector.load %arg7[%c0_12, %c0_13] : memref<2x3136xf32, #tpu.memory_space<vmem>>, vector<2x3136xf32>
    %cst_14 = arith.constant dense<0.000000e+00> : vector<2x3136xf32>
    %15 = tpu.matmul %13, %14, %cst_14 {dimension_numbers = #tpu.dot_dimension_numbers<[1], [0], [0], [1], [0, 0, 1, 1], [], []>} : vector<2x2xf32>, vector<2x3136xf32>, vector<2x3136xf32> -> vector<2x3136xf32>
    %c0_15 = arith.constant 0 : index
    %c0_16 = arith.constant 0 : index
    %16 = vector.load %arg8[%c0_15, %c0_16] : memref<1x3136xf32, #tpu.memory_space<vmem>>, vector<1x3136xf32>
    %17 = vector.broadcast %16 : vector<1x3136xf32> to vector<2x3136xf32>
    %18 = arith.addf %15, %17 : vector<2x3136xf32>
    %cst_17 = arith.constant 0.000000e+00 : f32
    %19 = vector.broadcast %cst_17 : f32 to vector<2x3136xf32>
    %20 = arith.maximumf %18, %19 : vector<2x3136xf32>
    %c0_18 = arith.constant 0 : index
    %c0_19 = arith.constant 0 : index
    %21 = vector.load %arg9[%c0_18, %c0_19] : memref<2x3136xf32, #tpu.memory_space<vmem>>, vector<2x3136xf32>
    tpu.vector_store %arg9[%c0_18, %c0_19], %20 {strides = array<i32>} : memref<2x3136xf32, #tpu.memory_space<vmem>>, vector<2x3136xf32>,
    return
  }
  func.func @transform_0(%arg0: i32) -> (i32, i32) {
    %c0_i32 = arith.constant 0 : i32
    %c0_i32_0 = arith.constant 0 : i32
    return %arg0, %c0_i32 : i32, i32
  }
  func.func @transform_1(%arg0: i32) -> (i32, i32) {
    %c0_i32 = arith.constant 0 : i32
    %c0_i32_0 = arith.constant 0 : i32
    %c0_i32_1 = arith.constant 0 : i32
    return %c0_i32, %c0_i32_0 : i32, i32
  }
  func.func @transform_2(%arg0: i32) -> (i32, i32) {
    %c0_i32 = arith.constant 0 : i32
    %c0_i32_0 = arith.constant 0 : i32
    %c0_i32_1 = arith.constant 0 : i32
    return %c0_i32, %c0_i32_0 : i32, i32
  }
  func.func @transform_3(%arg0: i32) -> (i32, i32) {
    %c0_i32 = arith.constant 0 : i32
    %c0_i32_0 = arith.constant 0 : i32
    %c0_i32_1 = arith.constant 0 : i32
    return %c0_i32, %c0_i32_0 : i32, i32
  }
  func.func @transform_4(%arg0: i32) -> (i32, i32) {
    %c0_i32 = arith.constant 0 : i32
    %c0_i32_0 = arith.constant 0 : i32
    %c0_i32_1 = arith.constant 0 : i32
    return %c0_i32, %c0_i32_0 : i32, i32
  }
  func.func @transform_5(%arg0: i32) -> (i32, i32) {
    %c0_i32 = arith.constant 0 : i32
    %c0_i32_0 = arith.constant 0 : i32
    return %arg0, %c0_i32 : i32, i32
  }
  func.func @transform_6(%arg0: i32) -> (i32, i32) {
    %c0_i32 = arith.constant 0 : i32
    %c0_i32_0 = arith.constant 0 : i32
    %c0_i32_1 = arith.constant 0 : i32
    return %c0_i32, %c0_i32_0 : i32, i32
  }
  func.func @transform_7(%arg0: i32) -> (i32, i32) {
    %c0_i32 = arith.constant 0 : i32
    %c0_i32_0 = arith.constant 0 : i32
    %c0_i32_1 = arith.constant 0 : i32
    return %c0_i32, %c0_i32_0 : i32, i32
  }
  func.func @transform_8(%arg0: i32) -> (i32, i32) {
    %c0_i32 = arith.constant 0 : i32
    %c0_i32_0 = arith.constant 0 : i32
    return %arg0, %c0_i32 : i32, i32
  }
}

module attributes {stable_mosaic.version = 11 : i64} {
  func.func @_gemm_bias_kernel(%arg0: i32, %arg1: memref<98x576xbf16, #tpu.memory_space<vmem>>, %arg2: memref<576x128xbf16, #tpu.memory_space<vmem>>, %arg3: memref<1x128xf32, #tpu.memory_space<vmem>>, %arg4: memref<98x128xf32, #tpu.memory_space<vmem>>) attributes {dimension_semantics = [#tpu.dimension_semantics<parallel>], iteration_bounds = array<i64: 1>, scalar_prefetch = 0 : i64, scratch_operands = 0 : i64, tpu.core_type = #tpu.core_type<tc>, window_params = [{transform_indices = @transform_0, window_bounds = array<i64: 98, 576>}, {pipeline_mode = #tpu.pipeline_mode<synchronous>, transform_indices = @transform_1, window_bounds = array<i64: 576, 128>}, {pipeline_mode = #tpu.pipeline_mode<synchronous>, transform_indices = @transform_2, window_bounds = array<i64: 1, 128>}, {transform_indices = @transform_3, window_bounds = array<i64: 98, 128>}]} {
    %c0 = arith.constant 0 : index
    %c0_0 = arith.constant 0 : index
    %0 = vector.load %arg1[%c0, %c0_0] : memref<98x576xbf16, #tpu.memory_space<vmem>>, vector<98x576xbf16>
    %c0_1 = arith.constant 0 : index
    %c0_2 = arith.constant 0 : index
    %1 = vector.load %arg2[%c0_1, %c0_2] : memref<576x128xbf16, #tpu.memory_space<vmem>>, vector<576x128xbf16>
    %cst = arith.constant dense<0.000000e+00> : vector<98x128xf32>
    %2 = tpu.matmul %0, %1, %cst {dimension_numbers = #tpu.dot_dimension_numbers<[1], [0], [0], [1], [0, 0, 1, 1], [], []>} : vector<98x576xbf16>, vector<576x128xbf16>, vector<98x128xf32> -> vector<98x128xf32>
    %c0_3 = arith.constant 0 : index
    %c0_4 = arith.constant 0 : index
    %3 = vector.load %arg3[%c0_3, %c0_4] : memref<1x128xf32, #tpu.memory_space<vmem>>, vector<1x128xf32>
    %4 = vector.broadcast %3 : vector<1x128xf32> to vector<98x128xf32>
    %5 = arith.addf %2, %4 : vector<98x128xf32>
    %cst_5 = arith.constant 0.000000e+00 : f32
    %6 = vector.broadcast %cst_5 : f32 to vector<98x128xf32>
    %7 = arith.maximumf %5, %6 : vector<98x128xf32>
    %c0_6 = arith.constant 0 : index
    %c0_7 = arith.constant 0 : index
    %8 = vector.load %arg4[%c0_6, %c0_7] : memref<98x128xf32, #tpu.memory_space<vmem>>, vector<98x128xf32>
    tpu.vector_store %arg4[%c0_6, %c0_7], %7 {strides = array<i32>} : memref<98x128xf32, #tpu.memory_space<vmem>>, vector<98x128xf32>,
    return
  }
  func.func @transform_0(%arg0: i32) -> (i32, i32) {
    %c0_i32 = arith.constant 0 : i32
    %c0_i32_0 = arith.constant 0 : i32
    return %arg0, %c0_i32 : i32, i32
  }
  func.func @transform_1(%arg0: i32) -> (i32, i32) {
    %c0_i32 = arith.constant 0 : i32
    %c0_i32_0 = arith.constant 0 : i32
    %c0_i32_1 = arith.constant 0 : i32
    return %c0_i32, %c0_i32_0 : i32, i32
  }
  func.func @transform_2(%arg0: i32) -> (i32, i32) {
    %c0_i32 = arith.constant 0 : i32
    %c0_i32_0 = arith.constant 0 : i32
    %c0_i32_1 = arith.constant 0 : i32
    return %c0_i32, %c0_i32_0 : i32, i32
  }
  func.func @transform_3(%arg0: i32) -> (i32, i32) {
    %c0_i32 = arith.constant 0 : i32
    %c0_i32_0 = arith.constant 0 : i32
    return %arg0, %c0_i32 : i32, i32
  }
}

module attributes {stable_mosaic.version = 11 : i64} {
  func.func @_gemm_bias_kernel(%arg0: i32, %arg1: memref<256x288xbf16, #tpu.memory_space<vmem>>, %arg2: memref<288x4xbf16, #tpu.memory_space<vmem>>, %arg3: memref<1x4xf32, #tpu.memory_space<vmem>>, %arg4: memref<256x4xf32, #tpu.memory_space<vmem>>) attributes {dimension_semantics = [#tpu.dimension_semantics<parallel>], iteration_bounds = array<i64: 2>, scalar_prefetch = 0 : i64, scratch_operands = 0 : i64, tpu.core_type = #tpu.core_type<tc>, window_params = [{transform_indices = @transform_0, window_bounds = array<i64: 256, 288>}, {pipeline_mode = #tpu.pipeline_mode<synchronous>, transform_indices = @transform_1, window_bounds = array<i64: 288, 4>}, {pipeline_mode = #tpu.pipeline_mode<synchronous>, transform_indices = @transform_2, window_bounds = array<i64: 1, 4>}, {transform_indices = @transform_3, window_bounds = array<i64: 256, 4>}]} {
    %c0 = arith.constant 0 : index
    %c0_0 = arith.constant 0 : index
    %0 = vector.load %arg1[%c0, %c0_0] : memref<256x288xbf16, #tpu.memory_space<vmem>>, vector<256x288xbf16>
    %c0_1 = arith.constant 0 : index
    %c0_2 = arith.constant 0 : index
    %1 = vector.load %arg2[%c0_1, %c0_2] : memref<288x4xbf16, #tpu.memory_space<vmem>>, vector<288x4xbf16>
    %cst = arith.constant dense<0.000000e+00> : vector<256x4xf32>
    %2 = tpu.matmul %0, %1, %cst {dimension_numbers = #tpu.dot_dimension_numbers<[1], [0], [0], [1], [0, 0, 1, 1], [], []>} : vector<256x288xbf16>, vector<288x4xbf16>, vector<256x4xf32> -> vector<256x4xf32>
    %c0_3 = arith.constant 0 : index
    %c0_4 = arith.constant 0 : index
    %3 = vector.load %arg3[%c0_3, %c0_4] : memref<1x4xf32, #tpu.memory_space<vmem>>, vector<1x4xf32>
    %4 = vector.broadcast %3 : vector<1x4xf32> to vector<256x4xf32>
    %5 = arith.addf %2, %4 : vector<256x4xf32>
    %c0_5 = arith.constant 0 : index
    %c0_6 = arith.constant 0 : index
    %6 = vector.load %arg4[%c0_5, %c0_6] : memref<256x4xf32, #tpu.memory_space<vmem>>, vector<256x4xf32>
    tpu.vector_store %arg4[%c0_5, %c0_6], %5 {strides = array<i32>} : memref<256x4xf32, #tpu.memory_space<vmem>>, vector<256x4xf32>,
    return
  }
  func.func @transform_0(%arg0: i32) -> (i32, i32) {
    %c0_i32 = arith.constant 0 : i32
    %c0_i32_0 = arith.constant 0 : i32
    return %arg0, %c0_i32 : i32, i32
  }
  func.func @transform_1(%arg0: i32) -> (i32, i32) {
    %c0_i32 = arith.constant 0 : i32
    %c0_i32_0 = arith.constant 0 : i32
    %c0_i32_1 = arith.constant 0 : i32
    return %c0_i32, %c0_i32_0 : i32, i32
  }
  func.func @transform_2(%arg0: i32) -> (i32, i32) {
    %c0_i32 = arith.constant 0 : i32
    %c0_i32_0 = arith.constant 0 : i32
    %c0_i32_1 = arith.constant 0 : i32
    return %c0_i32, %c0_i32_0 : i32, i32
  }
  func.func @transform_3(%arg0: i32) -> (i32, i32) {
    %c0_i32 = arith.constant 0 : i32
    %c0_i32_0 = arith.constant 0 : i32
    return %arg0, %c0_i32 : i32, i32
  }
}

</mosaic_0001>

<bundles_post_ra>
// kernel: vae_forward.5
= control target key start
LH: loop header
LB: loop body
LE: loop exit
PB: predicated region body
PF: predicated region fallthrough
CT: control target
= control target key end

     0   :  { %8 = vsyncpa [#allocation3], 0  ;;  %s1763_s0 = inlined_call_operand.vmem [shape: bf16[392,9], index: 0, kind: input, shape index: {}]   ;;  %s1764_s1 = inlined_call_operand.hbm [shape: bf16[9,32], index: 1, kind: input, shape index: {}]   ;;  %s1765_s2 = inlined_call_operand.hbm [shape: f32[1,32], index: 2, kind: input, shape index: {}]   ;;  %s1766_s3 = inlined_call_operand.vmem [shape: f32[392,32], index: 3, kind: output, shape index: {}]  }
   0x1   :  { %9 = vsyncpa [#allocation5], 0  ;;  %s1411_s12 = smov 0   ;;  %s1413_s13 = smov 0  }
   0x2   :  { %s1415_s14 = smov 0  }
   0x3 LB: > { %s1424_s15 = sadd.s32 4294967295, %s1352_s14   ;;  %s1426_s16 = sadd.s32 1, %s1352_s14   ;;  %s1352_s14 = sphi %s1415_s14, %s1777_s14   ;;  %s1348_s13 = sphi %s1413_s13, %s1776_s13   ;;  %s1344_s12 = sphi %s1411_s12, %s1775_s12  }
   0x4   : > { %s87_s17 = ssub.s32 %s1352_s14, %s1426_s16  ;;  %s90_s18 = sadd.s32 1, %s1348_s13 }
   0x5   : > { %p88_p0 = scmp.eq.s32.totalorder %s87_s17, 0  ;;  %p100_p1 = scmp.ne.s32.totalorder %s1348_s13, %s1344_s12 }
   0x6   : > { %p101_p2 = scmp.eq.s32.totalorder %s1424_s15, 1  ;;  %p992_p3 = scmp.ge.s32.totalorder %s1352_s14, 1 }
   0x7   : > { %s1434_s19 = scalar_select %p88_p0, %s1348_s13, %s90_s18  }
   0x8   : > { %p1436_p4 = por %p101_p2, %p100_p1  ;;  %p114_p5 = scmp.lt.s32.totalorder %s1352_s14, 3 }
   0x9   : > { %p1124_p6 = scmp.eq.s32.totalorder %s1424_s15, 0  ;;  %s1386_s22 = smov [#allocation2]  }
   0xa   : > { %p1441_p7 = pnand %p992_p3, %p114_p5  ;;  %s126_s23 = sshll.u32 %s1386_s22, 4  ;;  %s127_s23 = int_to_ptr.vmem [resolvable:$true] %s126_s23 }
   0xb   : > { %s1387_s25 = smov [#allocation4]   ;;  %s1249_s27 = scalar_lea.vmem %s127_s23, 128 }
   0xc   : > { %p1117_p8 = pneg %p1441_p7  ;;  %s140_s26 = sshll.u32 %s1387_s25, 4  ;;  %s141_s26 = int_to_ptr.vmem [resolvable:$true] %s140_s26 }
   0xd   : > { %p1250_p11 = scmp.ne.s32.totalorder %s127_s23, %s1249_s27  ;;  %p1257_p0 = scmp.lt.s32.totalorder %s127_s23, %s127_s23 }
   0xe   : > { %p1449_p9 = pnand %p1124_p6, %p1117_p8  ;;  %p1258_p1 = scmp.lt.s32.totalorder %s1249_s27, %s1249_s27 }
  0x10   : > { %p1240_p10 = pneg %p1449_p9  ;;  %p1259_p2 = por %p1258_p1, %p1257_p0 }
  0x12   : > { %p1252_p12 = pnand %p1250_p11, %p1240_p10 }
  0x14   : > { %p1253_p13 = pneg %p1252_p12 }
  0x16   : > { %p1260_p3 = pnand %p1259_p2, %p1253_p13 }
  0x18   : > { %1263 = shalt.err (!%p1260_p3)
}
  0x19   : > { %s1388_s28 = smov 64   ;;  %s1389_s29 = smov 4  }
  0x1a   : > { %1120 = dma.hbm_to_vmem [thread:$0]  (!%p1449_p9), %s1764_s1, 128, %s127_s23, [#allocation3], %s1388_s28, %s1388_s28, %s1389_s29  }
  0x1b   : > { %s1275_s5 = scalar_lea.vmem %s141_s26, 16  ;;  %s1282_s6 = scalar_lea.vmem %s141_s26, 32 }
  0x1c   : > { %p1276_p5 = scmp.ne.s32.totalorder %s141_s26, %s1275_s5  ;;  %p1283_p12 = scmp.lt.s32.totalorder %s141_s26, %s141_s26 }
  0x1d   : > { %p1284_p0 = scmp.lt.s32.totalorder %s1282_s6, %s1275_s5 }
  0x1e   : > { %p1278_p8 = pnand %p1276_p5, %p1240_p10 }
  0x1f   : > { %p1285_p13 = por %p1284_p0, %p1283_p12 }
  0x20   : > { %p1279_p11 = pneg %p1278_p8 }
  0x22   : > { %p1286_p1 = pnand %p1285_p13, %p1279_p11 }
  0x24   : > { %1289 = shalt.err (!%p1286_p1)
}
  0x25   : > { %1123 = dma.hbm_to_vmem [thread:$0]  (!%p1449_p9), %s1765_s2, 16, %s141_s26, [#allocation5]  }
  0x26   : > { %170 = sbr.rel (%p1441_p7) target bundleno = 332 (0x14c), region = 32 }
  0x2b   : > { %1335 = dma.done.wait (%p1124_p6), [#allocation3], 128  }
  0x2c   : > { %1337 = vsyncadd (%p1124_p6), [#allocation3], 4294967168 }
  0x2d   : > { %1339 = dma.done.wait (%p1124_p6), [#allocation5], 16  }
  0x2e   : > { %1341 = vsyncadd (%p1124_p6), [#allocation5], 4294967280  ;;  %vm396_vm0 = vcmask 1043456   ;;  %s1482_s9 = sshll.u32 %s1424_s15, 5  ;;  %vm397_vm1 = vcmask 1044480   ;;  %v1390_v0 = vmov 65535  }
  0x2f   : > { %p206_p9 = scmp.lt.s32.totalorder %s1482_s9, 48  ;;  %v398_v1 = vsel %vm396_vm0, 4294967295, %v1390_v0  ;;  %vm347_vm2 = vcmask 72704   ;;  %v1221_v3 = vld [vmem:[#allocation2] sm:$0x1f]   ;;  %s198_s21 = sand.u32 1, %s1344_s12  }
  0x30   : > { %v399_v2 = vsel %vm397_vm1, %v398_v1, 0  ;;  %v1524_v21 = vld [vmem:[#allocation4] ss:$0 sm:$0xff]  ;;  %s999_s22 = sshll.u32 %s198_s21, 8  ;;  %vm596_vm3 = vcmask 261120   ;;  %s637_s23 = ssub.s32 (%p1436_p4), 49, %s1482_s9 }
  0x31   : > { %s207_s10 = scalar_select %p206_p9, %s1482_s9, 48  ;;  %v401_v5 = vand.u32 %v1221_v3, %v399_v2 }
  0x32   : > { %s1530_s12 = scalar_lea.vmem [#allocation6], %s999_s22   ;;  %s1053_s24 = sshll.u32 (%p1436_p4), %s1424_s15, 8 }
  0x33   : > { %s1001_s11 = sshll.u32 %s207_s10, 2  ;;  %1073 = vmatprep.subr.bf16.mxu0 %v401_v5  ;;  %1107 = vmatprep.subr.bf16.mxu1 %v401_v5  ;;  %p638_p6 = scmp.lt.s32.totalorder (%p1436_p4), %s637_s23, 32 }
  0x34   : > { %s1489_s18 = scalar_lea.vmem %s1763_s0, %s1001_s11  ;;  %1074 = vmatpush3.bf16.msra.mxu0 %v401_v5  ;;  %1108 = vmatpush3.bf16.msra.mxu1 %v401_v5  ;;  %s1631_s27 = scalar_lea.vmem (%p1436_p4), %s1766_s3, %s1053_s24  }
  0x35   : > { %v1222_v4 = vld [vmem:[%s1489_s18] sm:$0xff]   ;;  %v1224_v7 = vld [vmem:[%s1489_s18 + $0x8] sm:$0xff]   ;;  %v1226_v9 = vld [vmem:[%s1489_s18 + $0x10] sm:$0xff]  }
  0x36   : > { %v1223_v6 = vld [vmem:[%s1489_s18 + $0x40] sm:$0xff]   ;;  %1075 = vmatprep.mubr.msk.bf16.mxu0 %vm347_vm2, %v1222_v4  ;;  %v1225_v8 = vld [vmem:[%s1489_s18 + $0x48] sm:$0xff]   ;;  %v1227_v10 = vld [vmem:[%s1489_s18 + $0x50] sm:$0xff]  }
  0x37   : > { %1091 = vmatprep.mubr.msk.bf16.mxu1 %vm347_vm2, %v1223_v6  ;;  %1076 = vmatmul.mubr.msk.bf16.vlgmr.msra.gmra.mxu0 %vm347_vm2, %v1224_v7  ;;  %v1228_v11 = vld [vmem:[%s1489_s18 + $0x18] sm:$0xff]   ;;  %v1230_v13 = vld [vmem:[%s1489_s18 + $0x20] sm:$0xff]   ;;  %v1232_v15 = vld [vmem:[%s1489_s18 + $0x28] sm:$0xff]  }
  0x38   : > { %1092 = vmatmul.mubr.msk.bf16.vlgmr.msra.gmra.mxu1 %vm347_vm2, %v1225_v8  ;;  %1079 = vmatprep.mubr.msk.bf16.mxu0 %vm347_vm2, %v1226_v9  ;;  %v1229_v12 = vld [vmem:[%s1489_s18 + $0x58] sm:$0xff]   ;;  %v1231_v14 = vld [vmem:[%s1489_s18 + $0x60] sm:$0xff]   ;;  %v1233_v16 = vld [vmem:[%s1489_s18 + $0x68] sm:$0xff]  }
  0x39   : > { %1095 = vmatprep.mubr.msk.bf16.mxu1 %vm347_vm2, %v1227_v10  ;;  %v1234_v17 = vld [vmem:[%s1489_s18 + $0x30] sm:$0xff]   ;;  %v1236_v19 = vld [vmem:[%s1489_s18 + $0x38] sm:$0xff]  }
  0x3a   : > { %v1235_v18 = vld [vmem:[%s1489_s18 + $0x70] sm:$0xff]   ;;  %v1237_v20 = vld [vmem:[%s1489_s18 + $0x78] sm:$0xff]  }
  0x3f   : > { %1080 = vmatmul.mubr.msk.bf16.gmra.mxu0 %vm347_vm2, %v1228_v11 }
  0x40   : > { %1096 = vmatmul.mubr.msk.bf16.gmra.mxu1 %vm347_vm2, %v1229_v12  ;;  %1083 = vmatprep.mubr.msk.bf16.mxu0 %vm347_vm2, %v1230_v13 }
  0x41   : > { %1099 = vmatprep.mubr.msk.bf16.mxu1 %vm347_vm2, %v1231_v14 }
  0x47   : > { %1084 = vmatmul.mubr.msk.bf16.gmra.mxu0 %vm347_vm2, %v1232_v15 }
  0x48   : > { %1100 = vmatmul.mubr.msk.bf16.gmra.mxu1 %vm347_vm2, %v1233_v16  ;;  %1087 = vmatprep.mubr.msk.bf16.mxu0 %vm347_vm2, %v1234_v17 }
  0x49   : > { %1103 = vmatprep.mubr.msk.bf16.mxu1 %vm347_vm2, %v1235_v18 }
  0x4f   : > { %1088 = vmatmul.mubr.msk.bf16.gmra.mxu0 %vm347_vm2, %v1236_v19 }
  0x50   : > { %1104 = vmatmul.mubr.msk.bf16.gmra.mxu1 %vm347_vm2, %v1237_v20 }
  0xf7   : > { %v1077_v22 = vpop.f32.mrf.mxu0 }
  0xf8   : > { %v1093_v23 = vpop.f32.mrf.mxu1  ;;  %v446_v24 = vadd.f32 %v1077_v22, %v1524_v21 }
  0xf9   : > { %v510_v25 = vadd.f32 %v1093_v23, %v1524_v21  ;;  %v437_v26 = vpop.f32.mrf.mxu0 }
  0xfa   : > { %v501_v27 = vpop.f32.mrf.mxu1  ;;  %v566_v28 = vmax.f32 %v446_v24, 0.0  ;;  %v438_v30 = vadd.f32 %v1524_v21, %v437_v26 }
  0xfb   : > { %v582_v29 = vmax.f32 %v510_v25, 0.0  ;;  %v502_v31 = vadd.f32 %v1524_v21, %v501_v27  ;;  %v1078_v32 = vpop.f32.mrf.mxu0 }
  0xfc   : > { %v1094_v33 = vpop.f32.mrf.mxu1  ;;  %599 = vst.msk [vmem:[%s1530_s12 + $0x10] sm:$0xff] %vm596_vm3, %v566_v28  ;;  %v564_v34 = vmax.f32 %v438_v30, 0.0  ;;  %v449_v36 = vadd.f32 %v1078_v32, %v1524_v21 }
  0xfd   : > { %615 = vst.msk [vmem:[%s1530_s12 + $0x90] sm:$0xff] %vm596_vm3, %v582_v29  ;;  %v580_v35 = vmax.f32 %v502_v31, 0.0  ;;  %v513_v37 = vadd.f32 %v1094_v33, %v1524_v21  ;;  %v440_v38 = vpop.f32.mrf.mxu0 }
  0xfe   : > { %v504_v39 = vpop.f32.mrf.mxu1  ;;  %597 = vst.msk [vmem:[%s1530_s12] sm:$0xff] %vm596_vm3, %v564_v34  ;;  %v567_v40 = vmax.f32 %v449_v36, 0.0  ;;  %v441_v42 = vadd.f32 %v1524_v21, %v440_v38 }
  0xff   : > { %613 = vst.msk [vmem:[%s1530_s12 + $0x80] sm:$0xff] %vm596_vm3, %v580_v35  ;;  %v583_v41 = vmax.f32 %v513_v37, 0.0  ;;  %v505_v43 = vadd.f32 %v1524_v21, %v504_v39  ;;  %v1081_v44 = vpop.f32.mrf.mxu0 }
 0x100   : > { %v1097_v45 = vpop.f32.mrf.mxu1  ;;  %600 = vst.msk [vmem:[%s1530_s12 + $0x18] sm:$0xff] %vm596_vm3, %v567_v40  ;;  %v565_v46 = vmax.f32 %v441_v42, 0.0  ;;  %v462_v48 = vadd.f32 %v1081_v44, %v1524_v21 }
 0x101   : > { %616 = vst.msk [vmem:[%s1530_s12 + $0x98] sm:$0xff] %vm596_vm3, %v583_v41  ;;  %v581_v47 = vmax.f32 %v505_v43, 0.0  ;;  %v526_v49 = vadd.f32 %v1097_v45, %v1524_v21  ;;  %v453_v50 = vpop.f32.mrf.mxu0 }
 0x102   : > { %v517_v51 = vpop.f32.mrf.mxu1  ;;  %598 = vst.msk [vmem:[%s1530_s12 + $0x8] sm:$0xff] %vm596_vm3, %v565_v46  ;;  %v570_v52 = vmax.f32 %v462_v48, 0.0  ;;  %v454_v54 = vadd.f32 %v1524_v21, %v453_v50 }
 0x103   : > { %614 = vst.msk [vmem:[%s1530_s12 + $0x88] sm:$0xff] %vm596_vm3, %v581_v47  ;;  %v586_v53 = vmax.f32 %v526_v49, 0.0  ;;  %v518_v55 = vadd.f32 %v1524_v21, %v517_v51  ;;  %v1082_v56 = vpop.f32.mrf.mxu0 }
 0x104   : > { %v1098_v57 = vpop.f32.mrf.mxu1  ;;  %603 = vst.msk [vmem:[%s1530_s12 + $0x30] sm:$0xff] %vm596_vm3, %v570_v52  ;;  %v568_v58 = vmax.f32 %v454_v54, 0.0  ;;  %v465_v60 = vadd.f32 %v1082_v56, %v1524_v21 }
 0x105   : > { %619 = vst.msk [vmem:[%s1530_s12 + $0xb0] sm:$0xff] %vm596_vm3, %v586_v53  ;;  %v584_v59 = vmax.f32 %v518_v55, 0.0  ;;  %v529_v61 = vadd.f32 %v1098_v57, %v1524_v21  ;;  %v456_v62 = vpop.f32.mrf.mxu0 }
 0x106   : > { %v520_v63 = vpop.f32.mrf.mxu1  ;;  %601 = vst.msk [vmem:[%s1530_s12 + $0x20] sm:$0xff] %vm596_vm3, %v568_v58  ;;  %v571_v0 = vmax.f32 %v465_v60, 0.0  ;;  %v457_v2 = vadd.f32 %v1524_v21, %v456_v62 }
 0x107   : > { %617 = vst.msk [vmem:[%s1530_s12 + $0xa0] sm:$0xff] %vm596_vm3, %v584_v59  ;;  %v587_v1 = vmax.f32 %v529_v61, 0.0  ;;  %v521_v3 = vadd.f32 %v1524_v21, %v520_v63  ;;  %v1085_v4 = vpop.f32.mrf.mxu0 }
 0x108   : > { %v1101_v5 = vpop.f32.mrf.mxu1  ;;  %604 = vst.msk [vmem:[%s1530_s12 + $0x38] sm:$0xff] %vm596_vm3, %v571_v0  ;;  %v569_v6 = vmax.f32 %v457_v2, 0.0  ;;  %v478_v8 = vadd.f32 %v1085_v4, %v1524_v21 }
 0x109   : > { %620 = vst.msk [vmem:[%s1530_s12 + $0xb8] sm:$0xff] %vm596_vm3, %v587_v1  ;;  %v585_v7 = vmax.f32 %v521_v3, 0.0  ;;  %v542_v9 = vadd.f32 %v1101_v5, %v1524_v21  ;;  %v469_v10 = vpop.f32.mrf.mxu0 }
 0x10a   : > { %v533_v11 = vpop.f32.mrf.mxu1  ;;  %602 = vst.msk [vmem:[%s1530_s12 + $0x28] sm:$0xff] %vm596_vm3, %v569_v6  ;;  %v574_v12 = vmax.f32 %v478_v8, 0.0  ;;  %v470_v14 = vadd.f32 %v1524_v21, %v469_v10 }
 0x10b   : > { %618 = vst.msk [vmem:[%s1530_s12 + $0xa8] sm:$0xff] %vm596_vm3, %v585_v7  ;;  %v590_v13 = vmax.f32 %v542_v9, 0.0  ;;  %v534_v15 = vadd.f32 %v1524_v21, %v533_v11  ;;  %v1086_v16 = vpop.f32.mrf.mxu0 }
 0x10c   : > { %v1102_v17 = vpop.f32.mrf.mxu1  ;;  %607 = vst.msk [vmem:[%s1530_s12 + $0x50] sm:$0xff] %vm596_vm3, %v574_v12  ;;  %v572_v18 = vmax.f32 %v470_v14, 0.0  ;;  %v481_v20 = vadd.f32 %v1086_v16, %v1524_v21 }
 0x10d   : > { %623 = vst.msk [vmem:[%s1530_s12 + $0xd0] sm:$0xff] %vm596_vm3, %v590_v13  ;;  %v588_v19 = vmax.f32 %v534_v15, 0.0  ;;  %v545_v22 = vadd.f32 %v1102_v17, %v1524_v21  ;;  %v472_v23 = vpop.f32.mrf.mxu0 }
 0x10e   : > { %v536_v24 = vpop.f32.mrf.mxu1  ;;  %605 = vst.msk [vmem:[%s1530_s12 + $0x40] sm:$0xff] %vm596_vm3, %v572_v18  ;;  %v575_v25 = vmax.f32 %v481_v20, 0.0  ;;  %v473_v27 = vadd.f32 %v1524_v21, %v472_v23 }
 0x10f   : > { %621 = vst.msk [vmem:[%s1530_s12 + $0xc0] sm:$0xff] %vm596_vm3, %v588_v19  ;;  %v591_v26 = vmax.f32 %v545_v22, 0.0  ;;  %v537_v28 = vadd.f32 %v1524_v21, %v536_v24  ;;  %v1089_v29 = vpop.f32.mrf.mxu0 }
 0x110   : > { %v1105_v30 = vpop.f32.mrf.mxu1  ;;  %608 = vst.msk [vmem:[%s1530_s12 + $0x58] sm:$0xff] %vm596_vm3, %v575_v25  ;;  %v573_v31 = vmax.f32 %v473_v27, 0.0  ;;  %v494_v33 = vadd.f32 %v1089_v29, %v1524_v21 }
 0x111   : > { %624 = vst.msk [vmem:[%s1530_s12 + $0xd8] sm:$0xff] %vm596_vm3, %v591_v26  ;;  %v589_v32 = vmax.f32 %v537_v28, 0.0  ;;  %v558_v34 = vadd.f32 %v1105_v30, %v1524_v21  ;;  %v485_v35 = vpop.f32.mrf.mxu0 }
 0x112   : > { %v549_v36 = vpop.f32.mrf.mxu1  ;;  %606 = vst.msk [vmem:[%s1530_s12 + $0x48] sm:$0xff] %vm596_vm3, %v573_v31  ;;  %v578_v37 = vmax.f32 %v494_v33, 0.0  ;;  %v486_v39 = vadd.f32 %v1524_v21, %v485_v35 }
 0x113   : > { %622 = vst.msk [vmem:[%s1530_s12 + $0xc8] sm:$0xff] %vm596_vm3, %v589_v32  ;;  %v594_v38 = vmax.f32 %v558_v34, 0.0  ;;  %v550_v40 = vadd.f32 %v1524_v21, %v549_v36  ;;  %v1090_v41 = vpop.f32.mrf.mxu0 }
 0x114   : > { %v1106_v42 = vpop.f32.mrf.mxu1  ;;  %611 = vst.msk [vmem:[%s1530_s12 + $0x70] sm:$0xff] %vm596_vm3, %v578_v37  ;;  %v576_v43 = vmax.f32 %v486_v39, 0.0  ;;  %v497_v45 = vadd.f32 %v1090_v41, %v1524_v21 }
 0x115   : > { %627 = vst.msk [vmem:[%s1530_s12 + $0xf0] sm:$0xff] %vm596_vm3, %v594_v38  ;;  %v592_v44 = vmax.f32 %v550_v40, 0.0  ;;  %v561_v46 = vadd.f32 %v1106_v42, %v1524_v21  ;;  %v488_v47 = vpop.f32.mrf.mxu0 }
 0x116   : > { %v552_v48 = vpop.f32.mrf.mxu1  ;;  %609 = vst.msk [vmem:[%s1530_s12 + $0x60] sm:$0xff] %vm596_vm3, %v576_v43  ;;  %v579_v49 = vmax.f32 %v497_v45, 0.0  ;;  %v489_v51 = vadd.f32 %v1524_v21, %v488_v47 }
 0x117   : > { %625 = vst.msk [vmem:[%s1530_s12 + $0xe0] sm:$0xff] %vm596_vm3, %v592_v44  ;;  %v595_v50 = vmax.f32 %v561_v46, 0.0  ;;  %v553_v52 = vadd.f32 %v1524_v21, %v552_v48  ;;  %635 = sbr.rel (!%p1436_p4) target bundleno = 332 (0x14c), region = 44 }
 0x118   : > { %612 = vst.msk [vmem:[%s1530_s12 + $0x78] sm:$0xff] %vm596_vm3, %v579_v49  ;;  %v577_v53 = vmax.f32 %v489_v51, 0.0 }
 0x119   : > { %628 = vst.msk [vmem:[%s1530_s12 + $0xf8] sm:$0xff] %vm596_vm3, %v595_v50  ;;  %v593_v54 = vmax.f32 %v553_v52, 0.0 }
 0x11a   : > { %610 = vst.msk [vmem:[%s1530_s12 + $0x68] sm:$0xff] %vm596_vm3, %v577_v53 }
 0x11b   : > { %626 = vst.msk [vmem:[%s1530_s12 + $0xe8] sm:$0xff] %vm596_vm3, %v593_v54 }
 0x11c   : > { %s1779_s23 = smov (!%p638_p6, %s637_s23), 32 }
 0x11d   : > { %s1038_s28 = sshll.u32 %s1779_s23, 7 }
 0x11e   : > { %p1041_p7 = scmp.eq.s32.totalorder %s1038_s28, 0 }
 0x11f   : > { %s1637_s29 = sshrl.u32 (!%p1041_p7), %s1779_s23, 5 }
 0x120   : > { %646 = sbr.rel (%p1041_p7) target bundleno = 332 (0x14c), region = 48  ;;  %p1042_p4 = scmp.le.s32.totalorder (!%p1041_p7), %s1637_s29, 0 }
 0x125   : > { %929 = sbr.rel (%p1042_p4) target bundleno = 315 (0x13b), region = 125  ;;  %s1770_s15 = smov (!%p1042_p4), %s1631_s27 }
 0x126   : > { %s1771_s20 = smov (!%p1042_p4), %s1530_s12  ;;  %s1646_s30 = smov (!%p1042_p4), 0  }
 0x127   : > { %s1648_s4 = smov (!%p1042_p4), 0  }
 0x12a LB: >> { %v771_v21 = vld [vmem:[%s1360_s20] sm:$0xff]  ;;  %v773_v55 = vld [vmem:[%s1360_s20 + $0x8] sm:$0xff]  ;;  %v775_v56 = vld [vmem:[%s1360_s20 + $0x10] sm:$0xff]  ;;  %s835_s5 = sadd.s32 1, %s1364_s30  ;;  %s765_s4 = sadd.s32 1, %s1368_s4   ;;  %s1368_s4 = sphi %s1648_s4, %s765_s4   ;;  %s1364_s30 = sphi %s1646_s30, %s1774_s30   ;;  %s1360_s20 = sphi %s1771_s20, %s1773_s20   ;;  %s1356_s15 = sphi %s1770_s15, %s1772_s15  }
 0x12b   : >> { %772 = vst [vmem:[%s1356_s15] sm:$0xff] %v771_v21  ;;  %774 = vst [vmem:[%s1356_s15 + $0x8] sm:$0xff] %v773_v55  ;;  %v777_v57 = vld [vmem:[%s1360_s20 + $0x18] sm:$0xff]  ;;  %v779_v58 = vld [vmem:[%s1360_s20 + $0x20] sm:$0xff]  ;;  %p836_p10 = scmp.ge.s32.totalorder %s835_s5, %s1637_s29  ;;  %p764_p2 = scmp.ge.s32.totalorder %s765_s4, %s1637_s29 }
 0x12c   : >> { %776 = vst [vmem:[%s1356_s15 + $0x10] sm:$0xff] %v775_v56  ;;  %v781_v59 = vld [vmem:[%s1360_s20 + $0x28] sm:$0xff]  ;;  %778 = vst [vmem:[%s1356_s15 + $0x18] sm:$0xff] %v777_v57  ;;  %v783_v60 = vld [vmem:[%s1360_s20 + $0x30] sm:$0xff] }
 0x12d   : >> { %780 = vst [vmem:[%s1356_s15 + $0x20] sm:$0xff] %v779_v58  ;;  %782 = vst [vmem:[%s1356_s15 + $0x28] sm:$0xff] %v781_v59  ;;  %v785_v61 = vld [vmem:[%s1360_s20 + $0x38] sm:$0xff]  ;;  %v787_v62 = vld [vmem:[%s1360_s20 + $0x40] sm:$0xff]  ;;  %s1781_s5 = smov (%p836_p10, %s835_s5), 0 }
 0x12e   : >> { %784 = vst [vmem:[%s1356_s15 + $0x30] sm:$0xff] %v783_v60  ;;  %786 = vst [vmem:[%s1356_s15 + $0x38] sm:$0xff] %v785_v61  ;;  %v789_v63 = vld [vmem:[%s1360_s20 + $0x48] sm:$0xff]  ;;  %v791_v0 = vld [vmem:[%s1360_s20 + $0x50] sm:$0xff]  ;;  %s1043_s6 = sshll.u32 %s1781_s5, 8  ;;  %s1774_s30 = smov %s1781_s5 }
 0x12f   : >> { %788 = vst [vmem:[%s1356_s15 + $0x40] sm:$0xff] %v787_v62  ;;  %v793_v1 = vld [vmem:[%s1360_s20 + $0x58] sm:$0xff]  ;;  %790 = vst [vmem:[%s1356_s15 + $0x48] sm:$0xff] %v789_v63  ;;  %v795_v2 = vld [vmem:[%s1360_s20 + $0x60] sm:$0xff]  ;;  %s1704_s7 = scalar_lea.vmem %s1530_s12, %s1043_s6 [#allocation6]   ;;  %s841_s8 = scalar_lea.vmem %s1631_s27, %s1043_s6  }
 0x130   : >> { %792 = vst [vmem:[%s1356_s15 + $0x50] sm:$0xff] %v791_v0  ;;  %794 = vst [vmem:[%s1356_s15 + $0x58] sm:$0xff] %v793_v1  ;;  %v797_v3 = vld [vmem:[%s1360_s20 + $0x68] sm:$0xff]  ;;  %v799_v4 = vld [vmem:[%s1360_s20 + $0x70] sm:$0xff] }
 0x131   : >> { %796 = vst [vmem:[%s1356_s15 + $0x60] sm:$0xff] %v795_v2  ;;  %798 = vst [vmem:[%s1356_s15 + $0x68] sm:$0xff] %v797_v3  ;;  %v801_v5 = vld [vmem:[%s1360_s20 + $0x78] sm:$0xff]  ;;  %v803_v6 = vld [vmem:[%s1360_s20 + $0x80] sm:$0xff] }
 0x132   : >> { %800 = vst [vmem:[%s1356_s15 + $0x70] sm:$0xff] %v799_v4  ;;  %v805_v7 = vld [vmem:[%s1360_s20 + $0x88] sm:$0xff]  ;;  %802 = vst [vmem:[%s1356_s15 + $0x78] sm:$0xff] %v801_v5  ;;  %v807_v8 = vld [vmem:[%s1360_s20 + $0x90] sm:$0xff] }
 0x133   : >> { %804 = vst [vmem:[%s1356_s15 + $0x80] sm:$0xff] %v803_v6  ;;  %806 = vst [vmem:[%s1356_s15 + $0x88] sm:$0xff] %v805_v7  ;;  %v809_v9 = vld [vmem:[%s1360_s20 + $0x98] sm:$0xff]  ;;  %v811_v10 = vld [vmem:[%s1360_s20 + $0xa0] sm:$0xff] }
 0x134   : >> { %808 = vst [vmem:[%s1356_s15 + $0x90] sm:$0xff] %v807_v8  ;;  %810 = vst [vmem:[%s1356_s15 + $0x98] sm:$0xff] %v809_v9  ;;  %v813_v11 = vld [vmem:[%s1360_s20 + $0xa8] sm:$0xff]  ;;  %v815_v12 = vld [vmem:[%s1360_s20 + $0xb0] sm:$0xff] }
 0x135   : >> { %812 = vst [vmem:[%s1356_s15 + $0xa0] sm:$0xff] %v811_v10  ;;  %v817_v13 = vld [vmem:[%s1360_s20 + $0xb8] sm:$0xff]  ;;  %814 = vst [vmem:[%s1356_s15 + $0xa8] sm:$0xff] %v813_v11  ;;  %v819_v14 = vld [vmem:[%s1360_s20 + $0xc0] sm:$0xff] }
 0x136   : >> { %816 = vst [vmem:[%s1356_s15 + $0xb0] sm:$0xff] %v815_v12  ;;  %818 = vst [vmem:[%s1356_s15 + $0xb8] sm:$0xff] %v817_v13  ;;  %v821_v15 = vld [vmem:[%s1360_s20 + $0xc8] sm:$0xff]  ;;  %v823_v16 = vld [vmem:[%s1360_s20 + $0xd0] sm:$0xff]  ;;  %767 = sbr.rel (!%p764_p2) target bundleno = 298 (0x12a), region = 131 }
 0x137   : >> { %820 = vst [vmem:[%s1356_s15 + $0xc0] sm:$0xff] %v819_v14  ;;  %822 = vst [vmem:[%s1356_s15 + $0xc8] sm:$0xff] %v821_v15  ;;  %v825_v17 = vld [vmem:[%s1360_s20 + $0xd8] sm:$0xff]  ;;  %v827_v18 = vld [vmem:[%s1360_s20 + $0xe0] sm:$0xff] }
 0x138   : >> { %824 = vst [vmem:[%s1356_s15 + $0xd0] sm:$0xff] %v823_v16  ;;  %v829_v19 = vld [vmem:[%s1360_s20 + $0xe8] sm:$0xff]  ;;  %826 = vst [vmem:[%s1356_s15 + $0xd8] sm:$0xff] %v825_v17  ;;  %v831_v20 = vld [vmem:[%s1360_s20 + $0xf0] sm:$0xff] }
 0x139   : >> { %828 = vst [vmem:[%s1356_s15 + $0xe0] sm:$0xff] %v827_v18  ;;  %830 = vst [vmem:[%s1356_s15 + $0xe8] sm:$0xff] %v829_v19  ;;  %v833_v22 = vld [vmem:[%s1360_s20 + $0xf8] sm:$0xff]  ;;  %s1773_s20 = smov %s1704_s7 }
 0x13a   : >> { %832 = vst [vmem:[%s1356_s15 + $0xf0] sm:$0xff] %v831_v20  ;;  %834 = vst [vmem:[%s1356_s15 + $0xf8] sm:$0xff] %v833_v22  ;;  %s1772_s15 = smov %s841_s8 }
 0x13b PF: > { %s1745_s9 = sand.u32 31, %s1779_s23   ;;  %s1054_s10 = sshll.u32 %s1637_s29, 8 }
 0x13c   : > { %s846_s11 = scalar_lea.vmem %s1530_s12, %s1054_s10 [#allocation6]   ;;  %s848_s14 = scalar_lea.vmem %s1631_s27, %s1054_s10  }
 0x13d   : > { %p1048_p3 = scmp.le.s32.totalorder %s1745_s9, 0 }
 0x13e   : > { %s1370_s17 = smov (!%p1048_p3), %s848_s14   ;;  %s1374_s18 = smov (!%p1048_p3), %s846_s11  }
 0x13f   : > { %943 = sbr.rel (%p1048_p3) target bundleno = 332 (0x14c), region = 136  ;;  %s1378_s21 = smov (!%p1048_p3), 0  }
 0x140   : > { %s1382_s22 = smov (!%p1048_p3), 0  }
 0x144 LB: >> { %v858_v23 = vld [vmem:[%s1376_s18] sm:$0xff]  ;;  %s860_s23 = sadd.s32 1, %s1380_s21  ;;  %s852_s22 = sadd.s32 1, %s1384_s22   ;;  %s1384_s22 = sphi %s1382_s22, %s852_s22   ;;  %s1380_s21 = sphi %s1378_s21, %s1379_s21   ;;  %s1376_s18 = sphi %s1374_s18, %s865_s18   ;;  %s1372_s17 = sphi %s1370_s17, %s866_s17  }
 0x145   : >> { %859 = vst [vmem:[%s1372_s17] sm:$0xff] %v858_v23  ;;  %p861_p5 = scmp.ge.s32.totalorder %s860_s23, %s1745_s9  ;;  %p851_p8 = scmp.ge.s32.totalorder %s852_s22, %s1745_s9 }
 0x147   : >> { %s1783_s23 = smov (%p861_p5, %s860_s23), 0  ;;  %854 = sbr.rel (!%p851_p8) target bundleno = 324 (0x144), region = 142 }
 0x148   : >> { %s1049_s12 = sshll.u32 %s1783_s23, 3  ;;  %s1379_s21 = smov %s1783_s23  }
 0x149   : >> { %s865_s18 = scalar_lea.vmem %s846_s11, %s1049_s12 [#allocation6]   ;;  %s866_s17 = scalar_lea.vmem %s848_s14, %s1049_s12  }
 0x14c PF: > { %p12_p11 = scmp.ge.s32.totalorder %s1426_s16, 4   ;;  %s1775_s12 = smov %s1348_s13 }
 0x14d   : > { %s1776_s13 = smov %s1434_s19  ;;  %s1777_s14 = smov %s1426_s16 }
 0x14e   :  { %14 = sbr.rel (!%p12_p11) target bundleno = 3 (0x3), region = 153 }
 0x153   :  { %882 = vsyncpa [#allocation3], 1 }
 0x154   :  { %884 = vsyncpa [#allocation3 + $0x1], 1 }
 0x155   :  { %885 = vsyncpa [#allocation5], 1 }

// kernel: vae_forward.6
= control target key start
LH: loop header
LB: loop body
LE: loop exit
PB: predicated region body
PF: predicated region fallthrough
CT: control target
= control target key end

     0   :  { %v715_v1 = vmov 0.0   ;;  %vm716_vm0 = vmmov 0   ;;  %vm292_vm1 = vcmask 261120   ;;  %vm503_vm2 = vcmask 523264   ;;  %s943_s1 = inlined_call_operand.vmem [shape: bf16[288,64], index: 1, kind: input, shape index: {}]   ;;  %s944_s0 = inlined_call_operand.vmem [shape: bf16[98,288], index: 0, kind: input, shape index: {}]   ;;  %s945_s2 = inlined_call_operand.vmem [shape: f32[1,64], index: 2, kind: input, shape index: {}]   ;;  %s946_s3 = inlined_call_operand.vmem [shape: f32[98,64], index: 3, kind: output, shape index: {}]  }
   0x1   :  { %v670_v0 = vld [vmem:[%s943_s1 + $0x78] sm:$0xff]   ;;  %636 = vmatprep.subr.bf16.mxu1 %v715_v1  ;;  %640 = vmatprep.mubr.msk.bf16.mxu1 %vm716_vm0, %v715_v1  ;;  %v672_v3 = vld [vmem:[%s943_s1 + $0x70] sm:$0xff]   ;;  %v674_v5 = vld [vmem:[%s943_s1 + $0x68] sm:$0xff]   ;;  %vm516_vm3 = vcmask 517120  }
   0x2   :  { %v671_v2 = vld [vmem:[%s943_s1 + $0x38] sm:$0xff]   ;;  %569 = vmatprep.subr.bf16.mxu0 %v670_v0  ;;  %v673_v4 = vld [vmem:[%s943_s1 + $0x30] sm:$0xff]   ;;  %v675_v6 = vld [vmem:[%s943_s1 + $0x28] sm:$0xff]  }
   0x3   :  { %570 = vmatpush3.bf16.msra.mxu0 %v671_v2  ;;  %v676_v7 = vld [vmem:[%s943_s1 + $0x60] sm:$0xff]   ;;  %v678_v9 = vld [vmem:[%s943_s1 + $0x58] sm:$0xff]   ;;  %v683_v10 = vld [vmem:[%s943_s1 + $0x88] sm:$0xff]  }
   0x4   :  { %571 = vmatprep.subr.bf16.mxu0 %v672_v3  ;;  %v677_v8 = vld [vmem:[%s943_s1 + $0x20] sm:$0xff]   ;;  %v679_v11 = vld [vmem:[%s943_s1 + $0x18] sm:$0xff]   ;;  %v680_v12 = vld [vmem:[%s943_s1 + $0x50] sm:$0xff]   ;;  %637 = vmatpush3.bf16.msra.mxu1 %v683_v10 }
   0x5   :  { %638 = vmatprep.subr.bf16.mxu1 %v715_v1  ;;  %v686_v13 = vld [vmem:[%s943_s1 + $0x80] sm:$0xff]   ;;  %v681_v14 = vld [vmem:[%s943_s1 + $0x10] sm:$0xff]   ;;  %v682_v15 = vld [vmem:[%s943_s1 + $0x48] sm:$0xff]  }
   0x6   :  { %v690_v16 = vld [vmem:[%s944_s0 + $0x4] ss:$12 sps:$4 sm:$0xff]   ;;  %v691_v17 = vld [vmem:[%s944_s0 + $0x8] ss:$12 sps:$4 sm:$0xff]   ;;  %v694_v20 = vld [vmem:[%s944_s0 + $0x20] ss:$12 sps:$4 sm:$0xff]  }
   0x7   :  { %572 = vmatpush3.bf16.msra.mxu0 %v673_v4  ;;  %346 = vmatprep.mubr.bf16.mxu0 %v690_v16  ;;  %v684_v18 = vld [vmem:[%s943_s1 + $0x8] sm:$0xff]   ;;  %v685_v19 = vld [vmem:[%s943_s1 + $0x40] sm:$0xff]   ;;  %v702_v27 = vld [vmem:[%s944_s0 + $0x50] ss:$12 sps:$4 sm:$0xff]  }
   0x8   :  { %573 = vmatprep.subr.bf16.mxu0 %v674_v5  ;;  %639 = vmatpush3.bf16.msra.mxu1 %v686_v13  ;;  %v687_v21 = vld [vmem:[%s943_s1] sm:$0xff]   ;;  %v692_v23 = vld [vmem:[%s944_s0 + $0x1c] ss:$12 sps:$4 sm:$0xff]   ;;  %v700_v29 = vld [vmem:[%s944_s0 + $0x4c] ss:$12 sps:$4 sm:$0xff]  }
   0x9   :  { %v688_v22 = vld [vmem:[%s944_s0] ss:$12 sps:$4 sm:$0xff]   ;;  %v698_v24 = vld [vmem:[%s944_s0 + $0x38] ss:$12 sps:$4 sm:$0xff]   ;;  %v699_v28 = vld [vmem:[%s944_s0 + $0x30] ss:$12 sps:$4 sm:$0xff]  }
   0xa   :  { %v695_v25 = vld [vmem:[%s944_s0 + $0x18] ss:$12 sps:$4 sm:$0xff]   ;;  %v696_v26 = vld [vmem:[%s944_s0 + $0x34] ss:$12 sps:$4 sm:$0xff]   ;;  %v708_v35 = vld [vmem:[%s944_s0 + $0x7c] ss:$12 sps:$4 sm:$0xff]  }
   0xb   :  { %574 = vmatpush3.bf16.msra.mxu0 %v675_v6  ;;  %641 = vmatmul.mubr.msk.bf16.vlgmr.msra.gmra.mxu1 %vm292_vm1, %v691_v17  ;;  %v706_v30 = vld [vmem:[%s944_s0 + $0x68] ss:$12 sps:$4 sm:$0xff]   ;;  %v704_v32 = vld [vmem:[%s944_s0 + $0x64] ss:$12 sps:$4 sm:$0xff]   ;;  %v710_v33 = vld [vmem:[%s944_s0 + $0x80] ss:$12 sps:$4 sm:$0xff]  }
   0xc   :  { %575 = vmatprep.subr.bf16.mxu0 %v676_v7  ;;  %644 = vmatprep.mubr.msk.bf16.mxu1 %vm716_vm0, %v715_v1  ;;  %v703_v31 = vld [vmem:[%s944_s0 + $0x48] ss:$12 sps:$4 sm:$0xff]   ;;  %v707_v34 = vld [vmem:[%s944_s0 + $0x60] ss:$12 sps:$4 sm:$0xff]   ;;  %v711_v38 = vld [vmem:[%s944_s0 + $0x78] ss:$12 sps:$4 sm:$0xff]  }
   0xd   :  { %v713_v36 = vld [vmem:[%s944_s0 + $0x98] ss:$0 sps:$4 sm:$0x11]   ;;  %v39_v37 = vld [vmem:[%s944_s0 + $0x90] sm:$0x11] }
   0xe   :  { %v542_v39 = vcombine.high %v39_v37, %v39_v37  ;;  %v541_v40 = vcombine.low %v39_v37, %v39_v37  ;;  %v877_v49 = vld [vmem:[%s945_s2] ss:$0 sm:$0xff] }
   0xf   :  { %576 = vmatpush3.bf16.msra.mxu0 %v677_v8 }
  0x10   :  { %577 = vmatprep.subr.bf16.mxu0 %v678_v9 }
  0x13   :  { %578 = vmatpush3.bf16.msra.mxu0 %v679_v11  ;;  %645 = vmatmul.mubr.msk.bf16.gmra.mxu1 %vm292_vm1, %v694_v20 }
  0x14   :  { %579 = vmatprep.subr.bf16.mxu0 %v680_v12  ;;  %648 = vmatprep.mubr.msk.bf16.mxu1 %vm716_vm0, %v715_v1 }
  0x17   :  { %580 = vmatpush3.bf16.msra.mxu0 %v681_v14 }
  0x18   :  { %581 = vmatprep.subr.bf16.mxu0 %v682_v15 }
  0x1b   :  { %582 = vmatpush3.bf16.msra.mxu0 %v684_v18  ;;  %649 = vmatmul.mubr.msk.bf16.gmra.mxu1 %vm292_vm1, %v698_v24 }
  0x1c   :  { %583 = vmatprep.subr.bf16.mxu0 %v685_v19  ;;  %652 = vmatprep.mubr.msk.bf16.mxu1 %vm716_vm0, %v715_v1 }
  0x1f   :  { %584 = vmatpush3.bf16.msra.mxu0 %v687_v21 }
  0x22   :  { %347 = vmatmul.mubr.bf16.vlgmr.msra.gmra.mxu0 %v688_v22 }
  0x23   :  { %354 = vmatprep.mubr.bf16.mxu0 %v692_v23  ;;  %653 = vmatmul.mubr.msk.bf16.gmra.mxu1 %vm292_vm1, %v702_v27 }
  0x24   :  { %656 = vmatprep.mubr.msk.bf16.mxu1 %vm716_vm0, %v715_v1 }
  0x2a   :  { %355 = vmatmul.mubr.bf16.gmra.mxu0 %v695_v25 }
  0x2b   :  { %362 = vmatprep.mubr.bf16.mxu0 %v696_v26  ;;  %657 = vmatmul.mubr.msk.bf16.gmra.mxu1 %vm292_vm1, %v706_v30 }
  0x2c   :  { %660 = vmatprep.mubr.msk.bf16.mxu1 %vm716_vm0, %v715_v1 }
  0x32   :  { %363 = vmatmul.mubr.bf16.gmra.mxu0 %v699_v28 }
  0x33   :  { %370 = vmatprep.mubr.bf16.mxu0 %v700_v29  ;;  %661 = vmatmul.mubr.msk.bf16.gmra.mxu1 %vm292_vm1, %v710_v33 }
  0x34   :  { %664 = vmatprep.mubr.msk.bf16.mxu1 %vm716_vm0, %v715_v1 }
  0x3a   :  { %371 = vmatmul.mubr.bf16.gmra.mxu0 %v703_v31 }
  0x3b   :  { %378 = vmatprep.mubr.bf16.mxu0 %v704_v32  ;;  %665 = vmatmul.mubr.msk.bf16.gmra.mxu1 %vm292_vm1, %v713_v36 }
  0x42   :  { %379 = vmatmul.mubr.bf16.gmra.mxu0 %v707_v34 }
  0x43   :  { %386 = vmatprep.mubr.bf16.mxu0 %v708_v35 }
  0x4a   :  { %387 = vmatmul.mubr.bf16.gmra.mxu0 %v711_v38 }
  0x4b   :  { %394 = vmatprep.mubr.bf16.mxu0 %v542_v39 }
  0x52   :  { %395 = vmatmul.mubr.bf16.gmra.mxu0 %v541_v40 }
  0xcb   :  { %v436_v41 = vpop.f32.mrf.mxu1 }
  0xcd   :  { %v642_v42 = vpop.f32.mrf.mxu1 }
  0xcf   :  { %v439_v43 = vpop.f32.mrf.mxu1 }
  0xd1   :  { %v643_v44 = vpop.f32.mrf.mxu1 }
  0xd3   :  { %v444_v45 = vpop.f32.mrf.mxu1 }
  0xd5   :  { %v646_v46 = vpop.f32.mrf.mxu1 }
  0xd7   :  { %v447_v48 = vpop.f32.mrf.mxu1 }
  0xd9   :  { %v647_v51 = vpop.f32.mrf.mxu1 }
  0xdb   :  { %v452_v54 = vpop.f32.mrf.mxu1 }
  0xdd   :  { %v650_v57 = vpop.f32.mrf.mxu1 }
  0xdf   :  { %v455_v61 = vpop.f32.mrf.mxu1 }
  0xe1   :  { %v651_v1 = vpop.f32.mrf.mxu1 }
  0xe2   :  { %v585_v47 = vpop.f32.mrf.mxu0 }
  0xe3   :  { %v460_v5 = vpop.f32.mrf.mxu1 }
  0xe4   :  { %v586_v50 = vpop.f32.mrf.mxu0 }
  0xe5   :  { %v587_v52 = vadd.f32 %v586_v50, %v585_v47  ;;  %v654_v9 = vpop.f32.mrf.mxu1 }
  0xe6   :  { %v588_v53 = vpop.f32.mrf.mxu0 }
  0xe7   :  { %v349_v55 = vadd.f32 %v587_v52, %v877_v49  ;;  %v463_v13 = vpop.f32.mrf.mxu1 }
  0xe8   :  { %v589_v56 = vpop.f32.mrf.mxu0 }
  0xe9   :  { %v437_v58 = vadd.f32 %v436_v41, %v349_v55  ;;  %v590_v59 = vadd.f32 %v589_v56, %v588_v53  ;;  %v655_v17 = vpop.f32.mrf.mxu1 }
  0xea   :  { %v591_v60 = vpop.f32.mrf.mxu0 }
  0xeb   :  { %v490_v62 = vmax.f32 %v437_v58, 0.0  ;;  %v352_v63 = vadd.f32 %v590_v59, %v877_v49  ;;  %v468_v21 = vpop.f32.mrf.mxu1 }
  0xec   :  { %v592_v0 = vpop.f32.mrf.mxu0 }
  0xed   :  { %504 = vst.msk [vmem:[%s946_s3] sm:$0xff] %vm503_vm2, %v490_v62  ;;  %v440_v2 = vadd.f32 %v439_v43, %v352_v63  ;;  %v593_v3 = vadd.f32 %v592_v0, %v591_v60  ;;  %v658_v25 = vpop.f32.mrf.mxu1 }
  0xee   :  { %v594_v4 = vpop.f32.mrf.mxu0 }
  0xef   :  { %v491_v6 = vmax.f32 %v440_v2, 0.0  ;;  %v357_v7 = vadd.f32 %v593_v3, %v877_v49  ;;  %v471_v29 = vpop.f32.mrf.mxu1 }
  0xf0   :  { %v595_v8 = vpop.f32.mrf.mxu0 }
  0xf1   :  { %505 = vst.msk [vmem:[%s946_s3 + $0x8] sm:$0xff] %vm503_vm2, %v491_v6  ;;  %v445_v10 = vadd.f32 %v444_v45, %v357_v7  ;;  %v596_v11 = vadd.f32 %v595_v8, %v594_v4  ;;  %v659_v33 = vpop.f32.mrf.mxu1 }
  0xf2   :  { %v597_v12 = vpop.f32.mrf.mxu0 }
  0xf3   :  { %v492_v14 = vmax.f32 %v445_v10, 0.0  ;;  %v360_v15 = vadd.f32 %v596_v11, %v877_v49  ;;  %v476_v37 = vpop.f32.mrf.mxu1 }
  0xf4   :  { %v598_v16 = vpop.f32.mrf.mxu0 }
  0xf5   :  { %506 = vst.msk [vmem:[%s946_s3 + $0x10] sm:$0xff] %vm503_vm2, %v492_v14  ;;  %v448_v18 = vadd.f32 %v447_v48, %v360_v15  ;;  %v599_v19 = vadd.f32 %v598_v16, %v597_v12  ;;  %v662_v41 = vpop.f32.mrf.mxu1 }
  0xf6   :  { %v600_v20 = vpop.f32.mrf.mxu0 }
  0xf7   :  { %v493_v22 = vmax.f32 %v448_v18, 0.0  ;;  %v365_v23 = vadd.f32 %v599_v19, %v877_v49  ;;  %v479_v45 = vpop.f32.mrf.mxu1 }
  0xf8   :  { %v601_v24 = vpop.f32.mrf.mxu0 }
  0xf9   :  { %507 = vst.msk [vmem:[%s946_s3 + $0x18] sm:$0xff] %vm503_vm2, %v493_v22  ;;  %v453_v26 = vadd.f32 %v452_v54, %v365_v23  ;;  %v602_v27 = vadd.f32 %v601_v24, %v600_v20  ;;  %v663_v50 = vpop.f32.mrf.mxu1 }
  0xfa   :  { %v603_v28 = vpop.f32.mrf.mxu0 }
  0xfb   :  { %v494_v30 = vmax.f32 %v453_v26, 0.0  ;;  %v368_v31 = vadd.f32 %v602_v27, %v877_v49  ;;  %v484_v54 = vpop.f32.mrf.mxu1 }
  0xfc   :  { %v604_v32 = vpop.f32.mrf.mxu0 }
  0xfd   :  { %508 = vst.msk [vmem:[%s946_s3 + $0x20] sm:$0xff] %vm503_vm2, %v494_v30  ;;  %v456_v34 = vadd.f32 %v455_v61, %v368_v31  ;;  %v605_v35 = vadd.f32 %v604_v32, %v603_v28  ;;  %v666_v58 = vpop.f32.mrf.mxu1 }
  0xfe   :  { %v606_v36 = vpop.f32.mrf.mxu0 }
  0xff   :  { %v495_v38 = vmax.f32 %v456_v34, 0.0  ;;  %v373_v39 = vadd.f32 %v605_v35, %v877_v49  ;;  %v487_v62 = vpop.f32.mrf.mxu1 }
 0x100   :  { %v607_v40 = vpop.f32.mrf.mxu0 }
 0x101   :  { %509 = vst.msk [vmem:[%s946_s3 + $0x28] sm:$0xff] %vm503_vm2, %v495_v38  ;;  %v461_v42 = vadd.f32 %v460_v5, %v373_v39  ;;  %v608_v43 = vadd.f32 %v607_v40, %v606_v36  ;;  %v667_v2 = vpop.f32.mrf.mxu1 }
 0x102   :  { %v609_v44 = vpop.f32.mrf.mxu0 }
 0x103   :  { %v496_v46 = vmax.f32 %v461_v42, 0.0  ;;  %v376_v47 = vadd.f32 %v608_v43, %v877_v49 }
 0x104   :  { %v610_v48 = vpop.f32.mrf.mxu0 }
 0x105   :  { %510 = vst.msk [vmem:[%s946_s3 + $0x30] sm:$0xff] %vm503_vm2, %v496_v46  ;;  %v464_v51 = vadd.f32 %v463_v13, %v376_v47  ;;  %v611_v52 = vadd.f32 %v610_v48, %v609_v44 }
 0x106   :  { %v612_v53 = vpop.f32.mrf.mxu0 }
 0x107   :  { %v497_v55 = vmax.f32 %v464_v51, 0.0  ;;  %v381_v56 = vadd.f32 %v611_v52, %v877_v49 }
 0x108   :  { %v613_v57 = vpop.f32.mrf.mxu0 }
 0x109   :  { %511 = vst.msk [vmem:[%s946_s3 + $0x38] sm:$0xff] %vm503_vm2, %v497_v55  ;;  %v469_v59 = vadd.f32 %v468_v21, %v381_v56  ;;  %v614_v60 = vadd.f32 %v613_v57, %v612_v53 }
 0x10a   :  { %v615_v61 = vpop.f32.mrf.mxu0 }
 0x10b   :  { %v498_v63 = vmax.f32 %v469_v59, 0.0  ;;  %v384_v0 = vadd.f32 %v614_v60, %v877_v49 }
 0x10c   :  { %v616_v1 = vpop.f32.mrf.mxu0 }
 0x10d   :  { %512 = vst.msk [vmem:[%s946_s3 + $0x40] sm:$0xff] %vm503_vm2, %v498_v63  ;;  %v472_v3 = vadd.f32 %v471_v29, %v384_v0  ;;  %v617_v4 = vadd.f32 %v616_v1, %v615_v61 }
 0x10e   :  { %v618_v5 = vpop.f32.mrf.mxu0 }
 0x10f   :  { %v499_v6 = vmax.f32 %v472_v3, 0.0  ;;  %v389_v7 = vadd.f32 %v617_v4, %v877_v49 }
 0x110   :  { %v619_v8 = vpop.f32.mrf.mxu0 }
 0x111   :  { %513 = vst.msk [vmem:[%s946_s3 + $0x48] sm:$0xff] %vm503_vm2, %v499_v6  ;;  %v477_v9 = vadd.f32 %v476_v37, %v389_v7  ;;  %v620_v10 = vadd.f32 %v619_v8, %v618_v5 }
 0x112   :  { %v621_v11 = vpop.f32.mrf.mxu0 }
 0x113   :  { %v500_v12 = vmax.f32 %v477_v9, 0.0  ;;  %v392_v13 = vadd.f32 %v620_v10, %v877_v49 }
 0x114   :  { %v622_v14 = vpop.f32.mrf.mxu0 }
 0x115   :  { %514 = vst.msk [vmem:[%s946_s3 + $0x50] sm:$0xff] %vm503_vm2, %v500_v12  ;;  %v480_v15 = vadd.f32 %v479_v45, %v392_v13  ;;  %v623_v16 = vadd.f32 %v622_v14, %v621_v11 }
 0x116   :  { %v624_v17 = vpop.f32.mrf.mxu0 }
 0x117   :  { %v501_v18 = vmax.f32 %v480_v15, 0.0  ;;  %v397_v19 = vadd.f32 %v623_v16, %v877_v49 }
 0x118   :  { %v625_v20 = vpop.f32.mrf.mxu0 }
 0x119   :  { %515 = vst.msk [vmem:[%s946_s3 + $0x58] sm:$0xff] %vm503_vm2, %v501_v18  ;;  %v485_v21 = vadd.f32 %v484_v54, %v397_v19 }
 0x11b   :  { %v502_v22 = vmax.f32 %v485_v21, 0.0 }
 0x11d   :  { %517 = vst.msk [vmem:[%s946_s3 + $0x60] sm:$0x3] %vm516_vm3, %v502_v22 }

// kernel: vae_forward.8
= control target key start
LH: loop header
LB: loop body
LE: loop exit
PB: predicated region body
PF: predicated region fallthrough
CT: control target
= control target key end

     0   :  { %v1167_v34 = vmov 0.0   ;;  %vm1168_vm0 = vmmov 0   ;;  %vm516_vm1 = vcmask 523264   ;;  %s1554_s1 = inlined_call_operand.vmem [shape: bf16[576,128], index: 1, kind: input, shape index: {}]   ;;  %s1555_s0 = inlined_call_operand.vmem [shape: bf16[98,576], index: 0, kind: input, shape index: {}]   ;;  %s1556_s2 = inlined_call_operand.vmem [shape: f32[1,128], index: 2, kind: input, shape index: {}]   ;;  %s1557_s3 = inlined_call_operand.vmem [shape: f32[98,128], index: 3, kind: output, shape index: {}]  }
   0x1   :  { %v1084_v0 = vld [vmem:[%s1554_s1 + $0x78] sm:$0xff]   ;;  %v1088_v4 = vld [vmem:[%s1554_s1 + $0x70] sm:$0xff]   ;;  %v1092_v8 = vld [vmem:[%s1554_s1 + $0x68] sm:$0xff]  }
   0x2   :  { %v1085_v1 = vld [vmem:[%s1554_s1 + $0xf8] sm:$0xff]   ;;  %911 = vmatprep.subr.bf16.mxu0 %v1084_v0  ;;  %v1089_v5 = vld [vmem:[%s1554_s1 + $0xf0] sm:$0xff]   ;;  %v1093_v9 = vld [vmem:[%s1554_s1 + $0xe8] sm:$0xff]  }
   0x3   :  { %v1086_v2 = vld [vmem:[%s1554_s1 + $0x38] sm:$0xff]   ;;  %969 = vmatprep.subr.bf16.mxu1 %v1085_v1  ;;  %v1090_v6 = vld [vmem:[%s1554_s1 + $0x30] sm:$0xff]   ;;  %v1094_v10 = vld [vmem:[%s1554_s1 + $0x28] sm:$0xff]  }
   0x4   :  { %v1087_v3 = vld [vmem:[%s1554_s1 + $0xb8] sm:$0xff]   ;;  %912 = vmatpush3.bf16.msra.mxu0 %v1086_v2  ;;  %v1091_v7 = vld [vmem:[%s1554_s1 + $0xb0] sm:$0xff]   ;;  %v1095_v11 = vld [vmem:[%s1554_s1 + $0xa8] sm:$0xff]  }
   0x5   :  { %970 = vmatpush3.bf16.msra.mxu1 %v1087_v3  ;;  %913 = vmatprep.subr.bf16.mxu0 %v1088_v4  ;;  %v1096_v12 = vld [vmem:[%s1554_s1 + $0x60] sm:$0xff]   ;;  %v1100_v16 = vld [vmem:[%s1554_s1 + $0x58] sm:$0xff]   ;;  %v1104_v20 = vld [vmem:[%s1554_s1 + $0x50] sm:$0xff]  }
   0x6   :  { %971 = vmatprep.subr.bf16.mxu1 %v1089_v5  ;;  %v1097_v13 = vld [vmem:[%s1554_s1 + $0xe0] sm:$0xff]   ;;  %v1101_v17 = vld [vmem:[%s1554_s1 + $0xd8] sm:$0xff]   ;;  %v1105_v21 = vld [vmem:[%s1554_s1 + $0xd0] sm:$0xff]  }
   0x7   :  { %v1098_v14 = vld [vmem:[%s1554_s1 + $0x20] sm:$0xff]   ;;  %v1102_v18 = vld [vmem:[%s1554_s1 + $0x18] sm:$0xff]   ;;  %v1106_v22 = vld [vmem:[%s1554_s1 + $0x10] sm:$0xff]  }
   0x8   :  { %914 = vmatpush3.bf16.msra.mxu0 %v1090_v6  ;;  %v1099_v15 = vld [vmem:[%s1554_s1 + $0xa0] sm:$0xff]   ;;  %v1103_v19 = vld [vmem:[%s1554_s1 + $0x98] sm:$0xff]   ;;  %v1107_v23 = vld [vmem:[%s1554_s1 + $0x90] sm:$0xff]  }
   0x9   :  { %972 = vmatpush3.bf16.msra.mxu1 %v1091_v7  ;;  %915 = vmatprep.subr.bf16.mxu0 %v1092_v8  ;;  %v1108_v24 = vld [vmem:[%s1554_s1 + $0x48] sm:$0xff]   ;;  %v1112_v28 = vld [vmem:[%s1554_s1 + $0x40] sm:$0xff]   ;;  %v1122_v37 = vld [vmem:[%s1554_s1 + $0x118] sm:$0xff]  }
   0xa   :  { %973 = vmatprep.subr.bf16.mxu1 %v1093_v9  ;;  %v1109_v25 = vld [vmem:[%s1554_s1 + $0xc8] sm:$0xff]   ;;  %v1113_v29 = vld [vmem:[%s1554_s1 + $0xc0] sm:$0xff]   ;;  %v1133_v43 = vld [vmem:[%s1554_s1 + $0x110] sm:$0xff]  }
   0xb   :  { %v1110_v26 = vld [vmem:[%s1554_s1 + $0x8] sm:$0xff]   ;;  %v1114_v30 = vld [vmem:[%s1554_s1] sm:$0xff]   ;;  %v1131_v44 = vld [vmem:[%s1555_s0 + $0x5c] ss:$20 sps:$4 sm:$0xff]  }
   0xc   :  { %916 = vmatpush3.bf16.msra.mxu0 %v1094_v10  ;;  %v1111_v27 = vld [vmem:[%s1554_s1 + $0x88] sm:$0xff]   ;;  %v1115_v31 = vld [vmem:[%s1554_s1 + $0x80] sm:$0xff]   ;;  %v1136_v48 = vld [vmem:[%s1555_s0 + $0x7c] ss:$20 sps:$4 sm:$0xff]  }
   0xd   :  { %974 = vmatpush3.bf16.msra.mxu1 %v1095_v11  ;;  %917 = vmatprep.subr.bf16.mxu0 %v1096_v12  ;;  %v1116_v32 = vld [vmem:[%s1555_s0] ss:$20 sps:$4 sm:$0xff]   ;;  %v1118_v33 = vld [vmem:[%s1555_s0 + $0x4] ss:$20 sps:$4 sm:$0xff]   ;;  %v1119_v35 = vld [vmem:[%s1555_s0 + $0x8] ss:$20 sps:$4 sm:$0xff]  }
   0xe   :  { %975 = vmatprep.subr.bf16.mxu1 %v1097_v13  ;;  %v1121_v36 = vld [vmem:[%s1555_s0 + $0xc] ss:$20 sps:$4 sm:$0xff]   ;;  %570 = vmatprep.mubr.bf16.mxu0 %v1118_v33  ;;  %v1125_v39 = vld [vmem:[%s1555_s0 + $0x34] ss:$20 sps:$4 sm:$0xff]   ;;  %v1128_v41 = vld [vmem:[%s1555_s0 + $0x30] ss:$20 sps:$4 sm:$0xff]  }
   0xf   :  { %658 = vmatprep.mubr.bf16.mxu1 %v1121_v36  ;;  %v1123_v38 = vld [vmem:[%s1555_s0 + $0x2c] ss:$20 sps:$4 sm:$0xff]   ;;  %v1127_v40 = vld [vmem:[%s1555_s0 + $0x28] ss:$20 sps:$4 sm:$0xff]   ;;  %v1134_v46 = vld [vmem:[%s1555_s0 + $0x50] ss:$20 sps:$4 sm:$0xff]  }
  0x10   :  { %918 = vmatpush3.bf16.msra.mxu0 %v1098_v14  ;;  %v1129_v42 = vld [vmem:[%s1555_s0 + $0x54] ss:$20 sps:$4 sm:$0xff]   ;;  %v1135_v47 = vld [vmem:[%s1555_s0 + $0x58] ss:$20 sps:$4 sm:$0xff]   ;;  %v1155_v50 = vld [vmem:[%s1554_s1 + $0x100] sm:$0xff]  }
  0x11   :  { %976 = vmatpush3.bf16.msra.mxu1 %v1099_v15  ;;  %919 = vmatprep.subr.bf16.mxu0 %v1100_v16  ;;  %v1142_v45 = vld [vmem:[%s1554_s1 + $0x108] sm:$0xff]   ;;  %v1138_v49 = vld [vmem:[%s1555_s0 + $0x84] ss:$20 sps:$4 sm:$0xff]   ;;  %v1141_v52 = vld [vmem:[%s1555_s0 + $0x80] ss:$20 sps:$4 sm:$0xff]  }
  0x12   :  { %977 = vmatprep.subr.bf16.mxu1 %v1101_v17  ;;  %v1140_v51 = vld [vmem:[%s1555_s0 + $0x78] ss:$20 sps:$4 sm:$0xff]   ;;  %v1147_v55 = vld [vmem:[%s1555_s0 + $0xa0] ss:$20 sps:$4 sm:$0xff]   ;;  %v1148_v56 = vld [vmem:[%s1555_s0 + $0xa8] ss:$20 sps:$4 sm:$0xff]  }
  0x13   :  { %v1143_v53 = vld [vmem:[%s1555_s0 + $0xa4] ss:$20 sps:$4 sm:$0xff]   ;;  %v1145_v54 = vld [vmem:[%s1555_s0 + $0xac] ss:$20 sps:$4 sm:$0xff]   ;;  %v1151_v58 = vld [vmem:[%s1555_s0 + $0xd4] ss:$20 sps:$4 sm:$0xff]  }
  0x14   :  { %920 = vmatpush3.bf16.msra.mxu0 %v1102_v18  ;;  %v1149_v57 = vld [vmem:[%s1555_s0 + $0xcc] ss:$20 sps:$4 sm:$0xff]   ;;  %v51_v59 = vld [vmem:[%s1555_s0 + $0xf0] sm:$0x11]  ;;  %v52_v60 = vld [vmem:[%s1555_s0 + $0xf8] sm:$0x11] }
  0x15   :  { %978 = vmatpush3.bf16.msra.mxu1 %v1103_v19  ;;  %921 = vmatprep.subr.bf16.mxu0 %v1104_v20  ;;  %v1153_v61 = vld [vmem:[%s1555_s0 + $0xc8] ss:$20 sps:$4 sm:$0xff]   ;;  %v1154_v62 = vld [vmem:[%s1555_s0 + $0xd0] ss:$20 sps:$4 sm:$0xff]   ;;  %v864_v63 = vcombine.high %v51_v59, %v51_v59  ;;  %v866_v0 = vcombine.high %v52_v60, %v52_v60  ;;  %v863_v1 = vcombine.low %v51_v59, %v51_v59  ;;  %v1162_v5 = vld [vmem:[%s1555_s0 + $0x38] ss:$20 sps:$4 sm:$0xff]  }
  0x16   :  { %979 = vmatprep.subr.bf16.mxu1 %v1105_v21  ;;  %v865_v2 = vcombine.low %v52_v60, %v52_v60  ;;  %v1160_v3 = vld [vmem:[%s1555_s0 + $0x10] ss:$20 sps:$4 sm:$0xff]   ;;  %v1163_v6 = vld [vmem:[%s1555_s0 + $0xd8] ss:$20 sps:$4 sm:$0xff]   ;;  %v1164_v7 = vld [vmem:[%s1555_s0 + $0x60] ss:$20 sps:$4 sm:$0xff]  }
  0x17   :  { %v1161_v4 = vld [vmem:[%s1555_s0 + $0xb0] ss:$20 sps:$4 sm:$0xff]   ;;  %v1165_v8 = vld [vmem:[%s1555_s0 + $0x100] ss:$0 sps:$4 sm:$0x11]  }
  0x18   :  { %922 = vmatpush3.bf16.msra.mxu0 %v1106_v22  ;;  %v1166_v9 = vld [vmem:[%s1555_s0 + $0x88] ss:$20 sps:$4 sm:$0xff]   ;;  %v1472_v59 = vld [vmem:[%s1556_s2] ss:$0 sm:$0xff] }
  0x19   :  { %980 = vmatpush3.bf16.msra.mxu1 %v1107_v23  ;;  %923 = vmatprep.subr.bf16.mxu0 %v1108_v24 }
  0x1a   :  { %981 = vmatprep.subr.bf16.mxu1 %v1109_v25 }
  0x1c   :  { %924 = vmatpush3.bf16.msra.mxu0 %v1110_v26 }
  0x1d   :  { %982 = vmatpush3.bf16.msra.mxu1 %v1111_v27  ;;  %925 = vmatprep.subr.bf16.mxu0 %v1112_v28 }
  0x1e   :  { %983 = vmatprep.subr.bf16.mxu1 %v1113_v29 }
  0x20   :  { %926 = vmatpush3.bf16.msra.mxu0 %v1114_v30 }
  0x21   :  { %984 = vmatpush3.bf16.msra.mxu1 %v1115_v31  ;;  %1038 = vmatprep.subr.bf16.mxu0 %v1167_v34 }
  0x22   :  { %1074 = vmatprep.subr.bf16.mxu1 %v1167_v34 }
  0x23   :  { %571 = vmatmul.mubr.bf16.vlgmr.msra.gmra.mxu0 %v1116_v32 }
  0x24   :  { %659 = vmatmul.mubr.bf16.vlgmr.msra.gmra.mxu1 %v1119_v35  ;;  %1039 = vmatpush3.bf16.msra.mxu0 %v1122_v37 }
  0x25   :  { %578 = vmatprep.mubr.bf16.mxu0 %v1123_v38  ;;  %1078 = vmatpush3.bf16.msra.mxu1 %v1122_v37 }
  0x26   :  { %666 = vmatprep.mubr.bf16.mxu1 %v1125_v39  ;;  %1040 = vmatprep.subr.bf16.mxu0 %v1167_v34 }
  0x27   :  { %1075 = vmatprep.subr.bf16.mxu1 %v1167_v34 }
  0x28   :  { %1041 = vmatpush3.bf16.msra.mxu0 %v1133_v43 }
  0x29   :  { %1079 = vmatpush3.bf16.msra.mxu1 %v1133_v43  ;;  %1042 = vmatprep.subr.bf16.mxu0 %v1167_v34 }
  0x2a   :  { %1076 = vmatprep.subr.bf16.mxu1 %v1167_v34 }
  0x2b   :  { %579 = vmatmul.mubr.bf16.gmra.mxu0 %v1127_v40 }
  0x2c   :  { %667 = vmatmul.mubr.bf16.gmra.mxu1 %v1128_v41  ;;  %586 = vmatprep.mubr.bf16.mxu0 %v1129_v42 }
  0x2d   :  { %674 = vmatprep.mubr.bf16.mxu1 %v1131_v44  ;;  %1043 = vmatpush3.bf16.msra.mxu0 %v1142_v45 }
  0x2e   :  { %1080 = vmatpush3.bf16.msra.mxu1 %v1142_v45  ;;  %1044 = vmatprep.subr.bf16.mxu0 %v1167_v34 }
  0x2f   :  { %1077 = vmatprep.subr.bf16.mxu1 %v1167_v34 }
  0x31   :  { %1045 = vmatpush3.bf16.msra.mxu0 %v1155_v50 }
  0x32   :  { %1081 = vmatpush3.bf16.msra.mxu1 %v1155_v50 }
  0x33   :  { %587 = vmatmul.mubr.bf16.gmra.mxu0 %v1134_v46 }
  0x34   :  { %675 = vmatmul.mubr.bf16.gmra.mxu1 %v1135_v47  ;;  %594 = vmatprep.mubr.bf16.mxu0 %v1136_v48 }
  0x35   :  { %682 = vmatprep.mubr.bf16.mxu1 %v1138_v49 }
  0x3b   :  { %595 = vmatmul.mubr.bf16.gmra.mxu0 %v1140_v51 }
  0x3c   :  { %683 = vmatmul.mubr.bf16.gmra.mxu1 %v1141_v52  ;;  %602 = vmatprep.mubr.bf16.mxu0 %v1143_v53 }
  0x3d   :  { %690 = vmatprep.mubr.bf16.mxu1 %v1145_v54 }
  0x43   :  { %603 = vmatmul.mubr.bf16.gmra.mxu0 %v1147_v55 }
  0x44   :  { %691 = vmatmul.mubr.bf16.gmra.mxu1 %v1148_v56  ;;  %610 = vmatprep.mubr.bf16.mxu0 %v1149_v57 }
  0x45   :  { %698 = vmatprep.mubr.bf16.mxu1 %v1151_v58 }
  0x4b   :  { %611 = vmatmul.mubr.bf16.gmra.mxu0 %v1153_v61 }
  0x4c   :  { %699 = vmatmul.mubr.bf16.gmra.mxu1 %v1154_v62  ;;  %618 = vmatprep.mubr.bf16.mxu0 %v864_v63 }
  0x4d   :  { %706 = vmatprep.mubr.bf16.mxu1 %v866_v0 }
  0x53   :  { %619 = vmatmul.mubr.bf16.gmra.mxu0 %v863_v1 }
  0x54   :  { %707 = vmatmul.mubr.bf16.gmra.mxu1 %v865_v2  ;;  %1046 = vmatprep.mubr.msk.bf16.mxu0 %vm1168_vm0, %v1167_v34 }
  0x55   :  { %1062 = vmatprep.mubr.msk.bf16.mxu1 %vm1168_vm0, %v1167_v34 }
  0x5b   :  { %1047 = vmatmul.mubr.msk.bf16.vlgmr.msra.gmra.mxu0 %vm516_vm1, %v1160_v3 }
  0x5c   :  { %1063 = vmatmul.mubr.msk.bf16.vlgmr.msra.gmra.mxu1 %vm516_vm1, %v1161_v4  ;;  %1050 = vmatprep.mubr.msk.bf16.mxu0 %vm1168_vm0, %v1167_v34 }
  0x5d   :  { %1066 = vmatprep.mubr.msk.bf16.mxu1 %vm1168_vm0, %v1167_v34 }
  0x63   :  { %1051 = vmatmul.mubr.msk.bf16.gmra.mxu0 %vm516_vm1, %v1162_v5 }
  0x64   :  { %1067 = vmatmul.mubr.msk.bf16.gmra.mxu1 %vm516_vm1, %v1163_v6  ;;  %1054 = vmatprep.mubr.msk.bf16.mxu0 %vm1168_vm0, %v1167_v34 }
  0x65   :  { %1070 = vmatprep.mubr.msk.bf16.mxu1 %vm1168_vm0, %v1167_v34 }
  0x6b   :  { %1055 = vmatmul.mubr.msk.bf16.gmra.mxu0 %vm516_vm1, %v1164_v7 }
  0x6c   :  { %1071 = vmatmul.mubr.msk.bf16.gmra.mxu1 %vm516_vm1, %v1165_v8  ;;  %1058 = vmatprep.mubr.msk.bf16.mxu0 %vm1168_vm0, %v1167_v34 }
  0x73   :  { %1059 = vmatmul.mubr.msk.bf16.gmra.mxu0 %vm516_vm1, %v1166_v9 }
  0xe3   :  { %v927_v10 = vpop.f32.mrf.mxu0 }
  0xe4   :  { %v985_v11 = vpop.f32.mrf.mxu1 }
  0xe5   :  { %v928_v12 = vpop.f32.mrf.mxu0 }
  0xe6   :  { %v986_v13 = vpop.f32.mrf.mxu1  ;;  %v929_v57 = vadd.f32 %v928_v12, %v927_v10 }
  0xe7   :  { %v930_v14 = vpop.f32.mrf.mxu0  ;;  %v987_v2 = vadd.f32 %v986_v13, %v985_v11 }
  0xe8   :  { %v988_v15 = vpop.f32.mrf.mxu1  ;;  %v573_v1 = vadd.f32 %v929_v57, %v1472_v59 }
  0xe9   :  { %v931_v16 = vpop.f32.mrf.mxu0 }
  0xea   :  { %v989_v17 = vpop.f32.mrf.mxu1  ;;  %v932_v63 = vadd.f32 %v931_v16, %v930_v14  ;;  %v661_v14 = vadd.f32 %v987_v2, %v573_v1 }
  0xeb   :  { %v933_v18 = vpop.f32.mrf.mxu0  ;;  %v990_v10 = vadd.f32 %v989_v17, %v988_v15 }
  0xec   :  { %v1425_v19 = vpop.f32.mrf.mxu1  ;;  %v576_v9 = vadd.f32 %v932_v63, %v1472_v59 }
  0xed   :  { %v934_v20 = vpop.f32.mrf.mxu0 }
  0xee   :  { %v1427_v21 = vpop.f32.mrf.mxu1  ;;  %v935_v12 = vadd.f32 %v934_v20, %v933_v18  ;;  %v664_v15 = vadd.f32 %v990_v10, %v576_v9 }
  0xef   :  { %v1429_v22 = vpop.f32.mrf.mxu0 }
  0xf0   :  { %v1431_v23 = vpop.f32.mrf.mxu1 }
  0xf1   :  { %v1433_v24 = vpop.f32.mrf.mxu0 }
  0xf2   :  { %v1435_v25 = vpop.f32.mrf.mxu1  ;;  %v938_v17 = vadd.f32 %v1433_v24, %v1429_v22 }
  0xf3   :  { %v1437_v26 = vpop.f32.mrf.mxu0 }
  0xf4   :  { %v1439_v27 = vpop.f32.mrf.mxu1 }
  0xf5   :  { %v1441_v28 = vpop.f32.mrf.mxu0 }
  0xf6   :  { %v1443_v29 = vpop.f32.mrf.mxu1 }
  0xf7   :  { %v1445_v30 = vpop.f32.mrf.mxu0 }
  0xf8   :  { %v1447_v31 = vpop.f32.mrf.mxu1 }
  0xf9   :  { %v1449_v32 = vpop.f32.mrf.mxu0 }
  0xfa   :  { %v1451_v33 = vpop.f32.mrf.mxu1 }
  0xfb   :  { %v1453_v34 = vpop.f32.mrf.mxu0 }
  0xfc   :  { %v1455_v35 = vpop.f32.mrf.mxu1 }
  0xfd   :  { %v1457_v36 = vpop.f32.mrf.mxu0 }
  0xfe   :  { %v1459_v37 = vpop.f32.mrf.mxu1 }
  0xff   :  { %v1461_v38 = vpop.f32.mrf.mxu0 }
 0x100   :  { %v1463_v39 = vpop.f32.mrf.mxu1 }
 0x101   :  { %1558 = vst [vmem:[#allocation2_spill] sm:$0xff] %v1463_v39  ;;  %v1465_v40 = vpop.f32.mrf.mxu0 }
 0x102   :  { %1559 = vst [vmem:[#allocation3_spill] sm:$0xff] %v1465_v40  ;;  %v1467_v41 = vpop.f32.mrf.mxu1 }
 0x103   :  { %1560 = vst [vmem:[#allocation4_spill] sm:$0xff] %v1467_v41  ;;  %v951_v42 = vpop.f32.mrf.mxu0 }
 0x104   :  { %v1009_v43 = vpop.f32.mrf.mxu1 }
 0x105   :  { %v952_v44 = vpop.f32.mrf.mxu0 }
 0x106   :  { %v1010_v45 = vpop.f32.mrf.mxu1  ;;  %v953_v60 = vadd.f32 %v952_v44, %v951_v42 }
 0x107   :  { %v954_v46 = vpop.f32.mrf.mxu0  ;;  %v1011_v5 = vadd.f32 %v1010_v45, %v1009_v43  ;;  %v581_v43 = vadd.f32 %v935_v12, %v1472_v59  ;;  %v993_v45 = vadd.f32 %v1427_v21, %v1425_v19 }
 0x108   :  { %v1012_v47 = vpop.f32.mrf.mxu1  ;;  %v605_v4 = vadd.f32 %v953_v60, %v1472_v59 }
 0x109   :  { %v955_v48 = vpop.f32.mrf.mxu0 }
 0x10a   :  { %v1013_v49 = vpop.f32.mrf.mxu1  ;;  %v956_v6 = vadd.f32 %v955_v48, %v954_v46  ;;  %v693_v13 = vadd.f32 %v1011_v5, %v605_v4 }
 0x10b   :  { %v957_v50 = vpop.f32.mrf.mxu0  ;;  %v1014_v57 = vadd.f32 %v1013_v49, %v1012_v47 }
 0x10c   :  { %v1015_v51 = vpop.f32.mrf.mxu1  ;;  %v608_v16 = vadd.f32 %v956_v6, %v1472_v59 }
 0x10d   :  { %v958_v52 = vpop.f32.mrf.mxu0 }
 0x10e   :  { %v1016_v53 = vpop.f32.mrf.mxu1  ;;  %v959_v44 = vadd.f32 %v958_v52, %v957_v50  ;;  %v696_v60 = vadd.f32 %v1014_v57, %v608_v16 }
 0x10f   :  { %v960_v54 = vpop.f32.mrf.mxu0  ;;  %v1017_v20 = vadd.f32 %v1016_v53, %v1015_v51  ;;  %v584_v51 = vadd.f32 %v938_v17, %v1472_v59  ;;  %v941_v53 = vadd.f32 %v1441_v28, %v1437_v26  ;;  %v1561_v17 = vld [vmem:[#allocation3_spill] sm:$0xff] }
 0x110   :  { %v1018_v55 = vpop.f32.mrf.mxu1  ;;  %v613_v18 = vadd.f32 %v959_v44, %v1472_v59 }
 0x111   :  { %v961_v56 = vpop.f32.mrf.mxu0 }
 0x112   :  { %v1019_v58 = vpop.f32.mrf.mxu1  ;;  %v962_v49 = vadd.f32 %v961_v56, %v960_v54  ;;  %v701_v63 = vadd.f32 %v1017_v20, %v613_v18  ;;  %v950_v18 = vadd.f32 %v1561_v17, %v1461_v38 }
 0x113   :  { %v963_v61 = vpop.f32.mrf.mxu0  ;;  %v1020_v2 = vadd.f32 %v1019_v58, %v1018_v55  ;;  %v589_v55 = vadd.f32 %v941_v53, %v1472_v59  ;;  %v999_v58 = vadd.f32 %v1443_v29, %v1439_v27  ;;  %v1002_v27 = vadd.f32 %v1451_v33, %v1447_v31 }
 0x114   :  { %v1474_v62 = vpop.f32.mrf.mxu1  ;;  %v616_v1 = vadd.f32 %v962_v49, %v1472_v59 }
 0x115   :  { %v964_v0 = vpop.f32.mrf.mxu0 }
 0x116   :  { %v1477_v3 = vpop.f32.mrf.mxu1  ;;  %v965_v4 = vadd.f32 %v964_v0, %v963_v61  ;;  %v704_v12 = vadd.f32 %v1020_v2, %v616_v1 }
 0x117   :  { %v966_v7 = vpop.f32.mrf.mxu0  ;;  %v1023_v10 = vadd.f32 %v1477_v3, %v1474_v62  ;;  %v947_v3 = vadd.f32 %v1457_v36, %v1453_v34  ;;  %v1005_v36 = vadd.f32 %v1459_v37, %v1455_v35  ;;  %v600_v35 = vadd.f32 %v950_v18, %v1472_v59  ;;  %v1562_v37 = vld [vmem:[#allocation2_spill] sm:$0xff] }
 0x118   :  { %v1024_v8 = vpop.f32.mrf.mxu1  ;;  %v944_v7 = vadd.f32 %v1449_v32, %v1445_v30  ;;  %v621_v9 = vadd.f32 %v965_v4, %v1472_v59 }
 0x119   :  { %v967_v42 = vpop.f32.mrf.mxu0  ;;  %v597_v34 = vadd.f32 %v947_v3, %v1472_v59 }
 0x11a   :  { %v1025_v41 = vpop.f32.mrf.mxu1 }
 0x11b   :  { %v748_v11 = vpop.f32.mrf.mxu0 }
 0x11c   :  { %v749_v39 = vadd.f32 %v748_v11, %v661_v14  ;;  %v780_v40 = vpop.f32.mrf.mxu1  ;;  %v592_v14 = vadd.f32 %v944_v7, %v1472_v59  ;;  %v677_v11 = vadd.f32 %v999_v58, %v589_v55 }
 0x11d   :  { %v781_v46 = vadd.f32 %v780_v40, %v693_v13  ;;  %v1048_v48 = vpop.f32.mrf.mxu0  ;;  %v996_v40 = vadd.f32 %v1435_v25, %v1431_v23 }
 0x11e   :  { %v802_v41 = vmax.f32 %v749_v39, 0.0  ;;  %v1064_v47 = vpop.f32.mrf.mxu1  ;;  %v669_v39 = vadd.f32 %v993_v45, %v581_v43  ;;  %v709_v45 = vadd.f32 %v1023_v10, %v621_v9 }
 0x11f   :  { %v810_v50 = vmax.f32 %v781_v46, 0.0  ;;  %v751_v52 = vpop.f32.mrf.mxu0  ;;  %v672_v8 = vadd.f32 %v996_v40, %v584_v51  ;;  %v685_v40 = vadd.f32 %v1005_v36, %v597_v34 }
 0x120   :  { %815 = vst [vmem:[%s1557_s3] sm:$0xff] %v802_v41  ;;  %v752_v19 = vadd.f32 %v751_v52, %v664_v15  ;;  %v783_v21 = vpop.f32.mrf.mxu1  ;;  %v680_v15 = vadd.f32 %v1002_v27, %v592_v14 }
 0x121   :  { %823 = vst [vmem:[%s1557_s3 + $0x40] sm:$0xff] %v810_v50  ;;  %v784_v22 = vadd.f32 %v783_v21, %v696_v60  ;;  %v1049_v24 = vpop.f32.mrf.mxu0 }
 0x122   :  { %v803_v54 = vmax.f32 %v752_v19, 0.0  ;;  %v1065_v56 = vpop.f32.mrf.mxu1  ;;  %v1563_v19 = vld [vmem:[#allocation4_spill] sm:$0xff] }
 0x123   :  { %v811_v23 = vmax.f32 %v784_v22, 0.0  ;;  %v756_v25 = vpop.f32.mrf.mxu0  ;;  %v1008_v38 = vadd.f32 %v1563_v19, %v1562_v37 }
 0x124   :  { %816 = vst [vmem:[%s1557_s3 + $0x8] sm:$0xff] %v803_v54  ;;  %v757_v5 = vadd.f32 %v756_v25, %v669_v39  ;;  %v788_v6 = vpop.f32.mrf.mxu1 }
 0x125   :  { %824 = vst [vmem:[%s1557_s3 + $0x48] sm:$0xff] %v811_v23  ;;  %v789_v26 = vadd.f32 %v788_v6, %v701_v63  ;;  %v1052_v28 = vpop.f32.mrf.mxu0  ;;  %v688_v54 = vadd.f32 %v1008_v38, %v600_v35 }
 0x126   :  { %v804_v61 = vmax.f32 %v757_v5, 0.0  ;;  %v1068_v0 = vpop.f32.mrf.mxu1 }
 0x127   :  { %v812_v30 = vmax.f32 %v789_v26, 0.0  ;;  %v759_v32 = vpop.f32.mrf.mxu0 }
 0x128   :  { %817 = vst [vmem:[%s1557_s3 + $0x10] sm:$0xff] %v804_v61  ;;  %v760_v42 = vadd.f32 %v759_v32, %v672_v8  ;;  %v791_v44 = vpop.f32.mrf.mxu1 }
 0x129   :  { %825 = vst [vmem:[%s1557_s3 + $0x50] sm:$0xff] %v812_v30  ;;  %v792_v29 = vadd.f32 %v791_v44, %v704_v12  ;;  %v1053_v62 = vpop.f32.mrf.mxu0 }
 0x12a   :  { %v805_v16 = vmax.f32 %v760_v42, 0.0  ;;  %v1069_v57 = vpop.f32.mrf.mxu1 }
 0x12b   :  { %v813_v13 = vmax.f32 %v792_v29, 0.0  ;;  %v764_v43 = vpop.f32.mrf.mxu0 }
 0x12c   :  { %818 = vst [vmem:[%s1557_s3 + $0x18] sm:$0xff] %v805_v16  ;;  %v765_v31 = vadd.f32 %v764_v43, %v677_v11  ;;  %v796_v33 = vpop.f32.mrf.mxu1 }
 0x12d   :  { %826 = vst [vmem:[%s1557_s3 + $0x58] sm:$0xff] %v813_v13  ;;  %v797_v46 = vadd.f32 %v796_v33, %v709_v45  ;;  %v1056_v48 = vpop.f32.mrf.mxu0 }
 0x12e   :  { %v806_v20 = vmax.f32 %v765_v31, 0.0  ;;  %v1072_v41 = vpop.f32.mrf.mxu1 }
 0x12f   :  { %v814_v47 = vmax.f32 %v797_v46, 0.0  ;;  %v767_v49 = vpop.f32.mrf.mxu0 }
 0x130   :  { %819 = vst [vmem:[%s1557_s3 + $0x20] sm:$0xff] %v806_v20  ;;  %v768_v50 = vadd.f32 %v767_v49, %v680_v15  ;;  %v799_v52 = vpop.f32.mrf.mxu1 }
 0x131   :  { %827 = vst [vmem:[%s1557_s3 + $0x60] sm:$0x3] %v814_v47  ;;  %v1057_v60 = vpop.f32.mrf.mxu0 }
 0x132   :  { %v807_v21 = vmax.f32 %v768_v50, 0.0  ;;  %v1073_v22 = vpop.f32.mrf.mxu1 }
 0x133   :  { %v772_v24 = vpop.f32.mrf.mxu0 }
 0x134   :  { %820 = vst [vmem:[%s1557_s3 + $0x28] sm:$0xff] %v807_v21  ;;  %v773_v39 = vadd.f32 %v772_v24, %v685_v40 }
 0x135   :  { %v1060_v51 = vpop.f32.mrf.mxu0 }
 0x136   :  { %v808_v53 = vmax.f32 %v773_v39, 0.0 }
 0x137   :  { %v775_v56 = vpop.f32.mrf.mxu0 }
 0x138   :  { %821 = vst [vmem:[%s1557_s3 + $0x30] sm:$0xff] %v808_v53  ;;  %v776_v59 = vadd.f32 %v775_v56, %v688_v54 }
 0x139   :  { %v1061_v63 = vpop.f32.mrf.mxu0 }
 0x13a   :  { %v809_v1 = vmax.f32 %v776_v59, 0.0 }
 0x13c   :  { %822 = vst [vmem:[%s1557_s3 + $0x38] sm:$0xff] %v809_v1 }

// kernel: vae_forward.7
= control target key start
LH: loop header
LB: loop body
LE: loop exit
PB: predicated region body
PF: predicated region fallthrough
CT: control target
= control target key end

     0   :  { %v5175_v30 = vmov 1983009808   ;;  %v446_v32 = vlaneseq  ;;  %vm575_vm0 = vcmask 523264   ;;  %vm5177_vm1 = vmmov 0   ;;  %s7995_s1 = inlined_call_operand.vmem [shape: f32[3136,2], index: 1, kind: input, shape index: {}]   ;;  %s7996_s0 = inlined_call_operand.vmem [shape: f32[2,3136], index: 0, kind: input, shape index: {}]   ;;  %s7997_s3 = inlined_call_operand.vmem [shape: f32[3136,2], index: 3, kind: input, shape index: {}]   ;;  %s7998_s2 = inlined_call_operand.vmem [shape: f32[1,2], index: 2, kind: input, shape index: {}]   ;;  %s7999_s6 = inlined_call_operand.vmem [shape: f32[2,3136], index: 6, kind: input, shape index: {}]   ;;  %s8000_s4 = inlined_call_operand.vmem [shape: f32[1,2], index: 4, kind: input, shape index: {}]   ;;  %s8001_s5 = inlined_call_operand.vmem [shape: f32[2,2], index: 5, kind: input, shape index: {}]   ;;  %s8002_s7 = inlined_call_operand.vmem [shape: f32[1,3136], index: 7, kind: input, shape index: {}]   ;;  %s8003_s8 = inlined_call_operand.vmem [shape: f32[2,3136], index: 8, kind: output, shape index: {}]  }
   0x1   :  { %v67_v0 = vld [vmem:[%s7995_s1 + $0xf8] sm:$0xff]  ;;  %v66_v4 = vld [vmem:[%s7995_s1 + $0xf0] sm:$0xff]  ;;  %v65_v8 = vld [vmem:[%s7995_s1 + $0xe8] sm:$0xff]  ;;  %v444_v31 = vunpack.c.l.s4 %v5175_v30  ;;  %vm3060_vm2 = vcmask 1041408   ;;  %vm3056_vm3 = vcmask 15360   ;;  %vm4205_vm4 = vcmask 517120  }
   0x2   :  { %v99_v1 = vld [vmem:[%s7995_s1 + $0x1f8] sm:$0xff]  ;;  %4256 = vmatprep.subr.mxu0 %v67_v0  ;;  %v98_v5 = vld [vmem:[%s7995_s1 + $0x1f0] sm:$0xff]  ;;  %v97_v9 = vld [vmem:[%s7995_s1 + $0x1e8] sm:$0xff]  ;;  %v5337_v42 = vshrl.u32 %v446_v32, 7 }
   0x3   :  { %v51_v2 = vld [vmem:[%s7995_s1 + $0x78] sm:$0xff]  ;;  %4291 = vmatprep.subr.mxu1 %v99_v1  ;;  %v50_v6 = vld [vmem:[%s7995_s1 + $0x70] sm:$0xff]  ;;  %v49_v10 = vld [vmem:[%s7995_s1 + $0x68] sm:$0xff]  ;;  %v445_v41 = vunpack.c.0.s8 %v444_v31 }
   0x4   :  { %v83_v3 = vld [vmem:[%s7995_s1 + $0x178] sm:$0xff]  ;;  %4257 = vmatpush3.msra.mxu0 %v51_v2  ;;  %v82_v7 = vld [vmem:[%s7995_s1 + $0x170] sm:$0xff]  ;;  %v81_v11 = vld [vmem:[%s7995_s1 + $0x168] sm:$0xff] }
   0x5   :  { %4292 = vmatpush3.msra.mxu1 %v83_v3  ;;  %4258 = vmatprep.subr.mxu0 %v66_v4  ;;  %v64_v12 = vld [vmem:[%s7995_s1 + $0xe0] sm:$0xff]  ;;  %v63_v16 = vld [vmem:[%s7995_s1 + $0xd8] sm:$0xff]  ;;  %v62_v20 = vld [vmem:[%s7995_s1 + $0xd0] sm:$0xff]  ;;  %v5364_v51 = vsub.s32 %v445_v41, %v5337_v42 }
   0x6   :  { %4293 = vmatprep.subr.mxu1 %v98_v5  ;;  %4259 = vmatpush3.msra.mxu0 %v50_v6  ;;  %v96_v13 = vld [vmem:[%s7995_s1 + $0x1e0] sm:$0xff]  ;;  %v95_v17 = vld [vmem:[%s7995_s1 + $0x1d8] sm:$0xff]  ;;  %v94_v21 = vld [vmem:[%s7995_s1 + $0x1d0] sm:$0xff] }
   0x7   :  { %4294 = vmatpush3.msra.mxu1 %v82_v7  ;;  %4260 = vmatprep.subr.mxu0 %v65_v8  ;;  %v48_v14 = vld [vmem:[%s7995_s1 + $0x60] sm:$0xff]  ;;  %v47_v18 = vld [vmem:[%s7995_s1 + $0x58] sm:$0xff]  ;;  %v46_v22 = vld [vmem:[%s7995_s1 + $0x50] sm:$0xff] }
   0x8   :  { %4295 = vmatprep.subr.mxu1 %v97_v9  ;;  %v80_v15 = vld [vmem:[%s7995_s1 + $0x160] sm:$0xff]  ;;  %4261 = vmatpush3.msra.mxu0 %v49_v10  ;;  %v79_v19 = vld [vmem:[%s7995_s1 + $0x158] sm:$0xff]  ;;  %v78_v23 = vld [vmem:[%s7995_s1 + $0x150] sm:$0xff] }
   0x9   :  { %4296 = vmatpush3.msra.mxu1 %v81_v11  ;;  %4262 = vmatprep.subr.mxu0 %v64_v12  ;;  %v61_v24 = vld [vmem:[%s7995_s1 + $0xc8] sm:$0xff]  ;;  %v60_v28 = vld [vmem:[%s7995_s1 + $0xc0] sm:$0xff]  ;;  %v59_v35 = vld [vmem:[%s7995_s1 + $0xb8] sm:$0xff] }
   0xa   :  { %4297 = vmatprep.subr.mxu1 %v96_v13  ;;  %4263 = vmatpush3.msra.mxu0 %v48_v14  ;;  %v93_v25 = vld [vmem:[%s7995_s1 + $0x1c8] sm:$0xff]  ;;  %v92_v29 = vld [vmem:[%s7995_s1 + $0x1c0] sm:$0xff]  ;;  %v91_v36 = vld [vmem:[%s7995_s1 + $0x1b8] sm:$0xff] }
   0xb   :  { %4298 = vmatpush3.msra.mxu1 %v80_v15  ;;  %4264 = vmatprep.subr.mxu0 %v63_v16  ;;  %v45_v26 = vld [vmem:[%s7995_s1 + $0x48] sm:$0xff]  ;;  %v44_v33 = vld [vmem:[%s7995_s1 + $0x40] sm:$0xff]  ;;  %v43_v37 = vld [vmem:[%s7995_s1 + $0x38] sm:$0xff] }
   0xc   :  { %4299 = vmatprep.subr.mxu1 %v95_v17  ;;  %4265 = vmatpush3.msra.mxu0 %v47_v18  ;;  %v77_v27 = vld [vmem:[%s7995_s1 + $0x148] sm:$0xff]  ;;  %v76_v34 = vld [vmem:[%s7995_s1 + $0x140] sm:$0xff]  ;;  %v75_v38 = vld [vmem:[%s7995_s1 + $0x138] sm:$0xff] }
   0xd   :  { %4300 = vmatpush3.msra.mxu1 %v79_v19  ;;  %4266 = vmatprep.subr.mxu0 %v62_v20  ;;  %v58_v39 = vld [vmem:[%s7995_s1 + $0xb0] sm:$0xff]  ;;  %v57_v45 = vld [vmem:[%s7995_s1 + $0xa8] sm:$0xff]  ;;  %v56_v49 = vld [vmem:[%s7995_s1 + $0xa0] sm:$0xff] }
   0xe   :  { %4301 = vmatprep.subr.mxu1 %v94_v21  ;;  %4267 = vmatpush3.msra.mxu0 %v46_v22  ;;  %v90_v40 = vld [vmem:[%s7995_s1 + $0x1b0] sm:$0xff]  ;;  %v89_v46 = vld [vmem:[%s7995_s1 + $0x1a8] sm:$0xff]  ;;  %v88_v50 = vld [vmem:[%s7995_s1 + $0x1a0] sm:$0xff] }
   0xf   :  { %4302 = vmatpush3.msra.mxu1 %v78_v23  ;;  %4268 = vmatprep.subr.mxu0 %v61_v24  ;;  %v42_v43 = vld [vmem:[%s7995_s1 + $0x30] sm:$0xff]  ;;  %v41_v47 = vld [vmem:[%s7995_s1 + $0x28] sm:$0xff]  ;;  %v40_v52 = vld [vmem:[%s7995_s1 + $0x20] sm:$0xff] }
  0x10   :  { %4303 = vmatprep.subr.mxu1 %v93_v25  ;;  %4269 = vmatpush3.msra.mxu0 %v45_v26  ;;  %v74_v44 = vld [vmem:[%s7995_s1 + $0x130] sm:$0xff]  ;;  %v73_v48 = vld [vmem:[%s7995_s1 + $0x128] sm:$0xff]  ;;  %v72_v53 = vld [vmem:[%s7995_s1 + $0x120] sm:$0xff] }
  0x11   :  { %4304 = vmatpush3.msra.mxu1 %v77_v27  ;;  %4270 = vmatprep.subr.mxu0 %v60_v28  ;;  %v29_v54 = vld [vmem:[%s7996_s0] sm:$0xff]  ;;  %v55_v55 = vld [vmem:[%s7995_s1 + $0x98] sm:$0xff]  ;;  %v54_v60 = vld [vmem:[%s7995_s1 + $0x90] sm:$0xff] }
  0x12   :  { %4305 = vmatprep.subr.mxu1 %v92_v29  ;;  %4271 = vmatpush3.msra.mxu0 %v44_v33  ;;  %v87_v56 = vld [vmem:[%s7995_s1 + $0x198] sm:$0xff]  ;;  %v442_v57 = vcombine.high %v29_v54, %v29_v54  ;;  %v86_v61 = vld [vmem:[%s7995_s1 + $0x190] sm:$0xff]  ;;  %v5394_v62 = vrot.slane %v29_v54, %v5364_v51  ;;  %v53_v1 = vld [vmem:[%s7995_s1 + $0x88] sm:$0xff] }
  0x13   :  { %4306 = vmatpush3.msra.mxu1 %v76_v34  ;;  %4272 = vmatprep.subr.mxu0 %v59_v35  ;;  %v39_v58 = vld [vmem:[%s7995_s1 + $0x18] sm:$0xff]  ;;  %v38_v63 = vld [vmem:[%s7995_s1 + $0x10] sm:$0xff]  ;;  %v85_v2 = vld [vmem:[%s7995_s1 + $0x188] sm:$0xff] }
  0x14   :  { %4307 = vmatprep.subr.mxu1 %v91_v36  ;;  %4273 = vmatpush3.msra.mxu0 %v43_v37  ;;  %v71_v59 = vld [vmem:[%s7995_s1 + $0x118] sm:$0xff]  ;;  %v70_v0 = vld [vmem:[%s7995_s1 + $0x110] sm:$0xff]  ;;  %v5409_v3 = vrot.slane %v442_v57, %v5364_v51  ;;  %v37_v4 = vld [vmem:[%s7995_s1 + $0x8] sm:$0xff]  ;;  %v5425_v8 = vcombine.high %v5394_v62, %v5394_v62 }
  0x15   :  { %4308 = vmatpush3.msra.mxu1 %v75_v38  ;;  %4274 = vmatprep.subr.mxu0 %v58_v39  ;;  %v69_v5 = vld [vmem:[%s7995_s1 + $0x108] sm:$0xff]  ;;  %v52_v6 = vld [vmem:[%s7995_s1 + $0x80] sm:$0xff]  ;;  %v131_v12 = vld [vmem:[%s7995_s1 + $0x2f8] sm:$0xff] }
  0x16   :  { %4309 = vmatprep.subr.mxu1 %v90_v40  ;;  %4275 = vmatpush3.msra.mxu0 %v42_v43  ;;  %v84_v7 = vld [vmem:[%s7995_s1 + $0x180] sm:$0xff]  ;;  %v5435_v11 = vcombine.high %v5409_v3, %v5409_v3  ;;  %v163_v13 = vld [vmem:[%s7995_s1 + $0x3f8] sm:$0xff]  ;;  %v130_v16 = vld [vmem:[%s7995_s1 + $0x2f0] sm:$0xff] }
  0x17   :  { %4310 = vmatpush3.msra.mxu1 %v74_v44  ;;  %4276 = vmatprep.subr.mxu0 %v57_v45  ;;  %v36_v9 = vld [vmem:[%s7995_s1] sm:$0xff]  ;;  %v115_v14 = vld [vmem:[%s7995_s1 + $0x278] sm:$0xff]  ;;  %v162_v17 = vld [vmem:[%s7995_s1 + $0x3f0] sm:$0xff] }
  0x18   :  { %4311 = vmatprep.subr.mxu1 %v89_v46  ;;  %4277 = vmatpush3.msra.mxu0 %v41_v47  ;;  %v68_v10 = vld [vmem:[%s7995_s1 + $0x100] sm:$0xff]  ;;  %v147_v15 = vld [vmem:[%s7995_s1 + $0x378] sm:$0xff]  ;;  %v114_v18 = vld [vmem:[%s7995_s1 + $0x270] sm:$0xff] }
  0x19   :  { %4312 = vmatpush3.msra.mxu1 %v73_v48  ;;  %4278 = vmatprep.subr.mxu0 %v56_v49  ;;  %v146_v19 = vld [vmem:[%s7995_s1 + $0x370] sm:$0xff]  ;;  %v129_v20 = vld [vmem:[%s7995_s1 + $0x2e8] sm:$0xff]  ;;  %v128_v24 = vld [vmem:[%s7995_s1 + $0x2e0] sm:$0xff] }
  0x1a   :  { %4313 = vmatprep.subr.mxu1 %v88_v50  ;;  %4279 = vmatpush3.msra.mxu0 %v40_v52  ;;  %v161_v21 = vld [vmem:[%s7995_s1 + $0x3e8] sm:$0xff]  ;;  %v160_v25 = vld [vmem:[%s7995_s1 + $0x3e0] sm:$0xff]  ;;  %v127_v28 = vld [vmem:[%s7995_s1 + $0x2d8] sm:$0xff] }
  0x1b   :  { %4314 = vmatpush3.msra.mxu1 %v72_v53  ;;  %4280 = vmatprep.subr.mxu0 %v55_v55  ;;  %v113_v22 = vld [vmem:[%s7995_s1 + $0x268] sm:$0xff]  ;;  %v112_v26 = vld [vmem:[%s7995_s1 + $0x260] sm:$0xff]  ;;  %v159_v29 = vld [vmem:[%s7995_s1 + $0x3d8] sm:$0xff] }
  0x1c   :  { %4315 = vmatprep.subr.mxu1 %v87_v56  ;;  %4281 = vmatpush3.msra.mxu0 %v39_v58  ;;  %v145_v23 = vld [vmem:[%s7995_s1 + $0x368] sm:$0xff]  ;;  %v144_v27 = vld [vmem:[%s7995_s1 + $0x360] sm:$0xff]  ;;  %v111_v30 = vld [vmem:[%s7995_s1 + $0x258] sm:$0xff] }
  0x1d   :  { %4316 = vmatpush3.msra.mxu1 %v71_v59  ;;  %4282 = vmatprep.subr.mxu0 %v54_v60  ;;  %v143_v31 = vld [vmem:[%s7995_s1 + $0x358] sm:$0xff]  ;;  %v126_v32 = vld [vmem:[%s7995_s1 + $0x2d0] sm:$0xff]  ;;  %v125_v36 = vld [vmem:[%s7995_s1 + $0x2c8] sm:$0xff] }
  0x1e   :  { %4317 = vmatprep.subr.mxu1 %v86_v61  ;;  %4283 = vmatpush3.msra.mxu0 %v38_v63  ;;  %v158_v33 = vld [vmem:[%s7995_s1 + $0x3d0] sm:$0xff]  ;;  %v157_v37 = vld [vmem:[%s7995_s1 + $0x3c8] sm:$0xff]  ;;  %v124_v40 = vld [vmem:[%s7995_s1 + $0x2c0] sm:$0xff] }
  0x1f   :  { %4318 = vmatpush3.msra.mxu1 %v70_v0  ;;  %4284 = vmatprep.subr.mxu0 %v53_v1  ;;  %v110_v34 = vld [vmem:[%s7995_s1 + $0x250] sm:$0xff]  ;;  %v109_v38 = vld [vmem:[%s7995_s1 + $0x248] sm:$0xff]  ;;  %v156_v41 = vld [vmem:[%s7995_s1 + $0x3c0] sm:$0xff] }
  0x20   :  { %4319 = vmatprep.subr.mxu1 %v85_v2  ;;  %4285 = vmatpush3.msra.mxu0 %v37_v4  ;;  %v142_v35 = vld [vmem:[%s7995_s1 + $0x350] sm:$0xff]  ;;  %v141_v39 = vld [vmem:[%s7995_s1 + $0x348] sm:$0xff]  ;;  %v108_v43 = vld [vmem:[%s7995_s1 + $0x240] sm:$0xff] }
  0x21   :  { %4320 = vmatpush3.msra.mxu1 %v69_v5  ;;  %4286 = vmatprep.subr.mxu0 %v52_v6  ;;  %v140_v44 = vld [vmem:[%s7995_s1 + $0x340] sm:$0xff]  ;;  %v123_v45 = vld [vmem:[%s7995_s1 + $0x2b8] sm:$0xff]  ;;  %v122_v49 = vld [vmem:[%s7995_s1 + $0x2b0] sm:$0xff] }
  0x22   :  { %4321 = vmatprep.subr.mxu1 %v84_v7  ;;  %4287 = vmatpush3.msra.mxu0 %v36_v9  ;;  %v155_v46 = vld [vmem:[%s7995_s1 + $0x3b8] sm:$0xff]  ;;  %v154_v50 = vld [vmem:[%s7995_s1 + $0x3b0] sm:$0xff]  ;;  %v121_v54 = vld [vmem:[%s7995_s1 + $0x2a8] sm:$0xff] }
  0x23   :  { %642 = vmatprep.mubr.f32.mxu0 %v5425_v8  ;;  %4322 = vmatpush3.msra.mxu1 %v68_v10  ;;  %v107_v47 = vld [vmem:[%s7995_s1 + $0x238] sm:$0xff]  ;;  %v106_v52 = vld [vmem:[%s7995_s1 + $0x230] sm:$0xff]  ;;  %v153_v55 = vld [vmem:[%s7995_s1 + $0x3a8] sm:$0xff] }
  0x24   :  { %643 = vmatmul.mubr.f32.vlgmr.msra.gmra.mxu0 %v5394_v62  ;;  %712 = vmatprep.mubr.f32.mxu1 %v5435_v11  ;;  %v139_v48 = vld [vmem:[%s7995_s1 + $0x338] sm:$0xff]  ;;  %v138_v53 = vld [vmem:[%s7995_s1 + $0x330] sm:$0xff]  ;;  %v105_v56 = vld [vmem:[%s7995_s1 + $0x228] sm:$0xff] }
  0x25   :  { %4326 = vmatprep.subr.mxu0 %v131_v12  ;;  %4361 = vmatprep.subr.mxu1 %v163_v13  ;;  %v137_v57 = vld [vmem:[%s7995_s1 + $0x328] sm:$0xff]  ;;  %v120_v59 = vld [vmem:[%s7995_s1 + $0x2a0] sm:$0xff]  ;;  %v119_v0 = vld [vmem:[%s7995_s1 + $0x298] sm:$0xff] }
  0x26   :  { %713 = vmatmul.mubr.f32.vlgmr.msra.gmra.mxu1 %v5409_v3  ;;  %4327 = vmatpush3.msra.mxu0 %v115_v14  ;;  %v30_v58 = vld [vmem:[%s7996_s0 + $0x8] sm:$0xff]  ;;  %v152_v60 = vld [vmem:[%s7995_s1 + $0x3a0] sm:$0xff]  ;;  %v151_v1 = vld [vmem:[%s7995_s1 + $0x398] sm:$0xff] }
  0x27   :  { %4362 = vmatpush3.msra.mxu1 %v147_v15  ;;  %4328 = vmatprep.subr.mxu0 %v130_v16  ;;  %v104_v61 = vld [vmem:[%s7995_s1 + $0x220] sm:$0xff]  ;;  %v459_v2 = vcombine.high %v30_v58, %v30_v58  ;;  %v103_v4 = vld [vmem:[%s7995_s1 + $0x218] sm:$0xff]  ;;  %v118_v6 = vld [vmem:[%s7995_s1 + $0x290] sm:$0xff]  ;;  %v5607_v9 = vrot.slane %v30_v58, %v5364_v51 }
  0x28   :  { %4363 = vmatprep.subr.mxu1 %v162_v17  ;;  %4329 = vmatpush3.msra.mxu0 %v114_v18  ;;  %v136_v63 = vld [vmem:[%s7995_s1 + $0x320] sm:$0xff]  ;;  %v135_v5 = vld [vmem:[%s7995_s1 + $0x318] sm:$0xff]  ;;  %v150_v7 = vld [vmem:[%s7995_s1 + $0x390] sm:$0xff] }
  0x29   :  { %4364 = vmatpush3.msra.mxu1 %v146_v19  ;;  %4330 = vmatprep.subr.mxu0 %v129_v20  ;;  %v102_v10 = vld [vmem:[%s7995_s1 + $0x210] sm:$0xff]  ;;  %v117_v13 = vld [vmem:[%s7995_s1 + $0x288] sm:$0xff]  ;;  %v5622_v15 = vrot.slane %v459_v2, %v5364_v51  ;;  %v116_v18 = vld [vmem:[%s7995_s1 + $0x280] sm:$0xff]  ;;  %v5638_v20 = vcombine.high %v5607_v9, %v5607_v9 }
  0x2a   :  { %4365 = vmatprep.subr.mxu1 %v161_v21  ;;  %4331 = vmatpush3.msra.mxu0 %v113_v22  ;;  %v134_v12 = vld [vmem:[%s7995_s1 + $0x310] sm:$0xff]  ;;  %v149_v14 = vld [vmem:[%s7995_s1 + $0x388] sm:$0xff]  ;;  %v148_v19 = vld [vmem:[%s7995_s1 + $0x380] sm:$0xff] }
  0x2b   :  { %4366 = vmatpush3.msra.mxu1 %v145_v23  ;;  %4332 = vmatprep.subr.mxu0 %v128_v24  ;;  %v101_v16 = vld [vmem:[%s7995_s1 + $0x208] sm:$0xff]  ;;  %v100_v21 = vld [vmem:[%s7995_s1 + $0x200] sm:$0xff]  ;;  %v5648_v23 = vcombine.high %v5622_v15, %v5622_v15  ;;  %v195_v24 = vld [vmem:[%s7995_s1 + $0x4f8] sm:$0xff] }
  0x2c   :  { %4367 = vmatprep.subr.mxu1 %v160_v25  ;;  %4333 = vmatpush3.msra.mxu0 %v112_v26  ;;  %v133_v17 = vld [vmem:[%s7995_s1 + $0x308] sm:$0xff]  ;;  %v132_v22 = vld [vmem:[%s7995_s1 + $0x300] sm:$0xff]  ;;  %v227_v25 = vld [vmem:[%s7995_s1 + $0x5f8] sm:$0xff] }
  0x2d   :  { %4368 = vmatpush3.msra.mxu1 %v144_v27  ;;  %4334 = vmatprep.subr.mxu0 %v127_v28  ;;  %v179_v26 = vld [vmem:[%s7995_s1 + $0x478] sm:$0xff]  ;;  %v194_v28 = vld [vmem:[%s7995_s1 + $0x4f0] sm:$0xff] }
  0x2e   :  { %4369 = vmatprep.subr.mxu1 %v159_v29  ;;  %4335 = vmatpush3.msra.mxu0 %v111_v30  ;;  %v211_v27 = vld [vmem:[%s7995_s1 + $0x578] sm:$0xff]  ;;  %v226_v29 = vld [vmem:[%s7995_s1 + $0x5f0] sm:$0xff] }
  0x2f   :  { %4370 = vmatpush3.msra.mxu1 %v143_v31  ;;  %4336 = vmatprep.subr.mxu0 %v126_v32  ;;  %v178_v30 = vld [vmem:[%s7995_s1 + $0x470] sm:$0xff]  ;;  %v193_v32 = vld [vmem:[%s7995_s1 + $0x4e8] sm:$0xff]  ;;  %v187_v58 = vld [vmem:[%s7995_s1 + $0x4b8] sm:$0xff] }
  0x30   :  { %4371 = vmatprep.subr.mxu1 %v158_v33  ;;  %4337 = vmatpush3.msra.mxu0 %v110_v34  ;;  %v210_v31 = vld [vmem:[%s7995_s1 + $0x570] sm:$0xff]  ;;  %v225_v33 = vld [vmem:[%s7995_s1 + $0x5e8] sm:$0xff] }
  0x31   :  { %4372 = vmatpush3.msra.mxu1 %v142_v35  ;;  %4338 = vmatprep.subr.mxu0 %v125_v36  ;;  %v177_v34 = vld [vmem:[%s7995_s1 + $0x468] sm:$0xff]  ;;  %v192_v36 = vld [vmem:[%s7995_s1 + $0x4e0] sm:$0xff]  ;;  %v202_v2 = vld [vmem:[%s7995_s1 + $0x530] sm:$0xff] }
  0x32   :  { %4373 = vmatprep.subr.mxu1 %v157_v37  ;;  %4339 = vmatpush3.msra.mxu0 %v109_v38  ;;  %v209_v35 = vld [vmem:[%s7995_s1 + $0x568] sm:$0xff]  ;;  %v224_v37 = vld [vmem:[%s7995_s1 + $0x5e0] sm:$0xff] }
  0x33   :  { %4374 = vmatpush3.msra.mxu1 %v141_v39  ;;  %4340 = vmatprep.subr.mxu0 %v124_v40  ;;  %v176_v38 = vld [vmem:[%s7995_s1 + $0x460] sm:$0xff]  ;;  %v191_v40 = vld [vmem:[%s7995_s1 + $0x4d8] sm:$0xff] }
  0x34   :  { %4375 = vmatprep.subr.mxu1 %v156_v41  ;;  %4341 = vmatpush3.msra.mxu0 %v108_v43  ;;  %v208_v39 = vld [vmem:[%s7995_s1 + $0x560] sm:$0xff]  ;;  %v223_v41 = vld [vmem:[%s7995_s1 + $0x5d8] sm:$0xff] }
  0x35   :  { %4376 = vmatpush3.msra.mxu1 %v140_v44  ;;  %4342 = vmatprep.subr.mxu0 %v123_v45  ;;  %v175_v43 = vld [vmem:[%s7995_s1 + $0x458] sm:$0xff]  ;;  %v190_v45 = vld [vmem:[%s7995_s1 + $0x4d0] sm:$0xff] }
  0x36   :  { %4377 = vmatprep.subr.mxu1 %v155_v46  ;;  %4343 = vmatpush3.msra.mxu0 %v107_v47  ;;  %v207_v44 = vld [vmem:[%s7995_s1 + $0x558] sm:$0xff]  ;;  %v222_v46 = vld [vmem:[%s7995_s1 + $0x5d0] sm:$0xff] }
  0x37   :  { %4378 = vmatpush3.msra.mxu1 %v139_v48  ;;  %4344 = vmatprep.subr.mxu0 %v122_v49  ;;  %v174_v47 = vld [vmem:[%s7995_s1 + $0x450] sm:$0xff]  ;;  %v189_v49 = vld [vmem:[%s7995_s1 + $0x4c8] sm:$0xff] }
  0x38   :  { %4379 = vmatprep.subr.mxu1 %v154_v50  ;;  %4345 = vmatpush3.msra.mxu0 %v106_v52  ;;  %v206_v48 = vld [vmem:[%s7995_s1 + $0x550] sm:$0xff]  ;;  %v221_v50 = vld [vmem:[%s7995_s1 + $0x5c8] sm:$0xff] }
  0x39   :  { %4380 = vmatpush3.msra.mxu1 %v138_v53  ;;  %4346 = vmatprep.subr.mxu0 %v121_v54  ;;  %v173_v52 = vld [vmem:[%s7995_s1 + $0x448] sm:$0xff]  ;;  %v188_v54 = vld [vmem:[%s7995_s1 + $0x4c0] sm:$0xff] }
  0x3a   :  { %4381 = vmatprep.subr.mxu1 %v153_v55  ;;  %4347 = vmatpush3.msra.mxu0 %v105_v56  ;;  %v205_v53 = vld [vmem:[%s7995_s1 + $0x548] sm:$0xff]  ;;  %v220_v55 = vld [vmem:[%s7995_s1 + $0x5c0] sm:$0xff] }
  0x3b   :  { %4382 = vmatpush3.msra.mxu1 %v137_v57  ;;  %4348 = vmatprep.subr.mxu0 %v120_v59  ;;  %v172_v56 = vld [vmem:[%s7995_s1 + $0x440] sm:$0xff]  ;;  %v219_v59 = vld [vmem:[%s7995_s1 + $0x5b8] sm:$0xff] }
  0x3c   :  { %4383 = vmatprep.subr.mxu1 %v152_v60  ;;  %4349 = vmatpush3.msra.mxu0 %v104_v61  ;;  %v204_v57 = vld [vmem:[%s7995_s1 + $0x540] sm:$0xff]  ;;  %v171_v60 = vld [vmem:[%s7995_s1 + $0x438] sm:$0xff] }
  0x3d   :  { %4384 = vmatpush3.msra.mxu1 %v136_v63  ;;  %4350 = vmatprep.subr.mxu0 %v119_v0  ;;  %v203_v61 = vld [vmem:[%s7995_s1 + $0x538] sm:$0xff]  ;;  %v186_v63 = vld [vmem:[%s7995_s1 + $0x4b0] sm:$0xff] }
  0x3e   :  { %4385 = vmatprep.subr.mxu1 %v151_v1  ;;  %4351 = vmatpush3.msra.mxu0 %v103_v4  ;;  %v218_v0 = vld [vmem:[%s7995_s1 + $0x5b0] sm:$0xff]  ;;  %v185_v4 = vld [vmem:[%s7995_s1 + $0x4a8] sm:$0xff] }
  0x3f   :  { %4386 = vmatpush3.msra.mxu1 %v135_v5  ;;  %4352 = vmatprep.subr.mxu0 %v118_v6  ;;  %v170_v1 = vld [vmem:[%s7995_s1 + $0x430] sm:$0xff]  ;;  %v217_v5 = vld [vmem:[%s7995_s1 + $0x5a8] sm:$0xff] }
  0x40   :  { %4387 = vmatprep.subr.mxu1 %v150_v7  ;;  %4353 = vmatpush3.msra.mxu0 %v102_v10  ;;  %v169_v6 = vld [vmem:[%s7995_s1 + $0x428] sm:$0xff]  ;;  %v31_v10 = vld [vmem:[%s7996_s0 + $0x10] sm:$0xff] }
  0x41   :  { %4388 = vmatpush3.msra.mxu1 %v134_v12  ;;  %4354 = vmatprep.subr.mxu0 %v117_v13  ;;  %v201_v7 = vld [vmem:[%s7995_s1 + $0x528] sm:$0xff]  ;;  %v184_v12 = vld [vmem:[%s7995_s1 + $0x4a0] sm:$0xff] }
  0x42   :  { %4389 = vmatprep.subr.mxu1 %v149_v14  ;;  %4355 = vmatpush3.msra.mxu0 %v101_v16  ;;  %v216_v13 = vld [vmem:[%s7995_s1 + $0x5a0] sm:$0xff] }
  0x43   :  { %4390 = vmatpush3.msra.mxu1 %v133_v17  ;;  %4356 = vmatprep.subr.mxu0 %v116_v18  ;;  %v168_v14 = vld [vmem:[%s7995_s1 + $0x420] sm:$0xff]  ;;  %v183_v17 = vld [vmem:[%s7995_s1 + $0x498] sm:$0xff] }
  0x44   :  { %4391 = vmatprep.subr.mxu1 %v148_v19  ;;  %4357 = vmatpush3.msra.mxu0 %v100_v21  ;;  %v200_v16 = vld [vmem:[%s7995_s1 + $0x520] sm:$0xff]  ;;  %v215_v18 = vld [vmem:[%s7995_s1 + $0x598] sm:$0xff]  ;;  %v476_v19 = vcombine.high %v31_v10, %v31_v10 }
  0x45   :  { %782 = vmatprep.mubr.f32.mxu0 %v5638_v20  ;;  %4392 = vmatpush3.msra.mxu1 %v132_v22  ;;  %v167_v21 = vld [vmem:[%s7995_s1 + $0x418] sm:$0xff] }
  0x46   :  { %783 = vmatmul.mubr.f32.vlgmr.msra.gmra.mxu0 %v5607_v9  ;;  %852 = vmatprep.mubr.f32.mxu1 %v5648_v23  ;;  %v199_v22 = vld [vmem:[%s7995_s1 + $0x518] sm:$0xff] }
  0x47   :  { %4396 = vmatprep.subr.mxu0 %v195_v24  ;;  %4431 = vmatprep.subr.mxu1 %v227_v25  ;;  %v182_v24 = vld [vmem:[%s7995_s1 + $0x490] sm:$0xff] }
  0x48   :  { %853 = vmatmul.mubr.f32.vlgmr.msra.gmra.mxu1 %v5622_v15  ;;  %4397 = vmatpush3.msra.mxu0 %v179_v26  ;;  %v214_v25 = vld [vmem:[%s7995_s1 + $0x590] sm:$0xff]  ;;  %v5820_v26 = vrot.slane %v31_v10, %v5364_v51  ;;  %v252_v10 = vld [vmem:[%s7995_s1 + $0x6c0] sm:$0xff] }
  0x49   :  { %4432 = vmatpush3.msra.mxu1 %v211_v27  ;;  %4398 = vmatprep.subr.mxu0 %v194_v28  ;;  %v166_v27 = vld [vmem:[%s7995_s1 + $0x410] sm:$0xff] }
  0x4a   :  { %4433 = vmatprep.subr.mxu1 %v226_v29  ;;  %4399 = vmatpush3.msra.mxu0 %v178_v30  ;;  %v198_v28 = vld [vmem:[%s7995_s1 + $0x510] sm:$0xff]  ;;  %v181_v29 = vld [vmem:[%s7995_s1 + $0x488] sm:$0xff] }
  0x4b   :  { %4434 = vmatpush3.msra.mxu1 %v210_v31  ;;  %4400 = vmatprep.subr.mxu0 %v193_v32  ;;  %v213_v30 = vld [vmem:[%s7995_s1 + $0x588] sm:$0xff]  ;;  %v5835_v31 = vrot.slane %v476_v19, %v5364_v51  ;;  %v267_v19 = vld [vmem:[%s7995_s1 + $0x738] sm:$0xff] }
  0x4c   :  { %4435 = vmatprep.subr.mxu1 %v225_v33  ;;  %4401 = vmatpush3.msra.mxu0 %v177_v34  ;;  %v165_v32 = vld [vmem:[%s7995_s1 + $0x408] sm:$0xff]  ;;  %v180_v34 = vld [vmem:[%s7995_s1 + $0x480] sm:$0xff] }
  0x4d   :  { %4436 = vmatpush3.msra.mxu1 %v209_v35  ;;  %4402 = vmatprep.subr.mxu0 %v192_v36  ;;  %v197_v33 = vld [vmem:[%s7995_s1 + $0x508] sm:$0xff]  ;;  %v212_v35 = vld [vmem:[%s7995_s1 + $0x580] sm:$0xff]  ;;  %v5851_v36 = vcombine.high %v5820_v26, %v5820_v26 }
  0x4e   :  { %4437 = vmatprep.subr.mxu1 %v224_v37  ;;  %4403 = vmatpush3.msra.mxu0 %v176_v38  ;;  %v164_v37 = vld [vmem:[%s7995_s1 + $0x400] sm:$0xff] }
  0x4f   :  { %4438 = vmatpush3.msra.mxu1 %v208_v39  ;;  %4404 = vmatprep.subr.mxu0 %v191_v40  ;;  %v196_v38 = vld [vmem:[%s7995_s1 + $0x500] sm:$0xff]  ;;  %v5861_v39 = vcombine.high %v5835_v31, %v5835_v31  ;;  %v259_v40 = vld [vmem:[%s7995_s1 + $0x6f8] sm:$0xff] }
  0x50   :  { %4439 = vmatprep.subr.mxu1 %v223_v41  ;;  %4405 = vmatpush3.msra.mxu0 %v175_v43  ;;  %v291_v41 = vld [vmem:[%s7995_s1 + $0x7f8] sm:$0xff] }
  0x51   :  { %4440 = vmatpush3.msra.mxu1 %v207_v44  ;;  %4406 = vmatprep.subr.mxu0 %v190_v45  ;;  %v243_v43 = vld [vmem:[%s7995_s1 + $0x678] sm:$0xff]  ;;  %v258_v45 = vld [vmem:[%s7995_s1 + $0x6f0] sm:$0xff] }
  0x52   :  { %4441 = vmatprep.subr.mxu1 %v222_v46  ;;  %4407 = vmatpush3.msra.mxu0 %v174_v47  ;;  %v275_v44 = vld [vmem:[%s7995_s1 + $0x778] sm:$0xff]  ;;  %v290_v46 = vld [vmem:[%s7995_s1 + $0x7f0] sm:$0xff] }
  0x53   :  { %4442 = vmatpush3.msra.mxu1 %v206_v48  ;;  %4408 = vmatprep.subr.mxu0 %v189_v49  ;;  %v242_v47 = vld [vmem:[%s7995_s1 + $0x670] sm:$0xff]  ;;  %v257_v49 = vld [vmem:[%s7995_s1 + $0x6e8] sm:$0xff] }
  0x54   :  { %4443 = vmatprep.subr.mxu1 %v221_v50  ;;  %4409 = vmatpush3.msra.mxu0 %v173_v52  ;;  %v274_v48 = vld [vmem:[%s7995_s1 + $0x770] sm:$0xff]  ;;  %v289_v50 = vld [vmem:[%s7995_s1 + $0x7e8] sm:$0xff] }
  0x55   :  { %4444 = vmatpush3.msra.mxu1 %v205_v53  ;;  %4410 = vmatprep.subr.mxu0 %v188_v54  ;;  %v241_v52 = vld [vmem:[%s7995_s1 + $0x668] sm:$0xff]  ;;  %v256_v54 = vld [vmem:[%s7995_s1 + $0x6e0] sm:$0xff] }
  0x56   :  { %4445 = vmatprep.subr.mxu1 %v220_v55  ;;  %4411 = vmatpush3.msra.mxu0 %v172_v56  ;;  %v273_v53 = vld [vmem:[%s7995_s1 + $0x768] sm:$0xff]  ;;  %v288_v55 = vld [vmem:[%s7995_s1 + $0x7e0] sm:$0xff] }
  0x57   :  { %4446 = vmatpush3.msra.mxu1 %v204_v57  ;;  %4412 = vmatprep.subr.mxu0 %v187_v58  ;;  %v240_v56 = vld [vmem:[%s7995_s1 + $0x660] sm:$0xff]  ;;  %v255_v58 = vld [vmem:[%s7995_s1 + $0x6d8] sm:$0xff] }
  0x58   :  { %4447 = vmatprep.subr.mxu1 %v219_v59  ;;  %4413 = vmatpush3.msra.mxu0 %v171_v60  ;;  %v272_v57 = vld [vmem:[%s7995_s1 + $0x760] sm:$0xff]  ;;  %v287_v59 = vld [vmem:[%s7995_s1 + $0x7d8] sm:$0xff] }
  0x59   :  { %4448 = vmatpush3.msra.mxu1 %v203_v61  ;;  %4414 = vmatprep.subr.mxu0 %v186_v63  ;;  %v239_v60 = vld [vmem:[%s7995_s1 + $0x658] sm:$0xff]  ;;  %v254_v63 = vld [vmem:[%s7995_s1 + $0x6d0] sm:$0xff] }
  0x5a   :  { %4449 = vmatprep.subr.mxu1 %v218_v0  ;;  %4415 = vmatpush3.msra.mxu0 %v170_v1  ;;  %v271_v61 = vld [vmem:[%s7995_s1 + $0x758] sm:$0xff]  ;;  %v286_v0 = vld [vmem:[%s7995_s1 + $0x7d0] sm:$0xff] }
  0x5b   :  { %4450 = vmatpush3.msra.mxu1 %v202_v2  ;;  %4416 = vmatprep.subr.mxu0 %v185_v4  ;;  %v238_v1 = vld [vmem:[%s7995_s1 + $0x650] sm:$0xff]  ;;  %v253_v4 = vld [vmem:[%s7995_s1 + $0x6c8] sm:$0xff] }
  0x5c   :  { %4451 = vmatprep.subr.mxu1 %v217_v5  ;;  %4417 = vmatpush3.msra.mxu0 %v169_v6  ;;  %v270_v2 = vld [vmem:[%s7995_s1 + $0x750] sm:$0xff]  ;;  %v285_v5 = vld [vmem:[%s7995_s1 + $0x7c8] sm:$0xff] }
  0x5d   :  { %4452 = vmatpush3.msra.mxu1 %v201_v7  ;;  %4418 = vmatprep.subr.mxu0 %v184_v12  ;;  %v237_v6 = vld [vmem:[%s7995_s1 + $0x648] sm:$0xff]  ;;  %v284_v12 = vld [vmem:[%s7995_s1 + $0x7c0] sm:$0xff] }
  0x5e   :  { %4453 = vmatprep.subr.mxu1 %v216_v13  ;;  %4419 = vmatpush3.msra.mxu0 %v168_v14  ;;  %v269_v7 = vld [vmem:[%s7995_s1 + $0x748] sm:$0xff]  ;;  %v236_v13 = vld [vmem:[%s7995_s1 + $0x640] sm:$0xff] }
  0x5f   :  { %4454 = vmatpush3.msra.mxu1 %v200_v16  ;;  %4420 = vmatprep.subr.mxu0 %v183_v17  ;;  %v268_v14 = vld [vmem:[%s7995_s1 + $0x740] sm:$0xff]  ;;  %v251_v16 = vld [vmem:[%s7995_s1 + $0x6b8] sm:$0xff] }
  0x60   :  { %4455 = vmatprep.subr.mxu1 %v215_v18  ;;  %4421 = vmatpush3.msra.mxu0 %v167_v21  ;;  %v283_v17 = vld [vmem:[%s7995_s1 + $0x7b8] sm:$0xff]  ;;  %v250_v21 = vld [vmem:[%s7995_s1 + $0x6b0] sm:$0xff] }
  0x61   :  { %4456 = vmatpush3.msra.mxu1 %v199_v22  ;;  %4422 = vmatprep.subr.mxu0 %v182_v24  ;;  %v235_v18 = vld [vmem:[%s7995_s1 + $0x638] sm:$0xff]  ;;  %v282_v22 = vld [vmem:[%s7995_s1 + $0x7b0] sm:$0xff] }
  0x62   :  { %4457 = vmatprep.subr.mxu1 %v214_v25  ;;  %4423 = vmatpush3.msra.mxu0 %v166_v27  ;;  %v234_v24 = vld [vmem:[%s7995_s1 + $0x630] sm:$0xff]  ;;  %v249_v27 = vld [vmem:[%s7995_s1 + $0x6a8] sm:$0xff] }
  0x63   :  { %4458 = vmatpush3.msra.mxu1 %v198_v28  ;;  %4424 = vmatprep.subr.mxu0 %v181_v29  ;;  %v266_v25 = vld [vmem:[%s7995_s1 + $0x730] sm:$0xff]  ;;  %v281_v28 = vld [vmem:[%s7995_s1 + $0x7a8] sm:$0xff] }
  0x64   :  { %4459 = vmatprep.subr.mxu1 %v213_v30  ;;  %4425 = vmatpush3.msra.mxu0 %v165_v32  ;;  %v233_v29 = vld [vmem:[%s7995_s1 + $0x628] sm:$0xff]  ;;  %v32_v32 = vld [vmem:[%s7996_s0 + $0x18] sm:$0xff] }
  0x65   :  { %4460 = vmatpush3.msra.mxu1 %v197_v33  ;;  %4426 = vmatprep.subr.mxu0 %v180_v34  ;;  %v265_v30 = vld [vmem:[%s7995_s1 + $0x728] sm:$0xff]  ;;  %v248_v33 = vld [vmem:[%s7995_s1 + $0x6a0] sm:$0xff] }
  0x66   :  { %4461 = vmatprep.subr.mxu1 %v212_v35  ;;  %4427 = vmatpush3.msra.mxu0 %v164_v37  ;;  %v280_v34 = vld [vmem:[%s7995_s1 + $0x7a0] sm:$0xff] }
  0x67   :  { %922 = vmatprep.mubr.f32.mxu0 %v5851_v36  ;;  %4462 = vmatpush3.msra.mxu1 %v196_v38  ;;  %v232_v35 = vld [vmem:[%s7995_s1 + $0x620] sm:$0xff]  ;;  %v247_v38 = vld [vmem:[%s7995_s1 + $0x698] sm:$0xff] }
  0x68   :  { %923 = vmatmul.mubr.f32.vlgmr.msra.gmra.mxu0 %v5820_v26  ;;  %992 = vmatprep.mubr.f32.mxu1 %v5861_v39  ;;  %v264_v37 = vld [vmem:[%s7995_s1 + $0x720] sm:$0xff] }
  0x69   :  { %4466 = vmatprep.subr.mxu0 %v259_v40  ;;  %4501 = vmatprep.subr.mxu1 %v291_v41  ;;  %v279_v40 = vld [vmem:[%s7995_s1 + $0x798] sm:$0xff]  ;;  %v493_v41 = vcombine.high %v32_v32, %v32_v32 }
  0x6a   :  { %993 = vmatmul.mubr.f32.vlgmr.msra.gmra.mxu1 %v5835_v31  ;;  %4467 = vmatpush3.msra.mxu0 %v243_v43  ;;  %v231_v43 = vld [vmem:[%s7995_s1 + $0x618] sm:$0xff] }
  0x6b   :  { %4502 = vmatpush3.msra.mxu1 %v275_v44  ;;  %4468 = vmatprep.subr.mxu0 %v258_v45  ;;  %v263_v44 = vld [vmem:[%s7995_s1 + $0x718] sm:$0xff]  ;;  %v246_v45 = vld [vmem:[%s7995_s1 + $0x690] sm:$0xff] }
  0x6c   :  { %4503 = vmatprep.subr.mxu1 %v290_v46  ;;  %4469 = vmatpush3.msra.mxu0 %v242_v47  ;;  %v278_v46 = vld [vmem:[%s7995_s1 + $0x790] sm:$0xff]  ;;  %v6033_v47 = vrot.slane %v32_v32, %v5364_v51  ;;  %v317_v32 = vld [vmem:[%s7995_s1 + $0x8c8] sm:$0xff] }
  0x6d   :  { %4504 = vmatpush3.msra.mxu1 %v274_v48  ;;  %4470 = vmatprep.subr.mxu0 %v257_v49  ;;  %v230_v48 = vld [vmem:[%s7995_s1 + $0x610] sm:$0xff] }
  0x6e   :  { %4505 = vmatprep.subr.mxu1 %v289_v50  ;;  %4471 = vmatpush3.msra.mxu0 %v241_v52  ;;  %v262_v49 = vld [vmem:[%s7995_s1 + $0x710] sm:$0xff]  ;;  %v245_v50 = vld [vmem:[%s7995_s1 + $0x688] sm:$0xff] }
  0x6f   :  { %4506 = vmatpush3.msra.mxu1 %v273_v53  ;;  %4472 = vmatprep.subr.mxu0 %v256_v54  ;;  %v277_v52 = vld [vmem:[%s7995_s1 + $0x788] sm:$0xff]  ;;  %v6048_v53 = vrot.slane %v493_v41, %v5364_v51  ;;  %v332_v41 = vld [vmem:[%s7995_s1 + $0x940] sm:$0xff] }
  0x70   :  { %4507 = vmatprep.subr.mxu1 %v288_v55  ;;  %4473 = vmatpush3.msra.mxu0 %v240_v56  ;;  %v229_v54 = vld [vmem:[%s7995_s1 + $0x608] sm:$0xff]  ;;  %v244_v56 = vld [vmem:[%s7995_s1 + $0x680] sm:$0xff] }
  0x71   :  { %4508 = vmatpush3.msra.mxu1 %v272_v57  ;;  %4474 = vmatprep.subr.mxu0 %v255_v58  ;;  %v261_v55 = vld [vmem:[%s7995_s1 + $0x708] sm:$0xff]  ;;  %v276_v57 = vld [vmem:[%s7995_s1 + $0x780] sm:$0xff]  ;;  %v6064_v58 = vcombine.high %v6033_v47, %v6033_v47 }
  0x72   :  { %4509 = vmatprep.subr.mxu1 %v287_v59  ;;  %4475 = vmatpush3.msra.mxu0 %v239_v60  ;;  %v228_v59 = vld [vmem:[%s7995_s1 + $0x600] sm:$0xff] }
  0x73   :  { %4510 = vmatpush3.msra.mxu1 %v271_v61  ;;  %4476 = vmatprep.subr.mxu0 %v254_v63  ;;  %v260_v60 = vld [vmem:[%s7995_s1 + $0x700] sm:$0xff]  ;;  %v6074_v61 = vcombine.high %v6048_v53, %v6048_v53  ;;  %v323_v63 = vld [vmem:[%s7995_s1 + $0x8f8] sm:$0xff] }
  0x74   :  { %4511 = vmatprep.subr.mxu1 %v286_v0  ;;  %4477 = vmatpush3.msra.mxu0 %v238_v1  ;;  %v355_v0 = vld [vmem:[%s7995_s1 + $0x9f8] sm:$0xff] }
  0x75   :  { %4512 = vmatpush3.msra.mxu1 %v270_v2  ;;  %4478 = vmatprep.subr.mxu0 %v253_v4  ;;  %v307_v1 = vld [vmem:[%s7995_s1 + $0x878] sm:$0xff]  ;;  %v322_v4 = vld [vmem:[%s7995_s1 + $0x8f0] sm:$0xff] }
  0x76   :  { %4513 = vmatprep.subr.mxu1 %v285_v5  ;;  %4479 = vmatpush3.msra.mxu0 %v237_v6  ;;  %v339_v2 = vld [vmem:[%s7995_s1 + $0x978] sm:$0xff]  ;;  %v354_v5 = vld [vmem:[%s7995_s1 + $0x9f0] sm:$0xff] }
  0x77   :  { %4514 = vmatpush3.msra.mxu1 %v269_v7  ;;  %4480 = vmatprep.subr.mxu0 %v252_v10  ;;  %v306_v6 = vld [vmem:[%s7995_s1 + $0x870] sm:$0xff]  ;;  %v321_v10 = vld [vmem:[%s7995_s1 + $0x8e8] sm:$0xff] }
  0x78   :  { %4515 = vmatprep.subr.mxu1 %v284_v12  ;;  %4481 = vmatpush3.msra.mxu0 %v236_v13  ;;  %v338_v7 = vld [vmem:[%s7995_s1 + $0x970] sm:$0xff]  ;;  %v353_v12 = vld [vmem:[%s7995_s1 + $0x9e8] sm:$0xff] }
  0x79   :  { %4516 = vmatpush3.msra.mxu1 %v268_v14  ;;  %4482 = vmatprep.subr.mxu0 %v251_v16  ;;  %v305_v13 = vld [vmem:[%s7995_s1 + $0x868] sm:$0xff]  ;;  %v320_v16 = vld [vmem:[%s7995_s1 + $0x8e0] sm:$0xff] }
  0x7a   :  { %4517 = vmatprep.subr.mxu1 %v283_v17  ;;  %4483 = vmatpush3.msra.mxu0 %v235_v18  ;;  %v337_v14 = vld [vmem:[%s7995_s1 + $0x968] sm:$0xff]  ;;  %v352_v17 = vld [vmem:[%s7995_s1 + $0x9e0] sm:$0xff] }
  0x7b   :  { %4518 = vmatpush3.msra.mxu1 %v267_v19  ;;  %4484 = vmatprep.subr.mxu0 %v250_v21  ;;  %v304_v18 = vld [vmem:[%s7995_s1 + $0x860] sm:$0xff]  ;;  %v319_v21 = vld [vmem:[%s7995_s1 + $0x8d8] sm:$0xff] }
  0x7c   :  { %4519 = vmatprep.subr.mxu1 %v282_v22  ;;  %4485 = vmatpush3.msra.mxu0 %v234_v24  ;;  %v336_v19 = vld [vmem:[%s7995_s1 + $0x960] sm:$0xff]  ;;  %v351_v22 = vld [vmem:[%s7995_s1 + $0x9d8] sm:$0xff] }
  0x7d   :  { %4520 = vmatpush3.msra.mxu1 %v266_v25  ;;  %4486 = vmatprep.subr.mxu0 %v249_v27  ;;  %v303_v24 = vld [vmem:[%s7995_s1 + $0x858] sm:$0xff]  ;;  %v318_v27 = vld [vmem:[%s7995_s1 + $0x8d0] sm:$0xff] }
  0x7e   :  { %4521 = vmatprep.subr.mxu1 %v281_v28  ;;  %4487 = vmatpush3.msra.mxu0 %v233_v29  ;;  %v335_v25 = vld [vmem:[%s7995_s1 + $0x958] sm:$0xff]  ;;  %v350_v28 = vld [vmem:[%s7995_s1 + $0x9d0] sm:$0xff] }
  0x7f   :  { %4522 = vmatpush3.msra.mxu1 %v265_v30  ;;  %4488 = vmatprep.subr.mxu0 %v248_v33  ;;  %v302_v29 = vld [vmem:[%s7995_s1 + $0x850] sm:$0xff]  ;;  %v349_v33 = vld [vmem:[%s7995_s1 + $0x9c8] sm:$0xff] }
  0x80   :  { %4523 = vmatprep.subr.mxu1 %v280_v34  ;;  %4489 = vmatpush3.msra.mxu0 %v232_v35  ;;  %v334_v30 = vld [vmem:[%s7995_s1 + $0x950] sm:$0xff]  ;;  %v301_v34 = vld [vmem:[%s7995_s1 + $0x848] sm:$0xff] }
  0x81   :  { %4524 = vmatpush3.msra.mxu1 %v264_v37  ;;  %4490 = vmatprep.subr.mxu0 %v247_v38  ;;  %v333_v35 = vld [vmem:[%s7995_s1 + $0x948] sm:$0xff]  ;;  %v316_v37 = vld [vmem:[%s7995_s1 + $0x8c0] sm:$0xff] }
  0x82   :  { %4525 = vmatprep.subr.mxu1 %v279_v40  ;;  %4491 = vmatpush3.msra.mxu0 %v231_v43  ;;  %v348_v38 = vld [vmem:[%s7995_s1 + $0x9c0] sm:$0xff]  ;;  %v315_v43 = vld [vmem:[%s7995_s1 + $0x8b8] sm:$0xff] }
  0x83   :  { %4526 = vmatpush3.msra.mxu1 %v263_v44  ;;  %4492 = vmatprep.subr.mxu0 %v246_v45  ;;  %v300_v40 = vld [vmem:[%s7995_s1 + $0x840] sm:$0xff]  ;;  %v347_v44 = vld [vmem:[%s7995_s1 + $0x9b8] sm:$0xff] }
  0x84   :  { %4527 = vmatprep.subr.mxu1 %v278_v46  ;;  %4493 = vmatpush3.msra.mxu0 %v230_v48  ;;  %v299_v45 = vld [vmem:[%s7995_s1 + $0x838] sm:$0xff]  ;;  %v314_v48 = vld [vmem:[%s7995_s1 + $0x8b0] sm:$0xff] }
  0x85   :  { %4528 = vmatpush3.msra.mxu1 %v262_v49  ;;  %4494 = vmatprep.subr.mxu0 %v245_v50  ;;  %v331_v46 = vld [vmem:[%s7995_s1 + $0x938] sm:$0xff]  ;;  %v346_v49 = vld [vmem:[%s7995_s1 + $0x9b0] sm:$0xff] }
  0x86   :  { %4529 = vmatprep.subr.mxu1 %v277_v52  ;;  %4495 = vmatpush3.msra.mxu0 %v229_v54  ;;  %v298_v50 = vld [vmem:[%s7995_s1 + $0x830] sm:$0xff]  ;;  %v313_v54 = vld [vmem:[%s7995_s1 + $0x8a8] sm:$0xff] }
  0x87   :  { %4530 = vmatpush3.msra.mxu1 %v261_v55  ;;  %4496 = vmatprep.subr.mxu0 %v244_v56  ;;  %v330_v52 = vld [vmem:[%s7995_s1 + $0x930] sm:$0xff]  ;;  %v345_v55 = vld [vmem:[%s7995_s1 + $0x9a8] sm:$0xff] }
  0x88   :  { %4531 = vmatprep.subr.mxu1 %v276_v57  ;;  %4497 = vmatpush3.msra.mxu0 %v228_v59  ;;  %v297_v56 = vld [vmem:[%s7995_s1 + $0x828] sm:$0xff]  ;;  %v33_v59 = vld [vmem:[%s7996_s0 + $0x20] sm:$0xff] }
  0x89   :  { %1062 = vmatprep.mubr.f32.mxu0 %v6064_v58  ;;  %4532 = vmatpush3.msra.mxu1 %v260_v60  ;;  %v329_v57 = vld [vmem:[%s7995_s1 + $0x928] sm:$0xff]  ;;  %v312_v60 = vld [vmem:[%s7995_s1 + $0x8a0] sm:$0xff] }
  0x8a   :  { %1063 = vmatmul.mubr.f32.vlgmr.msra.gmra.mxu0 %v6033_v47  ;;  %1132 = vmatprep.mubr.f32.mxu1 %v6074_v61 }
  0x8b   :  { %4536 = vmatprep.subr.mxu0 %v323_v63  ;;  %4571 = vmatprep.subr.mxu1 %v355_v0  ;;  %v344_v63 = vld [vmem:[%s7995_s1 + $0x9a0] sm:$0xff] }
  0x8c   :  { %1133 = vmatmul.mubr.f32.vlgmr.msra.gmra.mxu1 %v6048_v53  ;;  %4537 = vmatpush3.msra.mxu0 %v307_v1  ;;  %v296_v0 = vld [vmem:[%s7995_s1 + $0x820] sm:$0xff] }
  0x8d   :  { %4572 = vmatpush3.msra.mxu1 %v339_v2  ;;  %4538 = vmatprep.subr.mxu0 %v322_v4  ;;  %v328_v1 = vld [vmem:[%s7995_s1 + $0x920] sm:$0xff]  ;;  %v311_v2 = vld [vmem:[%s7995_s1 + $0x898] sm:$0xff] }
  0x8e   :  { %4573 = vmatprep.subr.mxu1 %v354_v5  ;;  %4539 = vmatpush3.msra.mxu0 %v306_v6  ;;  %v343_v4 = vld [vmem:[%s7995_s1 + $0x998] sm:$0xff]  ;;  %v510_v5 = vcombine.high %v33_v59, %v33_v59 }
  0x8f   :  { %4574 = vmatpush3.msra.mxu1 %v338_v7  ;;  %4540 = vmatprep.subr.mxu0 %v321_v10  ;;  %v295_v6 = vld [vmem:[%s7995_s1 + $0x818] sm:$0xff]  ;;  %v310_v10 = vld [vmem:[%s7995_s1 + $0x890] sm:$0xff] }
  0x90   :  { %4575 = vmatprep.subr.mxu1 %v353_v12  ;;  %4541 = vmatpush3.msra.mxu0 %v305_v13  ;;  %v327_v7 = vld [vmem:[%s7995_s1 + $0x918] sm:$0xff]  ;;  %v342_v12 = vld [vmem:[%s7995_s1 + $0x990] sm:$0xff]  ;;  %v6246_v13 = vrot.slane %v33_v59, %v5364_v51 }
  0x91   :  { %4576 = vmatpush3.msra.mxu1 %v337_v14  ;;  %4542 = vmatprep.subr.mxu0 %v320_v16  ;;  %v294_v14 = vld [vmem:[%s7995_s1 + $0x810] sm:$0xff] }
  0x92   :  { %4577 = vmatprep.subr.mxu1 %v352_v17  ;;  %4543 = vmatpush3.msra.mxu0 %v304_v18  ;;  %v326_v16 = vld [vmem:[%s7995_s1 + $0x910] sm:$0xff]  ;;  %v309_v17 = vld [vmem:[%s7995_s1 + $0x888] sm:$0xff] }
  0x93   :  { %4578 = vmatpush3.msra.mxu1 %v336_v19  ;;  %4544 = vmatprep.subr.mxu0 %v319_v21  ;;  %v341_v18 = vld [vmem:[%s7995_s1 + $0x988] sm:$0xff]  ;;  %v6261_v19 = vrot.slane %v510_v5, %v5364_v51  ;;  %v382_v59 = vld [vmem:[%s7995_s1 + $0xad0] sm:$0xff] }
  0x94   :  { %4579 = vmatprep.subr.mxu1 %v351_v22  ;;  %4545 = vmatpush3.msra.mxu0 %v303_v24  ;;  %v293_v21 = vld [vmem:[%s7995_s1 + $0x808] sm:$0xff]  ;;  %v308_v24 = vld [vmem:[%s7995_s1 + $0x880] sm:$0xff] }
  0x95   :  { %4580 = vmatpush3.msra.mxu1 %v335_v25  ;;  %4546 = vmatprep.subr.mxu0 %v318_v27  ;;  %v325_v22 = vld [vmem:[%s7995_s1 + $0x908] sm:$0xff]  ;;  %v340_v25 = vld [vmem:[%s7995_s1 + $0x980] sm:$0xff]  ;;  %v6277_v27 = vcombine.high %v6246_v13, %v6246_v13 }
  0x96   :  { %4581 = vmatprep.subr.mxu1 %v350_v28  ;;  %4547 = vmatpush3.msra.mxu0 %v302_v29  ;;  %v292_v28 = vld [vmem:[%s7995_s1 + $0x800] sm:$0xff]  ;;  %v397_v5 = vld [vmem:[%s7995_s1 + $0xb48] sm:$0xff] }
  0x97   :  { %4582 = vmatpush3.msra.mxu1 %v334_v30  ;;  %4548 = vmatprep.subr.mxu0 %v317_v32  ;;  %v324_v29 = vld [vmem:[%s7995_s1 + $0x900] sm:$0xff]  ;;  %v6287_v30 = vcombine.high %v6261_v19, %v6261_v19  ;;  %v387_v32 = vld [vmem:[%s7995_s1 + $0xaf8] sm:$0xff] }
  0x98   :  { %4583 = vmatprep.subr.mxu1 %v349_v33  ;;  %4549 = vmatpush3.msra.mxu0 %v301_v34  ;;  %v419_v33 = vld [vmem:[%s7995_s1 + $0xbf8] sm:$0xff] }
  0x99   :  { %4584 = vmatpush3.msra.mxu1 %v333_v35  ;;  %4550 = vmatprep.subr.mxu0 %v316_v37  ;;  %v371_v34 = vld [vmem:[%s7995_s1 + $0xa78] sm:$0xff]  ;;  %v386_v37 = vld [vmem:[%s7995_s1 + $0xaf0] sm:$0xff] }
  0x9a   :  { %4585 = vmatprep.subr.mxu1 %v348_v38  ;;  %4551 = vmatpush3.msra.mxu0 %v300_v40  ;;  %v403_v35 = vld [vmem:[%s7995_s1 + $0xb78] sm:$0xff]  ;;  %v418_v38 = vld [vmem:[%s7995_s1 + $0xbf0] sm:$0xff] }
  0x9b   :  { %4586 = vmatpush3.msra.mxu1 %v332_v41  ;;  %4552 = vmatprep.subr.mxu0 %v315_v43  ;;  %v370_v40 = vld [vmem:[%s7995_s1 + $0xa70] sm:$0xff]  ;;  %v385_v43 = vld [vmem:[%s7995_s1 + $0xae8] sm:$0xff] }
  0x9c   :  { %4587 = vmatprep.subr.mxu1 %v347_v44  ;;  %4553 = vmatpush3.msra.mxu0 %v299_v45  ;;  %v402_v41 = vld [vmem:[%s7995_s1 + $0xb70] sm:$0xff]  ;;  %v417_v44 = vld [vmem:[%s7995_s1 + $0xbe8] sm:$0xff] }
  0x9d   :  { %4588 = vmatpush3.msra.mxu1 %v331_v46  ;;  %4554 = vmatprep.subr.mxu0 %v314_v48  ;;  %v369_v45 = vld [vmem:[%s7995_s1 + $0xa68] sm:$0xff]  ;;  %v384_v48 = vld [vmem:[%s7995_s1 + $0xae0] sm:$0xff] }
  0x9e   :  { %4589 = vmatprep.subr.mxu1 %v346_v49  ;;  %4555 = vmatpush3.msra.mxu0 %v298_v50  ;;  %v401_v46 = vld [vmem:[%s7995_s1 + $0xb68] sm:$0xff]  ;;  %v416_v49 = vld [vmem:[%s7995_s1 + $0xbe0] sm:$0xff] }
  0x9f   :  { %4590 = vmatpush3.msra.mxu1 %v330_v52  ;;  %4556 = vmatprep.subr.mxu0 %v313_v54  ;;  %v368_v50 = vld [vmem:[%s7995_s1 + $0xa60] sm:$0xff]  ;;  %v383_v54 = vld [vmem:[%s7995_s1 + $0xad8] sm:$0xff] }
  0xa0   :  { %4591 = vmatprep.subr.mxu1 %v345_v55  ;;  %4557 = vmatpush3.msra.mxu0 %v297_v56  ;;  %v400_v52 = vld [vmem:[%s7995_s1 + $0xb60] sm:$0xff]  ;;  %v415_v55 = vld [vmem:[%s7995_s1 + $0xbd8] sm:$0xff] }
  0xa1   :  { %4592 = vmatpush3.msra.mxu1 %v329_v57  ;;  %4558 = vmatprep.subr.mxu0 %v312_v60  ;;  %v367_v56 = vld [vmem:[%s7995_s1 + $0xa58] sm:$0xff]  ;;  %v414_v60 = vld [vmem:[%s7995_s1 + $0xbd0] sm:$0xff] }
  0xa2   :  { %4593 = vmatprep.subr.mxu1 %v344_v63  ;;  %4559 = vmatpush3.msra.mxu0 %v296_v0  ;;  %v399_v57 = vld [vmem:[%s7995_s1 + $0xb58] sm:$0xff]  ;;  %v366_v63 = vld [vmem:[%s7995_s1 + $0xa50] sm:$0xff] }
  0xa3   :  { %4594 = vmatpush3.msra.mxu1 %v328_v1  ;;  %4560 = vmatprep.subr.mxu0 %v311_v2  ;;  %v398_v0 = vld [vmem:[%s7995_s1 + $0xb50] sm:$0xff]  ;;  %v381_v1 = vld [vmem:[%s7995_s1 + $0xac8] sm:$0xff] }
  0xa4   :  { %4595 = vmatprep.subr.mxu1 %v343_v4  ;;  %4561 = vmatpush3.msra.mxu0 %v295_v6  ;;  %v413_v2 = vld [vmem:[%s7995_s1 + $0xbc8] sm:$0xff]  ;;  %v380_v6 = vld [vmem:[%s7995_s1 + $0xac0] sm:$0xff] }
  0xa5   :  { %4596 = vmatpush3.msra.mxu1 %v327_v7  ;;  %4562 = vmatprep.subr.mxu0 %v310_v10  ;;  %v365_v4 = vld [vmem:[%s7995_s1 + $0xa48] sm:$0xff]  ;;  %v412_v7 = vld [vmem:[%s7995_s1 + $0xbc0] sm:$0xff] }
  0xa6   :  { %4597 = vmatprep.subr.mxu1 %v342_v12  ;;  %4563 = vmatpush3.msra.mxu0 %v294_v14  ;;  %v364_v10 = vld [vmem:[%s7995_s1 + $0xa40] sm:$0xff]  ;;  %v379_v14 = vld [vmem:[%s7995_s1 + $0xab8] sm:$0xff] }
  0xa7   :  { %4598 = vmatpush3.msra.mxu1 %v326_v16  ;;  %4564 = vmatprep.subr.mxu0 %v309_v17  ;;  %v396_v12 = vld [vmem:[%s7995_s1 + $0xb40] sm:$0xff]  ;;  %v411_v16 = vld [vmem:[%s7995_s1 + $0xbb8] sm:$0xff] }
  0xa8   :  { %4599 = vmatprep.subr.mxu1 %v341_v18  ;;  %4565 = vmatpush3.msra.mxu0 %v293_v21  ;;  %v363_v17 = vld [vmem:[%s7995_s1 + $0xa38] sm:$0xff]  ;;  %v378_v21 = vld [vmem:[%s7995_s1 + $0xab0] sm:$0xff] }
  0xa9   :  { %4600 = vmatpush3.msra.mxu1 %v325_v22  ;;  %4566 = vmatprep.subr.mxu0 %v308_v24  ;;  %v395_v18 = vld [vmem:[%s7995_s1 + $0xb38] sm:$0xff]  ;;  %v410_v22 = vld [vmem:[%s7995_s1 + $0xbb0] sm:$0xff] }
  0xaa   :  { %4601 = vmatprep.subr.mxu1 %v340_v25  ;;  %4567 = vmatpush3.msra.mxu0 %v292_v28  ;;  %v362_v24 = vld [vmem:[%s7995_s1 + $0xa30] sm:$0xff]  ;;  %v377_v28 = vld [vmem:[%s7995_s1 + $0xaa8] sm:$0xff] }
  0xab   :  { %1202 = vmatprep.mubr.f32.mxu0 %v6277_v27  ;;  %4602 = vmatpush3.msra.mxu1 %v324_v29  ;;  %v394_v25 = vld [vmem:[%s7995_s1 + $0xb30] sm:$0xff]  ;;  %v409_v29 = vld [vmem:[%s7995_s1 + $0xba8] sm:$0xff] }
  0xac   :  { %1203 = vmatmul.mubr.f32.vlgmr.msra.gmra.mxu0 %v6246_v13  ;;  %1272 = vmatprep.mubr.f32.mxu1 %v6287_v30 }
  0xad   :  { %4606 = vmatprep.subr.mxu0 %v387_v32  ;;  %4641 = vmatprep.subr.mxu1 %v419_v33  ;;  %v361_v32 = vld [vmem:[%s7995_s1 + $0xa28] sm:$0xff] }
  0xae   :  { %1273 = vmatmul.mubr.f32.vlgmr.msra.gmra.mxu1 %v6261_v19  ;;  %4607 = vmatpush3.msra.mxu0 %v371_v34  ;;  %v393_v33 = vld [vmem:[%s7995_s1 + $0xb28] sm:$0xff] }
  0xaf   :  { %4642 = vmatpush3.msra.mxu1 %v403_v35  ;;  %4608 = vmatprep.subr.mxu0 %v386_v37  ;;  %v34_v34 = vld [vmem:[%s7996_s0 + $0x28] sm:$0xff]  ;;  %v376_v35 = vld [vmem:[%s7995_s1 + $0xaa0] sm:$0xff] }
  0xb0   :  { %4643 = vmatprep.subr.mxu1 %v418_v38  ;;  %4609 = vmatpush3.msra.mxu0 %v370_v40  ;;  %v408_v37 = vld [vmem:[%s7995_s1 + $0xba0] sm:$0xff] }
  0xb1   :  { %4644 = vmatpush3.msra.mxu1 %v402_v41  ;;  %4610 = vmatprep.subr.mxu0 %v385_v43  ;;  %v360_v38 = vld [vmem:[%s7995_s1 + $0xa20] sm:$0xff]  ;;  %v375_v41 = vld [vmem:[%s7995_s1 + $0xa98] sm:$0xff] }
  0xb2   :  { %4645 = vmatprep.subr.mxu1 %v417_v44  ;;  %4611 = vmatpush3.msra.mxu0 %v369_v45  ;;  %v392_v40 = vld [vmem:[%s7995_s1 + $0xb20] sm:$0xff]  ;;  %v407_v43 = vld [vmem:[%s7995_s1 + $0xb98] sm:$0xff]  ;;  %v527_v44 = vcombine.high %v34_v34, %v34_v34 }
  0xb3   :  { %4646 = vmatpush3.msra.mxu1 %v401_v46  ;;  %4612 = vmatprep.subr.mxu0 %v384_v48  ;;  %v359_v45 = vld [vmem:[%s7995_s1 + $0xa18] sm:$0xff]  ;;  %v374_v48 = vld [vmem:[%s7995_s1 + $0xa90] sm:$0xff] }
  0xb4   :  { %4647 = vmatprep.subr.mxu1 %v416_v49  ;;  %4613 = vmatpush3.msra.mxu0 %v368_v50  ;;  %v391_v46 = vld [vmem:[%s7995_s1 + $0xb18] sm:$0xff]  ;;  %v406_v49 = vld [vmem:[%s7995_s1 + $0xb90] sm:$0xff]  ;;  %v6459_v50 = vrot.slane %v34_v34, %v5364_v51 }
  0xb5   :  { %4648 = vmatpush3.msra.mxu1 %v400_v52  ;;  %4614 = vmatprep.subr.mxu0 %v383_v54  ;;  %v358_v52 = vld [vmem:[%s7995_s1 + $0xa10] sm:$0xff] }
  0xb6   :  { %4649 = vmatprep.subr.mxu1 %v415_v55  ;;  %4615 = vmatpush3.msra.mxu0 %v367_v56  ;;  %v390_v54 = vld [vmem:[%s7995_s1 + $0xb10] sm:$0xff]  ;;  %v373_v55 = vld [vmem:[%s7995_s1 + $0xa88] sm:$0xff] }
  0xb7   :  { %4650 = vmatpush3.msra.mxu1 %v399_v57  ;;  %4616 = vmatprep.subr.mxu0 %v382_v59  ;;  %v405_v56 = vld [vmem:[%s7995_s1 + $0xb88] sm:$0xff]  ;;  %v6474_v57 = vrot.slane %v527_v44, %v5364_v51  ;;  %v1514_v34 = vld [vmem:[%s7997_s3 + $0xd0] sm:$0xff]  ;;  %v420_v44 = vld [vmem:[%s7995_s1 + $0xc00] sm:$0xff] }
  0xb8   :  { %4651 = vmatprep.subr.mxu1 %v414_v60  ;;  %4617 = vmatpush3.msra.mxu0 %v366_v63  ;;  %v357_v59 = vld [vmem:[%s7995_s1 + $0xa08] sm:$0xff]  ;;  %v372_v63 = vld [vmem:[%s7995_s1 + $0xa80] sm:$0xff] }
  0xb9   :  { %4652 = vmatpush3.msra.mxu1 %v398_v0  ;;  %4618 = vmatprep.subr.mxu0 %v381_v1  ;;  %v389_v60 = vld [vmem:[%s7995_s1 + $0xb08] sm:$0xff]  ;;  %v404_v0 = vld [vmem:[%s7995_s1 + $0xb80] sm:$0xff]  ;;  %v6490_v1 = vcombine.high %v6459_v50, %v6459_v50 }
  0xba   :  { %4653 = vmatprep.subr.mxu1 %v413_v2  ;;  %4619 = vmatpush3.msra.mxu0 %v365_v4  ;;  %v356_v2 = vld [vmem:[%s7995_s1 + $0xa00] sm:$0xff] }
  0xbb   :  { %4654 = vmatpush3.msra.mxu1 %v397_v5  ;;  %4620 = vmatprep.subr.mxu0 %v380_v6  ;;  %v388_v4 = vld [vmem:[%s7995_s1 + $0xb00] sm:$0xff]  ;;  %v6500_v5 = vcombine.high %v6474_v57, %v6474_v57  ;;  %v1519_v6 = vld [vmem:[%s7997_s3 + $0xf8] sm:$0xff] }
  0xbc   :  { %4655 = vmatprep.subr.mxu1 %v412_v7  ;;  %4621 = vmatpush3.msra.mxu0 %v364_v10  ;;  %v427_v7 = vld [vmem:[%s7995_s1 + $0xc38] sm:$0xff] }
  0xbd   :  { %4656 = vmatpush3.msra.mxu1 %v396_v12  ;;  %4622 = vmatprep.subr.mxu0 %v379_v14  ;;  %v1503_v10 = vld [vmem:[%s7997_s3 + $0x78] sm:$0xff]  ;;  %v5176_v12 = vmov 0.0   ;;  %v1518_v14 = vld [vmem:[%s7997_s3 + $0xf0] sm:$0xff] }
  0xbe   :  { %4657 = vmatprep.subr.mxu1 %v411_v16  ;;  %4623 = vmatpush3.msra.mxu0 %v363_v17  ;;  %v426_v16 = vld [vmem:[%s7995_s1 + $0xc30] sm:$0xff] }
  0xbf   :  { %4658 = vmatpush3.msra.mxu1 %v395_v18  ;;  %4624 = vmatprep.subr.mxu0 %v378_v21  ;;  %v1502_v17 = vld [vmem:[%s7997_s3 + $0x70] sm:$0xff]  ;;  %v1517_v18 = vld [vmem:[%s7997_s3 + $0xe8] sm:$0xff] }
  0xc0   :  { %4659 = vmatprep.subr.mxu1 %v410_v22  ;;  %4625 = vmatpush3.msra.mxu0 %v362_v24  ;;  %v425_v21 = vld [vmem:[%s7995_s1 + $0xc28] sm:$0xff]  ;;  %v1516_v24 = vld [vmem:[%s7997_s3 + $0xe0] sm:$0xff] }
  0xc1   :  { %4660 = vmatpush3.msra.mxu1 %v394_v25  ;;  %4626 = vmatprep.subr.mxu0 %v377_v28  ;;  %v1501_v22 = vld [vmem:[%s7997_s3 + $0x68] sm:$0xff]  ;;  %v424_v25 = vld [vmem:[%s7995_s1 + $0xc20] sm:$0xff] }
  0xc2   :  { %4661 = vmatprep.subr.mxu1 %v409_v29  ;;  %4627 = vmatpush3.msra.mxu0 %v361_v32  ;;  %v1500_v28 = vld [vmem:[%s7997_s3 + $0x60] sm:$0xff]  ;;  %v1515_v29 = vld [vmem:[%s7997_s3 + $0xd8] sm:$0xff] }
  0xc3   :  { %4662 = vmatpush3.msra.mxu1 %v393_v33  ;;  %4628 = vmatprep.subr.mxu0 %v376_v35  ;;  %v423_v32 = vld [vmem:[%s7995_s1 + $0xc18] sm:$0xff]  ;;  %v422_v35 = vld [vmem:[%s7995_s1 + $0xc10] sm:$0xff] }
  0xc4   :  { %4663 = vmatprep.subr.mxu1 %v408_v37  ;;  %4629 = vmatpush3.msra.mxu0 %v360_v38  ;;  %v1499_v33 = vld [vmem:[%s7997_s3 + $0x58] sm:$0xff]  ;;  %v1498_v37 = vld [vmem:[%s7997_s3 + $0x50] sm:$0xff]  ;;  %v1513_v38 = vld [vmem:[%s7997_s3 + $0xc8] sm:$0xff] }
  0xc5   :  { %4664 = vmatpush3.msra.mxu1 %v392_v40  ;;  %4630 = vmatprep.subr.mxu0 %v375_v41  ;;  %v421_v40 = vld [vmem:[%s7995_s1 + $0xc08] sm:$0xff] }
  0xc6   :  { %4665 = vmatprep.subr.mxu1 %v407_v43  ;;  %4631 = vmatpush3.msra.mxu0 %v359_v45  ;;  %v1497_v41 = vld [vmem:[%s7997_s3 + $0x48] sm:$0xff]  ;;  %v1512_v43 = vld [vmem:[%s7997_s3 + $0xc0] sm:$0xff] }
  0xc7   :  { %4666 = vmatpush3.msra.mxu1 %v391_v46  ;;  %4632 = vmatprep.subr.mxu0 %v374_v48  ;;  %v1496_v45 = vld [vmem:[%s7997_s3 + $0x40] sm:$0xff]  ;;  %v4212_v46 = vld.sshfl [vmem:[%s7996_s0 + $0x30] sm:$0x3 pattern:$0x76325410]  ;;  %v1511_v48 = vld [vmem:[%s7997_s3 + $0xb8] sm:$0xff] }
  0xc8   :  { %4667 = vmatprep.subr.mxu1 %v406_v49  ;;  %4633 = vmatpush3.msra.mxu0 %v358_v52  ;;  %v1551_v49 = vld [vmem:[%s7997_s3 + $0x1f8] sm:$0xff] }
  0xc9   :  { %4668 = vmatpush3.msra.mxu1 %v390_v54  ;;  %4634 = vmatprep.subr.mxu0 %v373_v55  ;;  %v1495_v52 = vld [vmem:[%s7997_s3 + $0x38] sm:$0xff]  ;;  %v1510_v55 = vld [vmem:[%s7997_s3 + $0xb0] sm:$0xff] }
  0xca   :  { %4669 = vmatprep.subr.mxu1 %v405_v56  ;;  %4635 = vmatpush3.msra.mxu0 %v357_v59  ;;  %v1535_v54 = vld [vmem:[%s7997_s3 + $0x178] sm:$0xff]  ;;  %v1550_v56 = vld [vmem:[%s7997_s3 + $0x1f0] sm:$0xff] }
  0xcb   :  { %4670 = vmatpush3.msra.mxu1 %v389_v60  ;;  %4636 = vmatprep.subr.mxu0 %v372_v63  ;;  %v1494_v59 = vld [vmem:[%s7997_s3 + $0x30] sm:$0xff]  ;;  %v1509_v63 = vld [vmem:[%s7997_s3 + $0xa8] sm:$0xff] }
  0xcc   :  { %4671 = vmatprep.subr.mxu1 %v404_v0  ;;  %4637 = vmatpush3.msra.mxu0 %v356_v2  ;;  %v1534_v60 = vld [vmem:[%s7997_s3 + $0x170] sm:$0xff]  ;;  %v1549_v0 = vld [vmem:[%s7997_s3 + $0x1e8] sm:$0xff] }
  0xcd   :  { %1342 = vmatprep.mubr.f32.mxu0 %v6490_v1  ;;  %4672 = vmatpush3.msra.mxu1 %v388_v4  ;;  %v1493_v2 = vld [vmem:[%s7997_s3 + $0x28] sm:$0xff] }
  0xce   :  { %1343 = vmatmul.mubr.f32.vlgmr.msra.gmra.mxu0 %v6459_v50  ;;  %1412 = vmatprep.mubr.f32.mxu1 %v6500_v5  ;;  %v1533_v4 = vld [vmem:[%s7997_s3 + $0x168] sm:$0xff] }
  0xcf   :  { %5116 = vmatprep.subr.mxu0 %v5176_v12  ;;  %4685 = vmatprep.subr.mxu1 %v1519_v6  ;;  %v1508_v6 = vld [vmem:[%s7997_s3 + $0xa0] sm:$0xff] }
  0xd0   :  { %1413 = vmatmul.mubr.f32.vlgmr.msra.gmra.mxu1 %v6474_v57  ;;  %5117 = vmatpush3.msra.mxu0 %v427_v7  ;;  %v1548_v7 = vld [vmem:[%s7997_s3 + $0x1e0] sm:$0xff] }
  0xd1   :  { %4686 = vmatpush3.msra.mxu1 %v1503_v10  ;;  %5118 = vmatprep.subr.mxu0 %v5176_v12 }
  0xd2   :  { %4687 = vmatprep.subr.mxu1 %v1518_v14  ;;  %5119 = vmatpush3.msra.mxu0 %v426_v16  ;;  %v1492_v14 = vld [vmem:[%s7997_s3 + $0x20] sm:$0xff] }
  0xd3   :  { %4688 = vmatpush3.msra.mxu1 %v1502_v17  ;;  %5120 = vmatprep.subr.mxu0 %v5176_v12  ;;  %v1532_v16 = vld [vmem:[%s7997_s3 + $0x160] sm:$0xff]  ;;  %v1507_v17 = vld [vmem:[%s7997_s3 + $0x98] sm:$0xff] }
  0xd4   :  { %4689 = vmatprep.subr.mxu1 %v1517_v18  ;;  %5121 = vmatpush3.msra.mxu0 %v425_v21  ;;  %v1547_v18 = vld [vmem:[%s7997_s3 + $0x1d8] sm:$0xff] }
  0xd5   :  { %4690 = vmatpush3.msra.mxu1 %v1501_v22  ;;  %5122 = vmatprep.subr.mxu0 %v5176_v12  ;;  %v1491_v22 = vld [vmem:[%s7997_s3 + $0x18] sm:$0xff] }
  0xd6   :  { %4691 = vmatprep.subr.mxu1 %v1516_v24  ;;  %5123 = vmatpush3.msra.mxu0 %v424_v25  ;;  %v1531_v24 = vld [vmem:[%s7997_s3 + $0x158] sm:$0xff] }
  0xd7   :  { %4692 = vmatpush3.msra.mxu1 %v1500_v28  ;;  %5124 = vmatprep.subr.mxu0 %v5176_v12  ;;  %v1506_v28 = vld [vmem:[%s7997_s3 + $0x90] sm:$0xff] }
  0xd8   :  { %4693 = vmatprep.subr.mxu1 %v1515_v29  ;;  %5125 = vmatpush3.msra.mxu0 %v423_v32  ;;  %v1546_v29 = vld [vmem:[%s7997_s3 + $0x1d0] sm:$0xff] }
  0xd9   :  { %4694 = vmatpush3.msra.mxu1 %v1499_v33  ;;  %5126 = vmatprep.subr.mxu0 %v5176_v12  ;;  %v1490_v32 = vld [vmem:[%s7997_s3 + $0x10] sm:$0xff] }
  0xda   :  { %4695 = vmatprep.subr.mxu1 %v1514_v34  ;;  %5127 = vmatpush3.msra.mxu0 %v422_v35  ;;  %v1530_v33 = vld [vmem:[%s7997_s3 + $0x150] sm:$0xff]  ;;  %v1505_v34 = vld [vmem:[%s7997_s3 + $0x88] sm:$0xff] }
  0xdb   :  { %4696 = vmatpush3.msra.mxu1 %v1498_v37  ;;  %5128 = vmatprep.subr.mxu0 %v5176_v12  ;;  %v1545_v35 = vld [vmem:[%s7997_s3 + $0x1c8] sm:$0xff] }
  0xdc   :  { %4697 = vmatprep.subr.mxu1 %v1513_v38  ;;  %5129 = vmatpush3.msra.mxu0 %v421_v40  ;;  %v1489_v37 = vld [vmem:[%s7997_s3 + $0x8] sm:$0xff]  ;;  %v1504_v40 = vld [vmem:[%s7997_s3 + $0x80] sm:$0xff] }
  0xdd   :  { %4698 = vmatpush3.msra.mxu1 %v1497_v41  ;;  %5130 = vmatprep.subr.mxu0 %v5176_v12  ;;  %v1529_v38 = vld [vmem:[%s7997_s3 + $0x148] sm:$0xff]  ;;  %v1544_v41 = vld [vmem:[%s7997_s3 + $0x1c0] sm:$0xff] }
  0xde   :  { %4699 = vmatprep.subr.mxu1 %v1512_v43  ;;  %5131 = vmatpush3.msra.mxu0 %v420_v44  ;;  %v1488_v43 = vld [vmem:[%s7997_s3] sm:$0xff] }
  0xdf   :  { %5132 = vmatprep.mubr.msk.f32.mxu0 %vm5177_vm1, %v5176_v12  ;;  %4700 = vmatpush3.msra.mxu1 %v1496_v45  ;;  %v1528_v44 = vld [vmem:[%s7997_s3 + $0x140] sm:$0xff]  ;;  %v1543_v45 = vld [vmem:[%s7997_s3 + $0x1b8] sm:$0xff] }
  0xe0   :  { %5133 = vmatmul.mubr.msk.f32.vlgmr.msra.gmra.mxu0 %vm575_vm0, %v4212_v46  ;;  %4701 = vmatprep.subr.mxu1 %v1511_v48  ;;  %v1583_v46 = vld [vmem:[%s7997_s3 + $0x2f8] sm:$0xff] }
  0xe1   :  { %4720 = vmatprep.subr.mxu0 %v1551_v49  ;;  %4702 = vmatpush3.msra.mxu1 %v1495_v52  ;;  %v1527_v48 = vld [vmem:[%s7997_s3 + $0x138] sm:$0xff]  ;;  %v1542_v52 = vld [vmem:[%s7997_s3 + $0x1b0] sm:$0xff] }
  0xe2   :  { %4721 = vmatpush3.msra.mxu0 %v1535_v54  ;;  %4703 = vmatprep.subr.mxu1 %v1510_v55  ;;  %v1567_v49 = vld [vmem:[%s7997_s3 + $0x278] sm:$0xff]  ;;  %v1582_v54 = vld [vmem:[%s7997_s3 + $0x2f0] sm:$0xff] }
  0xe3   :  { %4722 = vmatprep.subr.mxu0 %v1550_v56  ;;  %4704 = vmatpush3.msra.mxu1 %v1494_v59  ;;  %v1526_v55 = vld [vmem:[%s7997_s3 + $0x130] sm:$0xff]  ;;  %v1541_v56 = vld [vmem:[%s7997_s3 + $0x1a8] sm:$0xff] }
  0xe4   :  { %4723 = vmatpush3.msra.mxu0 %v1534_v60  ;;  %v4288_v10 = vpop.f32.mrf.mxu0  ;;  %4705 = vmatprep.subr.mxu1 %v1509_v63  ;;  %v1581_v59 = vld [vmem:[%s7997_s3 + $0x2e8] sm:$0xff]  ;;  %v1540_v63 = vld [vmem:[%s7997_s3 + $0x1a0] sm:$0xff] }
  0xe5   :  { %4724 = vmatprep.subr.mxu0 %v1549_v0  ;;  %4706 = vmatpush3.msra.mxu1 %v1493_v2  ;;  %v1565_v60 = vld [vmem:[%s7997_s3 + $0x268] sm:$0xff]  ;;  %v1580_v0 = vld [vmem:[%s7997_s3 + $0x2e0] sm:$0xff] }
  0xe6   :  { %4725 = vmatpush3.msra.mxu0 %v1533_v4  ;;  %v4289_v21 = vpop.f32.mrf.mxu0  ;;  %4707 = vmatprep.subr.mxu1 %v1508_v6  ;;  %v1524_v2 = vld [vmem:[%s7997_s3 + $0x120] sm:$0xff]  ;;  %v1539_v6 = vld [vmem:[%s7997_s3 + $0x198] sm:$0xff] }
  0xe7   :  { %4726 = vmatprep.subr.mxu0 %v1548_v7  ;;  %v6652_v25 = vadd.f32 %v4289_v21, %v4288_v10  ;;  %4708 = vmatpush3.msra.mxu1 %v1492_v14  ;;  %v1564_v4 = vld [vmem:[%s7997_s3 + $0x260] sm:$0xff]  ;;  %v1579_v7 = vld [vmem:[%s7997_s3 + $0x2d8] sm:$0xff]  ;;  %v1562_v21 = vld [vmem:[%s7997_s3 + $0x250] sm:$0xff] }
  0xe8   :  { %4727 = vmatpush3.msra.mxu0 %v1532_v16  ;;  %4709 = vmatprep.subr.mxu1 %v1507_v17  ;;  %v1523_v10 = vld [vmem:[%s7997_s3 + $0x118] sm:$0xff]  ;;  %v1538_v16 = vld [vmem:[%s7997_s3 + $0x190] sm:$0xff] }
  0xe9   :  { %4728 = vmatprep.subr.mxu0 %v1547_v18  ;;  %4710 = vmatpush3.msra.mxu1 %v1491_v22  ;;  %v1563_v14 = vld [vmem:[%s7997_s3 + $0x258] sm:$0xff]  ;;  %v1578_v17 = vld [vmem:[%s7997_s3 + $0x2d0] sm:$0xff]  ;;  %v1537_v22 = vld [vmem:[%s7997_s3 + $0x188] sm:$0xff] }
  0xea   :  { %4729 = vmatpush3.msra.mxu0 %v1531_v24  ;;  %4711 = vmatprep.subr.mxu1 %v1506_v28  ;;  %v1522_v18 = vld [vmem:[%s7997_s3 + $0x110] sm:$0xff]  ;;  %v1577_v24 = vld [vmem:[%s7997_s3 + $0x2c8] sm:$0xff] }
  0xeb   :  { %4730 = vmatprep.subr.mxu0 %v1546_v29  ;;  %4712 = vmatpush3.msra.mxu1 %v1490_v32  ;;  %v1521_v28 = vld [vmem:[%s7997_s3 + $0x108] sm:$0xff]  ;;  %v1536_v32 = vld [vmem:[%s7997_s3 + $0x180] sm:$0xff] }
  0xec   :  { %4731 = vmatpush3.msra.mxu0 %v1530_v33  ;;  %4713 = vmatprep.subr.mxu1 %v1505_v34  ;;  %v1561_v29 = vld [vmem:[%s7997_s3 + $0x248] sm:$0xff]  ;;  %v1576_v33 = vld [vmem:[%s7997_s3 + $0x2c0] sm:$0xff]  ;;  %v4323_v34 = vpop.f32.mrf.mxu1 }
  0xed   :  { %4732 = vmatprep.subr.mxu0 %v1545_v35  ;;  %4714 = vmatpush3.msra.mxu1 %v1489_v37  ;;  %v1520_v35 = vld [vmem:[%s7997_s3 + $0x100] sm:$0xff] }
  0xee   :  { %4733 = vmatpush3.msra.mxu0 %v1529_v38  ;;  %4715 = vmatprep.subr.mxu1 %v1504_v40  ;;  %v1560_v37 = vld [vmem:[%s7997_s3 + $0x240] sm:$0xff]  ;;  %v1575_v38 = vld [vmem:[%s7997_s3 + $0x2b8] sm:$0xff] }
  0xef   :  { %4734 = vmatprep.subr.mxu0 %v1544_v41  ;;  %4716 = vmatpush3.msra.mxu1 %v1488_v43  ;;  %v1615_v40 = vld [vmem:[%s7997_s3 + $0x3f8] sm:$0xff] }
  0xf0   :  { %4735 = vmatpush3.msra.mxu0 %v1528_v44  ;;  %1951 = vmatprep.mubr.f32.mxu1 %v5425_v8  ;;  %v1566_v8 = vld [vmem:[%s7997_s3 + $0x270] sm:$0xff]  ;;  %v1559_v41 = vld [vmem:[%s7997_s3 + $0x238] sm:$0xff]  ;;  %v4211_v44 = vld [vmem:[%s7998_s2] ss:$0 sm:$0xff] }
  0xf1   :  { %4736 = vmatprep.subr.mxu0 %v1543_v45  ;;  %4755 = vmatprep.subr.mxu1 %v1583_v46  ;;  %v1599_v43 = vld [vmem:[%s7997_s3 + $0x378] sm:$0xff]  ;;  %v4324_v45 = vpop.f32.mrf.mxu1  ;;  %v1614_v46 = vld [vmem:[%s7997_s3 + $0x3f0] sm:$0xff] }
  0xf2   :  { %1952 = vmatmul.mubr.f32.vlgmr.msra.gmra.mxu1 %v5394_v62  ;;  %4737 = vmatpush3.msra.mxu0 %v1527_v48  ;;  %v1525_v62 = vld [vmem:[%s7997_s3 + $0x128] sm:$0xff]  ;;  %v1558_v48 = vld [vmem:[%s7997_s3 + $0x230] sm:$0xff] }
  0xf3   :  { %4756 = vmatpush3.msra.mxu1 %v1567_v49  ;;  %4738 = vmatprep.subr.mxu0 %v1542_v52  ;;  %v1598_v49 = vld [vmem:[%s7997_s3 + $0x370] sm:$0xff]  ;;  %v1613_v52 = vld [vmem:[%s7997_s3 + $0x3e8] sm:$0xff] }
  0xf4   :  { %4757 = vmatprep.subr.mxu1 %v1582_v54  ;;  %4739 = vmatpush3.msra.mxu0 %v1526_v55  ;;  %v645_v54 = vadd.f32 %v6652_v25, %v4211_v44  ;;  %v4325_v55 = vadd.f32 %v4324_v45, %v4323_v34  ;;  %v1612_v25 = vld [vmem:[%s7997_s3 + $0x3e0] sm:$0xff]  ;;  %v1606_v44 = vld [vmem:[%s7997_s3 + $0x3b0] sm:$0xff] }
  0xf5   :  { %4758 = vmatpush3.msra.mxu1 %v1566_v8  ;;  %4740 = vmatprep.subr.mxu0 %v1541_v56  ;;  %v1557_v8 = vld [vmem:[%s7997_s3 + $0x228] sm:$0xff]  ;;  %v1608_v34 = vld [vmem:[%s7997_s3 + $0x3c0] sm:$0xff]  ;;  %v1646_v45 = vld [vmem:[%s7997_s3 + $0x4f0] sm:$0xff] }
  0xf6   :  { %4759 = vmatprep.subr.mxu1 %v1581_v59  ;;  %4741 = vmatpush3.msra.mxu0 %v1525_v62  ;;  %v1597_v56 = vld [vmem:[%s7997_s3 + $0x368] sm:$0xff]  ;;  %v1572_v59 = vld [vmem:[%s7997_s3 + $0x2a0] sm:$0xff] }
  0xf7   :  { %4760 = vmatpush3.msra.mxu1 %v1565_v60  ;;  %4742 = vmatprep.subr.mxu0 %v1540_v63  ;;  %v1556_v60 = vld [vmem:[%s7997_s3 + $0x220] sm:$0xff] }
  0xf8   :  { %4761 = vmatprep.subr.mxu1 %v1580_v0  ;;  %4743 = vmatpush3.msra.mxu0 %v1524_v2  ;;  %v1596_v63 = vld [vmem:[%s7997_s3 + $0x360] sm:$0xff]  ;;  %v1571_v0 = vld [vmem:[%s7997_s3 + $0x298] sm:$0xff] }
  0xf9   :  { %4762 = vmatpush3.msra.mxu1 %v1564_v4  ;;  %4744 = vmatprep.subr.mxu0 %v1539_v6  ;;  %v1611_v2 = vld [vmem:[%s7997_s3 + $0x3d8] sm:$0xff]  ;;  %v715_v6 = vadd.f32 %v4325_v55, %v645_v54  ;;  %v1588_v54 = vld [vmem:[%s7997_s3 + $0x320] sm:$0xff] }
  0xfa   :  { %4763 = vmatprep.subr.mxu1 %v1579_v7  ;;  %4745 = vmatpush3.msra.mxu0 %v1523_v10  ;;  %v1555_v7 = vld [vmem:[%s7997_s3 + $0x218] sm:$0xff]  ;;  %v1628_v55 = vld [vmem:[%s7997_s3 + $0x460] sm:$0xff] }
  0xfb   :  { %4764 = vmatpush3.msra.mxu1 %v1563_v14  ;;  %4746 = vmatprep.subr.mxu0 %v1538_v16  ;;  %v1595_v10 = vld [vmem:[%s7997_s3 + $0x358] sm:$0xff]  ;;  %v1570_v16 = vld [vmem:[%s7997_s3 + $0x290] sm:$0xff] }
  0xfc   :  { %4765 = vmatprep.subr.mxu1 %v1578_v17  ;;  %4747 = vmatpush3.msra.mxu0 %v1522_v18  ;;  %v1610_v17 = vld [vmem:[%s7997_s3 + $0x3d0] sm:$0xff] }
  0xfd   :  { %4766 = vmatpush3.msra.mxu1 %v1562_v21  ;;  %4748 = vmatprep.subr.mxu0 %v1537_v22  ;;  %v1554_v18 = vld [vmem:[%s7997_s3 + $0x210] sm:$0xff] }
  0xfe   :  { %4767 = vmatprep.subr.mxu1 %v1577_v24  ;;  %4749 = vmatpush3.msra.mxu0 %v1521_v28  ;;  %v1594_v21 = vld [vmem:[%s7997_s3 + $0x350] sm:$0xff]  ;;  %v1569_v24 = vld [vmem:[%s7997_s3 + $0x288] sm:$0xff] }
  0xff   :  { %4768 = vmatpush3.msra.mxu1 %v1561_v29  ;;  %4750 = vmatprep.subr.mxu0 %v1536_v32  ;;  %v1609_v28 = vld [vmem:[%s7997_s3 + $0x3c8] sm:$0xff] }
 0x100   :  { %4769 = vmatprep.subr.mxu1 %v1576_v33  ;;  %4751 = vmatpush3.msra.mxu0 %v1520_v35  ;;  %v1553_v29 = vld [vmem:[%s7997_s3 + $0x208] sm:$0xff]  ;;  %v1568_v33 = vld [vmem:[%s7997_s3 + $0x280] sm:$0xff] }
 0x101   :  { %2021 = vmatprep.mubr.f32.mxu0 %v5435_v11  ;;  %4770 = vmatpush3.msra.mxu1 %v1560_v37  ;;  %v1574_v11 = vld [vmem:[%s7997_s3 + $0x2b0] sm:$0xff]  ;;  %v1593_v32 = vld [vmem:[%s7997_s3 + $0x348] sm:$0xff]  ;;  %v1552_v35 = vld [vmem:[%s7997_s3 + $0x200] sm:$0xff] }
 0x102   :  { %2022 = vmatmul.mubr.f32.vlgmr.msra.gmra.mxu0 %v5409_v3  ;;  %4771 = vmatprep.subr.mxu1 %v1575_v38  ;;  %v1573_v3 = vld [vmem:[%s7997_s3 + $0x2a8] sm:$0xff]  ;;  %v1592_v37 = vld [vmem:[%s7997_s3 + $0x340] sm:$0xff]  ;;  %v1607_v38 = vld [vmem:[%s7997_s3 + $0x3b8] sm:$0xff] }
 0x103   :  { %4790 = vmatprep.subr.mxu0 %v1615_v40  ;;  %4772 = vmatpush3.msra.mxu1 %v1559_v41  ;;  %v1647_v40 = vld [vmem:[%s7997_s3 + $0x4f8] sm:$0xff] }
 0x104   :  { %4791 = vmatpush3.msra.mxu0 %v1599_v43  ;;  %4773 = vmatprep.subr.mxu1 %v1574_v11  ;;  %v1591_v41 = vld [vmem:[%s7997_s3 + $0x338] sm:$0xff]  ;;  %v1630_v11 = vld [vmem:[%s7997_s3 + $0x470] sm:$0xff] }
 0x105   :  { %4792 = vmatprep.subr.mxu0 %v1614_v46  ;;  %4774 = vmatpush3.msra.mxu1 %v1558_v48  ;;  %v1631_v43 = vld [vmem:[%s7997_s3 + $0x478] sm:$0xff]  ;;  %v1645_v46 = vld [vmem:[%s7997_s3 + $0x4e8] sm:$0xff] }
 0x106   :  { %4793 = vmatpush3.msra.mxu0 %v1598_v49  ;;  %v4358_v62 = vpop.f32.mrf.mxu0  ;;  %4775 = vmatprep.subr.mxu1 %v1573_v3  ;;  %v1589_v48 = vld [vmem:[%s7997_s3 + $0x328] sm:$0xff]  ;;  %v1604_v3 = vld [vmem:[%s7997_s3 + $0x3a0] sm:$0xff] }
 0x107   :  { %4794 = vmatprep.subr.mxu0 %v1613_v52  ;;  %4776 = vmatpush3.msra.mxu1 %v1557_v8  ;;  %v1629_v49 = vld [vmem:[%s7997_s3 + $0x468] sm:$0xff]  ;;  %v1644_v52 = vld [vmem:[%s7997_s3 + $0x4e0] sm:$0xff]  ;;  %v1603_v8 = vld [vmem:[%s7997_s3 + $0x398] sm:$0xff] }
 0x108   :  { %4795 = vmatpush3.msra.mxu0 %v1597_v56  ;;  %v4359_v4 = vpop.f32.mrf.mxu0  ;;  %4777 = vmatprep.subr.mxu1 %v1572_v59  ;;  %v1643_v56 = vld [vmem:[%s7997_s3 + $0x4d8] sm:$0xff] }
 0x109   :  { %4796 = vmatprep.subr.mxu0 %v1612_v25  ;;  %v4360_v14 = vadd.f32 %v4359_v4, %v4358_v62  ;;  %4778 = vmatpush3.msra.mxu1 %v1556_v60  ;;  %v1587_v59 = vld [vmem:[%s7997_s3 + $0x318] sm:$0xff]  ;;  %v1602_v62 = vld [vmem:[%s7997_s3 + $0x390] sm:$0xff]  ;;  %v1641_v4 = vld [vmem:[%s7997_s3 + $0x4c8] sm:$0xff] }
 0x10a   :  { %4797 = vmatpush3.msra.mxu0 %v1596_v63  ;;  %4779 = vmatprep.subr.mxu1 %v1571_v0  ;;  %v1627_v25 = vld [vmem:[%s7997_s3 + $0x458] sm:$0xff]  ;;  %v1642_v60 = vld [vmem:[%s7997_s3 + $0x4d0] sm:$0xff] }
 0x10b   :  { %4798 = vmatprep.subr.mxu0 %v1611_v2  ;;  %v6866_v22 = vadd.f32 %v4360_v14, %v715_v6  ;;  %4780 = vmatpush3.msra.mxu1 %v1555_v7  ;;  %v1586_v63 = vld [vmem:[%s7997_s3 + $0x310] sm:$0xff]  ;;  %v1601_v2 = vld [vmem:[%s7997_s3 + $0x388] sm:$0xff]  ;;  %v1640_v14 = vld [vmem:[%s7997_s3 + $0x4c0] sm:$0xff] }
 0x10c   :  { %4799 = vmatpush3.msra.mxu0 %v1595_v10  ;;  %4781 = vmatprep.subr.mxu1 %v1570_v16  ;;  %v1626_v0 = vld [vmem:[%s7997_s3 + $0x450] sm:$0xff]  ;;  %v1585_v6 = vld [vmem:[%s7997_s3 + $0x308] sm:$0xff]  ;;  %v1600_v10 = vld [vmem:[%s7997_s3 + $0x380] sm:$0xff]  ;;  %v4393_v16 = vpop.f32.mrf.mxu1 }
 0x10d   :  { %4800 = vmatprep.subr.mxu0 %v1610_v17  ;;  %4782 = vmatpush3.msra.mxu1 %v1554_v18  ;;  %v1625_v7 = vld [vmem:[%s7997_s3 + $0x448] sm:$0xff]  ;;  %v1584_v17 = vld [vmem:[%s7997_s3 + $0x300] sm:$0xff] }
 0x10e   :  { %4801 = vmatpush3.msra.mxu0 %v1594_v21  ;;  %4783 = vmatprep.subr.mxu1 %v1569_v24  ;;  %v1624_v18 = vld [vmem:[%s7997_s3 + $0x440] sm:$0xff]  ;;  %v1639_v21 = vld [vmem:[%s7997_s3 + $0x4b8] sm:$0xff] }
 0x10f   :  { %4802 = vmatprep.subr.mxu0 %v1609_v28  ;;  %4784 = vmatpush3.msra.mxu1 %v1553_v29  ;;  %v1679_v24 = vld [vmem:[%s7997_s3 + $0x5f8] sm:$0xff] }
 0x110   :  { %4803 = vmatpush3.msra.mxu0 %v1593_v32  ;;  %4785 = vmatprep.subr.mxu1 %v1568_v33  ;;  %v1623_v28 = vld [vmem:[%s7997_s3 + $0x438] sm:$0xff]  ;;  %v4394_v32 = vpop.f32.mrf.mxu1  ;;  %v1638_v33 = vld [vmem:[%s7997_s3 + $0x4b0] sm:$0xff] }
 0x111   :  { %4804 = vmatprep.subr.mxu0 %v1608_v34  ;;  %4786 = vmatpush3.msra.mxu1 %v1552_v35  ;;  %v1663_v29 = vld [vmem:[%s7997_s3 + $0x578] sm:$0xff]  ;;  %v1622_v34 = vld [vmem:[%s7997_s3 + $0x430] sm:$0xff] }
 0x112   :  { %2091 = vmatprep.mubr.f32.mxu1 %v5638_v20  ;;  %4805 = vmatpush3.msra.mxu0 %v1592_v37  ;;  %v1590_v20 = vld [vmem:[%s7997_s3 + $0x330] sm:$0xff]  ;;  %v1677_v37 = vld [vmem:[%s7997_s3 + $0x5e8] sm:$0xff] }
 0x113   :  { %2092 = vmatmul.mubr.f32.vlgmr.msra.gmra.mxu1 %v5607_v9  ;;  %4806 = vmatprep.subr.mxu0 %v1607_v38  ;;  %v1605_v9 = vld [vmem:[%s7997_s3 + $0x3a8] sm:$0xff]  ;;  %v1662_v35 = vld [vmem:[%s7997_s3 + $0x570] sm:$0xff]  ;;  %v4395_v38 = vadd.f32 %v4394_v32, %v4393_v16  ;;  %v1695_v16 = vld [vmem:[%s7997_s3 + $0x678] sm:$0xff] }
 0x114   :  { %4825 = vmatprep.subr.mxu1 %v1647_v40  ;;  %4807 = vmatpush3.msra.mxu0 %v1591_v41  ;;  %v1621_v40 = vld [vmem:[%s7997_s3 + $0x428] sm:$0xff]  ;;  %v1668_v32 = vld [vmem:[%s7997_s3 + $0x5a0] sm:$0xff] }
 0x115   :  { %4826 = vmatpush3.msra.mxu1 %v1631_v43  ;;  %4808 = vmatprep.subr.mxu0 %v1606_v44  ;;  %v1661_v41 = vld [vmem:[%s7997_s3 + $0x568] sm:$0xff]  ;;  %v1636_v43 = vld [vmem:[%s7997_s3 + $0x4a0] sm:$0xff] }
 0x116   :  { %4827 = vmatprep.subr.mxu1 %v1646_v45  ;;  %4809 = vmatpush3.msra.mxu0 %v1590_v20  ;;  %v1676_v44 = vld [vmem:[%s7997_s3 + $0x5e0] sm:$0xff] }
 0x117   :  { %4828 = vmatpush3.msra.mxu1 %v1630_v11  ;;  %4810 = vmatprep.subr.mxu0 %v1605_v9  ;;  %v1620_v20 = vld [vmem:[%s7997_s3 + $0x420] sm:$0xff]  ;;  %v1635_v9 = vld [vmem:[%s7997_s3 + $0x498] sm:$0xff] }
 0x118   :  { %4829 = vmatprep.subr.mxu1 %v1645_v46  ;;  %4811 = vmatpush3.msra.mxu0 %v1589_v48  ;;  %v1660_v11 = vld [vmem:[%s7997_s3 + $0x560] sm:$0xff]  ;;  %v1675_v46 = vld [vmem:[%s7997_s3 + $0x5d8] sm:$0xff] }
 0x119   :  { %4830 = vmatpush3.msra.mxu1 %v1629_v49  ;;  %4812 = vmatprep.subr.mxu0 %v1604_v3  ;;  %v855_v49 = vadd.f32 %v4395_v38, %v6866_v22  ;;  %v1619_v3 = vld [vmem:[%s7997_s3 + $0x418] sm:$0xff]  ;;  %v1674_v22 = vld [vmem:[%s7997_s3 + $0x5d0] sm:$0xff] }
 0x11a   :  { %4831 = vmatprep.subr.mxu1 %v1644_v52  ;;  %4813 = vmatpush3.msra.mxu0 %v1588_v54  ;;  %v1659_v52 = vld [vmem:[%s7997_s3 + $0x558] sm:$0xff] }
 0x11b   :  { %4832 = vmatpush3.msra.mxu1 %v1628_v55  ;;  %4814 = vmatprep.subr.mxu0 %v1603_v8  ;;  %v1634_v55 = vld [vmem:[%s7997_s3 + $0x490] sm:$0xff]  ;;  %v1691_v38 = vld [vmem:[%s7997_s3 + $0x658] sm:$0xff] }
 0x11c   :  { %4833 = vmatprep.subr.mxu1 %v1643_v56  ;;  %4815 = vmatpush3.msra.mxu0 %v1587_v59  ;;  %v1618_v8 = vld [vmem:[%s7997_s3 + $0x410] sm:$0xff] }
 0x11d   :  { %4834 = vmatpush3.msra.mxu1 %v1627_v25  ;;  %4816 = vmatprep.subr.mxu0 %v1602_v62  ;;  %v1658_v56 = vld [vmem:[%s7997_s3 + $0x550] sm:$0xff]  ;;  %v1633_v25 = vld [vmem:[%s7997_s3 + $0x488] sm:$0xff] }
 0x11e   :  { %4835 = vmatprep.subr.mxu1 %v1642_v60  ;;  %4817 = vmatpush3.msra.mxu0 %v1586_v63  ;;  %v1673_v62 = vld [vmem:[%s7997_s3 + $0x5c8] sm:$0xff] }
 0x11f   :  { %4836 = vmatpush3.msra.mxu1 %v1626_v0  ;;  %4818 = vmatprep.subr.mxu0 %v1601_v2  ;;  %v1617_v60 = vld [vmem:[%s7997_s3 + $0x408] sm:$0xff]  ;;  %v1632_v0 = vld [vmem:[%s7997_s3 + $0x480] sm:$0xff] }
 0x120   :  { %4837 = vmatprep.subr.mxu1 %v1641_v4  ;;  %4819 = vmatpush3.msra.mxu0 %v1585_v6  ;;  %v1657_v63 = vld [vmem:[%s7997_s3 + $0x548] sm:$0xff]  ;;  %v1672_v2 = vld [vmem:[%s7997_s3 + $0x5c0] sm:$0xff] }
 0x121   :  { %4838 = vmatpush3.msra.mxu1 %v1625_v7  ;;  %4820 = vmatprep.subr.mxu0 %v1600_v10  ;;  %v1616_v4 = vld [vmem:[%s7997_s3 + $0x400] sm:$0xff]  ;;  %v1671_v7 = vld [vmem:[%s7997_s3 + $0x5b8] sm:$0xff] }
 0x122   :  { %4839 = vmatprep.subr.mxu1 %v1640_v14  ;;  %4821 = vmatpush3.msra.mxu0 %v1584_v17  ;;  %v1656_v6 = vld [vmem:[%s7997_s3 + $0x540] sm:$0xff]  ;;  %v1711_v10 = vld [vmem:[%s7997_s3 + $0x6f8] sm:$0xff]  ;;  %v1670_v17 = vld [vmem:[%s7997_s3 + $0x5b0] sm:$0xff] }
 0x123   :  { %2161 = vmatprep.mubr.f32.mxu0 %v5648_v23  ;;  %4840 = vmatpush3.msra.mxu1 %v1624_v18  ;;  %v1678_v23 = vld [vmem:[%s7997_s3 + $0x5f0] sm:$0xff]  ;;  %v1655_v14 = vld [vmem:[%s7997_s3 + $0x538] sm:$0xff] }
 0x124   :  { %2162 = vmatmul.mubr.f32.vlgmr.msra.gmra.mxu0 %v5622_v15  ;;  %4841 = vmatprep.subr.mxu1 %v1639_v21  ;;  %v1637_v15 = vld [vmem:[%s7997_s3 + $0x4a8] sm:$0xff]  ;;  %v1710_v18 = vld [vmem:[%s7997_s3 + $0x6f0] sm:$0xff] }
 0x125   :  { %4860 = vmatprep.subr.mxu0 %v1679_v24  ;;  %4842 = vmatpush3.msra.mxu1 %v1623_v28  ;;  %v1694_v21 = vld [vmem:[%s7997_s3 + $0x670] sm:$0xff]  ;;  %v1709_v24 = vld [vmem:[%s7997_s3 + $0x6e8] sm:$0xff] }
 0x126   :  { %4861 = vmatpush3.msra.mxu0 %v1663_v29  ;;  %4843 = vmatprep.subr.mxu1 %v1638_v33  ;;  %v1653_v28 = vld [vmem:[%s7997_s3 + $0x528] sm:$0xff]  ;;  %v1708_v33 = vld [vmem:[%s7997_s3 + $0x6e0] sm:$0xff] }
 0x127   :  { %4862 = vmatprep.subr.mxu0 %v1678_v23  ;;  %4844 = vmatpush3.msra.mxu1 %v1622_v34  ;;  %v1693_v29 = vld [vmem:[%s7997_s3 + $0x668] sm:$0xff]  ;;  %v1652_v23 = vld [vmem:[%s7997_s3 + $0x520] sm:$0xff] }
 0x128   :  { %4863 = vmatpush3.msra.mxu0 %v1662_v35  ;;  %v4428_v45 = vpop.f32.mrf.mxu0  ;;  %4845 = vmatprep.subr.mxu1 %v1637_v15  ;;  %v1692_v34 = vld [vmem:[%s7997_s3 + $0x660] sm:$0xff]  ;;  %v1667_v35 = vld [vmem:[%s7997_s3 + $0x598] sm:$0xff] }
 0x129   :  { %4864 = vmatprep.subr.mxu0 %v1677_v37  ;;  %4846 = vmatpush3.msra.mxu1 %v1621_v40  ;;  %v1707_v15 = vld [vmem:[%s7997_s3 + $0x6d8] sm:$0xff]  ;;  %v1666_v40 = vld [vmem:[%s7997_s3 + $0x590] sm:$0xff] }
 0x12a   :  { %4865 = vmatpush3.msra.mxu0 %v1661_v41  ;;  %v4429_v48 = vpop.f32.mrf.mxu0  ;;  %4847 = vmatprep.subr.mxu1 %v1636_v43  ;;  %v1651_v37 = vld [vmem:[%s7997_s3 + $0x518] sm:$0xff]  ;;  %v1706_v41 = vld [vmem:[%s7997_s3 + $0x6d0] sm:$0xff] }
 0x12b   :  { %4866 = vmatprep.subr.mxu0 %v1676_v44  ;;  %v4430_v54 = vadd.f32 %v4429_v48, %v4428_v45  ;;  %4848 = vmatpush3.msra.mxu1 %v1620_v20  ;;  %v1650_v43 = vld [vmem:[%s7997_s3 + $0x510] sm:$0xff]  ;;  %v1665_v45 = vld [vmem:[%s7997_s3 + $0x588] sm:$0xff]  ;;  %v1704_v48 = vld [vmem:[%s7997_s3 + $0x6c0] sm:$0xff] }
 0x12c   :  { %4867 = vmatpush3.msra.mxu0 %v1660_v11  ;;  %4849 = vmatprep.subr.mxu1 %v1635_v9  ;;  %v1690_v44 = vld [vmem:[%s7997_s3 + $0x650] sm:$0xff]  ;;  %v1705_v20 = vld [vmem:[%s7997_s3 + $0x6c8] sm:$0xff] }
 0x12d   :  { %4868 = vmatprep.subr.mxu0 %v1675_v46  ;;  %v7065_v59 = vadd.f32 %v4430_v54, %v855_v49  ;;  %4850 = vmatpush3.msra.mxu1 %v1619_v3  ;;  %v1649_v11 = vld [vmem:[%s7997_s3 + $0x508] sm:$0xff]  ;;  %v1664_v46 = vld [vmem:[%s7997_s3 + $0x580] sm:$0xff]  ;;  %v4463_v49 = vpop.f32.mrf.mxu1  ;;  %v1703_v54 = vld [vmem:[%s7997_s3 + $0x6b8] sm:$0xff] }
 0x12e   :  { %4869 = vmatpush3.msra.mxu0 %v1659_v52  ;;  %4851 = vmatprep.subr.mxu1 %v1634_v55  ;;  %v1689_v9 = vld [vmem:[%s7997_s3 + $0x648] sm:$0xff]  ;;  %v1648_v3 = vld [vmem:[%s7997_s3 + $0x500] sm:$0xff]  ;;  %v1743_v55 = vld [vmem:[%s7997_s3 + $0x7f8] sm:$0xff] }
 0x12f   :  { %4870 = vmatprep.subr.mxu0 %v1674_v22  ;;  %4852 = vmatpush3.msra.mxu1 %v1618_v8  ;;  %v1688_v52 = vld [vmem:[%s7997_s3 + $0x640] sm:$0xff]  ;;  %v1687_v22 = vld [vmem:[%s7997_s3 + $0x638] sm:$0xff] }
 0x130   :  { %4871 = vmatpush3.msra.mxu0 %v1658_v56  ;;  %4853 = vmatprep.subr.mxu1 %v1633_v25  ;;  %v1727_v8 = vld [vmem:[%s7997_s3 + $0x778] sm:$0xff]  ;;  %v4464_v56 = vpop.f32.mrf.mxu1  ;;  %v1702_v25 = vld [vmem:[%s7997_s3 + $0x6b0] sm:$0xff] }
 0x131   :  { %4872 = vmatprep.subr.mxu0 %v1673_v62  ;;  %4854 = vmatpush3.msra.mxu1 %v1617_v60  ;;  %v1686_v62 = vld [vmem:[%s7997_s3 + $0x630] sm:$0xff] }
 0x132   :  { %4873 = vmatpush3.msra.mxu0 %v1657_v63  ;;  %4855 = vmatprep.subr.mxu1 %v1632_v0  ;;  %v1726_v60 = vld [vmem:[%s7997_s3 + $0x770] sm:$0xff]  ;;  %v1741_v63 = vld [vmem:[%s7997_s3 + $0x7e8] sm:$0xff]  ;;  %v4465_v0 = vadd.f32 %v4464_v56, %v4463_v49  ;;  %v1731_v56 = vld [vmem:[%s7997_s3 + $0x798] sm:$0xff] }
 0x133   :  { %4874 = vmatprep.subr.mxu0 %v1672_v2  ;;  %4856 = vmatpush3.msra.mxu1 %v1616_v4  ;;  %v1685_v2 = vld [vmem:[%s7997_s3 + $0x628] sm:$0xff] }
 0x134   :  { %2231 = vmatprep.mubr.f32.mxu1 %v5851_v36  ;;  %4875 = vmatpush3.msra.mxu0 %v1656_v6  ;;  %v1654_v36 = vld [vmem:[%s7997_s3 + $0x530] sm:$0xff]  ;;  %v1725_v4 = vld [vmem:[%s7997_s3 + $0x768] sm:$0xff]  ;;  %v1700_v6 = vld [vmem:[%s7997_s3 + $0x6a0] sm:$0xff] }
 0x135   :  { %2232 = vmatmul.mubr.f32.vlgmr.msra.gmra.mxu1 %v5820_v26  ;;  %4876 = vmatprep.subr.mxu0 %v1671_v7  ;;  %v1669_v26 = vld [vmem:[%s7997_s3 + $0x5a8] sm:$0xff]  ;;  %v1740_v7 = vld [vmem:[%s7997_s3 + $0x7e0] sm:$0xff] }
 0x136   :  { %4895 = vmatprep.subr.mxu1 %v1711_v10  ;;  %4877 = vmatpush3.msra.mxu0 %v1655_v14  ;;  %v1684_v14 = vld [vmem:[%s7997_s3 + $0x620] sm:$0xff]  ;;  %v1773_v49 = vld [vmem:[%s7997_s3 + $0x8e8] sm:$0xff] }
 0x137   :  { %4896 = vmatpush3.msra.mxu1 %v1695_v16  ;;  %4878 = vmatprep.subr.mxu0 %v1670_v17  ;;  %v1724_v16 = vld [vmem:[%s7997_s3 + $0x760] sm:$0xff]  ;;  %v1699_v17 = vld [vmem:[%s7997_s3 + $0x698] sm:$0xff] }
 0x138   :  { %4897 = vmatprep.subr.mxu1 %v1710_v18  ;;  %4879 = vmatpush3.msra.mxu0 %v1654_v36  ;;  %v1739_v18 = vld [vmem:[%s7997_s3 + $0x7d8] sm:$0xff] }
 0x139   :  { %4898 = vmatpush3.msra.mxu1 %v1694_v21  ;;  %4880 = vmatprep.subr.mxu0 %v1669_v26  ;;  %v995_v21 = vadd.f32 %v4465_v0, %v7065_v59  ;;  %v1683_v26 = vld [vmem:[%s7997_s3 + $0x618] sm:$0xff]  ;;  %v1738_v59 = vld [vmem:[%s7997_s3 + $0x7d0] sm:$0xff] }
 0x13a   :  { %4899 = vmatprep.subr.mxu1 %v1709_v24  ;;  %4881 = vmatpush3.msra.mxu0 %v1653_v28  ;;  %v1723_v24 = vld [vmem:[%s7997_s3 + $0x758] sm:$0xff]  ;;  %v1754_v0 = vld [vmem:[%s7997_s3 + $0x850] sm:$0xff] }
 0x13b   :  { %4900 = vmatpush3.msra.mxu1 %v1693_v29  ;;  %4882 = vmatprep.subr.mxu0 %v1668_v32  ;;  %v1698_v29 = vld [vmem:[%s7997_s3 + $0x690] sm:$0xff] }
 0x13c   :  { %4901 = vmatprep.subr.mxu1 %v1708_v33  ;;  %4883 = vmatpush3.msra.mxu0 %v1652_v23  ;;  %v1682_v32 = vld [vmem:[%s7997_s3 + $0x610] sm:$0xff] }
 0x13d   :  { %4902 = vmatpush3.msra.mxu1 %v1692_v34  ;;  %4884 = vmatprep.subr.mxu0 %v1667_v35  ;;  %v1722_v33 = vld [vmem:[%s7997_s3 + $0x750] sm:$0xff]  ;;  %v1697_v34 = vld [vmem:[%s7997_s3 + $0x688] sm:$0xff] }
 0x13e   :  { %4903 = vmatprep.subr.mxu1 %v1707_v15  ;;  %4885 = vmatpush3.msra.mxu0 %v1651_v37  ;;  %v1737_v35 = vld [vmem:[%s7997_s3 + $0x7c8] sm:$0xff] }
 0x13f   :  { %4904 = vmatpush3.msra.mxu1 %v1691_v38  ;;  %4886 = vmatprep.subr.mxu0 %v1666_v40  ;;  %v1681_v15 = vld [vmem:[%s7997_s3 + $0x608] sm:$0xff]  ;;  %v1696_v38 = vld [vmem:[%s7997_s3 + $0x680] sm:$0xff] }
 0x140   :  { %4905 = vmatprep.subr.mxu1 %v1706_v41  ;;  %4887 = vmatpush3.msra.mxu0 %v1650_v43  ;;  %v1721_v37 = vld [vmem:[%s7997_s3 + $0x748] sm:$0xff]  ;;  %v1736_v40 = vld [vmem:[%s7997_s3 + $0x7c0] sm:$0xff] }
 0x141   :  { %4906 = vmatpush3.msra.mxu1 %v1690_v44  ;;  %4888 = vmatprep.subr.mxu0 %v1665_v45  ;;  %v1680_v41 = vld [vmem:[%s7997_s3 + $0x600] sm:$0xff]  ;;  %v1735_v44 = vld [vmem:[%s7997_s3 + $0x7b8] sm:$0xff] }
 0x142   :  { %4907 = vmatprep.subr.mxu1 %v1705_v20  ;;  %4889 = vmatpush3.msra.mxu0 %v1649_v11  ;;  %v1720_v43 = vld [vmem:[%s7997_s3 + $0x740] sm:$0xff]  ;;  %v1775_v45 = vld [vmem:[%s7997_s3 + $0x8f8] sm:$0xff] }
 0x143   :  { %4908 = vmatpush3.msra.mxu1 %v1689_v9  ;;  %4890 = vmatprep.subr.mxu0 %v1664_v46  ;;  %v1719_v20 = vld [vmem:[%s7997_s3 + $0x738] sm:$0xff]  ;;  %v1734_v9 = vld [vmem:[%s7997_s3 + $0x7b0] sm:$0xff] }
 0x144   :  { %4909 = vmatprep.subr.mxu1 %v1704_v48  ;;  %4891 = vmatpush3.msra.mxu0 %v1648_v3  ;;  %v1759_v11 = vld [vmem:[%s7997_s3 + $0x878] sm:$0xff]  ;;  %v1774_v46 = vld [vmem:[%s7997_s3 + $0x8f0] sm:$0xff]  ;;  %v1717_v3 = vld [vmem:[%s7997_s3 + $0x728] sm:$0xff] }
 0x145   :  { %2301 = vmatprep.mubr.f32.mxu0 %v5861_v39  ;;  %4910 = vmatpush3.msra.mxu1 %v1688_v52  ;;  %v1742_v39 = vld [vmem:[%s7997_s3 + $0x7f0] sm:$0xff]  ;;  %v1757_v52 = vld [vmem:[%s7997_s3 + $0x868] sm:$0xff] }
 0x146   :  { %2302 = vmatmul.mubr.f32.vlgmr.msra.gmra.mxu0 %v5835_v31  ;;  %4911 = vmatprep.subr.mxu1 %v1703_v54  ;;  %v1701_v31 = vld [vmem:[%s7997_s3 + $0x6a8] sm:$0xff]  ;;  %v1758_v48 = vld [vmem:[%s7997_s3 + $0x870] sm:$0xff]  ;;  %v1732_v54 = vld [vmem:[%s7997_s3 + $0x7a0] sm:$0xff] }
 0x147   :  { %4930 = vmatprep.subr.mxu0 %v1743_v55  ;;  %4912 = vmatpush3.msra.mxu1 %v1687_v22  ;;  %v1772_v55 = vld [vmem:[%s7997_s3 + $0x8e0] sm:$0xff] }
 0x148   :  { %4931 = vmatpush3.msra.mxu0 %v1727_v8  ;;  %4913 = vmatprep.subr.mxu1 %v1702_v25  ;;  %v1716_v22 = vld [vmem:[%s7997_s3 + $0x720] sm:$0xff]  ;;  %v1771_v25 = vld [vmem:[%s7997_s3 + $0x8d8] sm:$0xff] }
 0x149   :  { %4932 = vmatprep.subr.mxu0 %v1742_v39  ;;  %4914 = vmatpush3.msra.mxu1 %v1686_v62  ;;  %v1756_v8 = vld [vmem:[%s7997_s3 + $0x860] sm:$0xff]  ;;  %v1715_v39 = vld [vmem:[%s7997_s3 + $0x718] sm:$0xff] }
 0x14a   :  { %4933 = vmatpush3.msra.mxu0 %v1726_v60  ;;  %v4498_v10 = vpop.f32.mrf.mxu0  ;;  %4915 = vmatprep.subr.mxu1 %v1701_v31  ;;  %v1755_v62 = vld [vmem:[%s7997_s3 + $0x858] sm:$0xff]  ;;  %v1730_v60 = vld [vmem:[%s7997_s3 + $0x790] sm:$0xff] }
 0x14b   :  { %4934 = vmatprep.subr.mxu0 %v1741_v63  ;;  %4916 = vmatpush3.msra.mxu1 %v1685_v2  ;;  %v1770_v31 = vld [vmem:[%s7997_s3 + $0x8d0] sm:$0xff]  ;;  %v1729_v2 = vld [vmem:[%s7997_s3 + $0x788] sm:$0xff] }
 0x14c   :  { %4935 = vmatpush3.msra.mxu0 %v1725_v4  ;;  %v4499_v36 = vpop.f32.mrf.mxu0  ;;  %4917 = vmatprep.subr.mxu1 %v1700_v6  ;;  %v1714_v63 = vld [vmem:[%s7997_s3 + $0x710] sm:$0xff]  ;;  %v1769_v4 = vld [vmem:[%s7997_s3 + $0x8c8] sm:$0xff] }
 0x14d   :  { %4936 = vmatprep.subr.mxu0 %v1740_v7  ;;  %v4500_v28 = vadd.f32 %v4499_v36, %v4498_v10  ;;  %4918 = vmatpush3.msra.mxu1 %v1684_v14  ;;  %v1713_v6 = vld [vmem:[%s7997_s3 + $0x708] sm:$0xff]  ;;  %v1728_v10 = vld [vmem:[%s7997_s3 + $0x780] sm:$0xff]  ;;  %v1767_v36 = vld [vmem:[%s7997_s3 + $0x8b8] sm:$0xff] }
 0x14e   :  { %4937 = vmatpush3.msra.mxu0 %v1724_v16  ;;  %4919 = vmatprep.subr.mxu1 %v1699_v17  ;;  %v1753_v7 = vld [vmem:[%s7997_s3 + $0x848] sm:$0xff]  ;;  %v1768_v14 = vld [vmem:[%s7997_s3 + $0x8c0] sm:$0xff]  ;;  %v4533_v16 = vpop.f32.mrf.mxu1 }
 0x14f   :  { %4938 = vmatprep.subr.mxu0 %v1739_v18  ;;  %v7264_v23 = vadd.f32 %v4500_v28, %v995_v21  ;;  %4920 = vmatpush3.msra.mxu1 %v1683_v26  ;;  %v1712_v17 = vld [vmem:[%s7997_s3 + $0x700] sm:$0xff]  ;;  %v1807_v21 = vld [vmem:[%s7997_s3 + $0x9f8] sm:$0xff] }
 0x150   :  { %4939 = vmatpush3.msra.mxu0 %v1723_v24  ;;  %4921 = vmatprep.subr.mxu1 %v1698_v29  ;;  %v1752_v18 = vld [vmem:[%s7997_s3 + $0x840] sm:$0xff]  ;;  %v1751_v26 = vld [vmem:[%s7997_s3 + $0x838] sm:$0xff]  ;;  %v4534_v28 = vpop.f32.mrf.mxu1  ;;  %v1766_v29 = vld [vmem:[%s7997_s3 + $0x8b0] sm:$0xff] }
 0x151   :  { %4940 = vmatprep.subr.mxu0 %v1738_v59  ;;  %4922 = vmatpush3.msra.mxu1 %v1682_v32  ;;  %v1791_v24 = vld [vmem:[%s7997_s3 + $0x978] sm:$0xff]  ;;  %v1750_v59 = vld [vmem:[%s7997_s3 + $0x830] sm:$0xff] }
 0x152   :  { %4941 = vmatpush3.msra.mxu0 %v1722_v33  ;;  %4923 = vmatprep.subr.mxu1 %v1697_v34  ;;  %v1790_v32 = vld [vmem:[%s7997_s3 + $0x970] sm:$0xff]  ;;  %v1805_v33 = vld [vmem:[%s7997_s3 + $0x9e8] sm:$0xff]  ;;  %v4535_v34 = vadd.f32 %v4534_v28, %v4533_v16  ;;  %v1836_v16 = vld [vmem:[%s7997_s3 + $0xae0] sm:$0xff] }
 0x153   :  { %4942 = vmatprep.subr.mxu0 %v1737_v35  ;;  %4924 = vmatpush3.msra.mxu1 %v1681_v15  ;;  %v1749_v35 = vld [vmem:[%s7997_s3 + $0x828] sm:$0xff]  ;;  %v1794_v28 = vld [vmem:[%s7997_s3 + $0x990] sm:$0xff] }
 0x154   :  { %4943 = vmatpush3.msra.mxu0 %v1721_v37  ;;  %4925 = vmatprep.subr.mxu1 %v1696_v38  ;;  %v1789_v15 = vld [vmem:[%s7997_s3 + $0x968] sm:$0xff]  ;;  %v1764_v37 = vld [vmem:[%s7997_s3 + $0x8a0] sm:$0xff] }
 0x155   :  { %4944 = vmatprep.subr.mxu0 %v1736_v40  ;;  %4926 = vmatpush3.msra.mxu1 %v1680_v41  ;;  %v1804_v38 = vld [vmem:[%s7997_s3 + $0x9e0] sm:$0xff] }
 0x156   :  { %2371 = vmatprep.mubr.f32.mxu1 %v6064_v58  ;;  %4945 = vmatpush3.msra.mxu0 %v1720_v43  ;;  %v1718_v58 = vld [vmem:[%s7997_s3 + $0x730] sm:$0xff]  ;;  %v1748_v41 = vld [vmem:[%s7997_s3 + $0x820] sm:$0xff] }
 0x157   :  { %2372 = vmatmul.mubr.f32.vlgmr.msra.gmra.mxu1 %v6033_v47  ;;  %4946 = vmatprep.subr.mxu0 %v1735_v44  ;;  %v1733_v47 = vld [vmem:[%s7997_s3 + $0x7a8] sm:$0xff]  ;;  %v1788_v43 = vld [vmem:[%s7997_s3 + $0x960] sm:$0xff]  ;;  %v1763_v44 = vld [vmem:[%s7997_s3 + $0x898] sm:$0xff] }
 0x158   :  { %4965 = vmatprep.subr.mxu1 %v1775_v45  ;;  %4947 = vmatpush3.msra.mxu0 %v1719_v20  ;;  %v1803_v45 = vld [vmem:[%s7997_s3 + $0x9d8] sm:$0xff] }
 0x159   :  { %4966 = vmatpush3.msra.mxu1 %v1759_v11  ;;  %4948 = vmatprep.subr.mxu0 %v1734_v9  ;;  %v1135_v11 = vadd.f32 %v4535_v34, %v7264_v23  ;;  %v1747_v9 = vld [vmem:[%s7997_s3 + $0x818] sm:$0xff]  ;;  %v1802_v23 = vld [vmem:[%s7997_s3 + $0x9d0] sm:$0xff]  ;;  %v1817_v34 = vld [vmem:[%s7997_s3 + $0xa48] sm:$0xff] }
 0x15a   :  { %4967 = vmatprep.subr.mxu1 %v1774_v46  ;;  %4949 = vmatpush3.msra.mxu0 %v1718_v58  ;;  %v1787_v46 = vld [vmem:[%s7997_s3 + $0x958] sm:$0xff] }
 0x15b   :  { %4968 = vmatpush3.msra.mxu1 %v1758_v48  ;;  %4950 = vmatprep.subr.mxu0 %v1733_v47  ;;  %v1762_v48 = vld [vmem:[%s7997_s3 + $0x890] sm:$0xff] }
 0x15c   :  { %4969 = vmatprep.subr.mxu1 %v1773_v49  ;;  %4951 = vmatpush3.msra.mxu0 %v1717_v3  ;;  %v1746_v47 = vld [vmem:[%s7997_s3 + $0x810] sm:$0xff] }
 0x15d   :  { %4970 = vmatpush3.msra.mxu1 %v1757_v52  ;;  %4952 = vmatprep.subr.mxu0 %v1732_v54  ;;  %v1786_v49 = vld [vmem:[%s7997_s3 + $0x950] sm:$0xff]  ;;  %v1761_v52 = vld [vmem:[%s7997_s3 + $0x888] sm:$0xff] }
 0x15e   :  { %4971 = vmatprep.subr.mxu1 %v1772_v55  ;;  %4953 = vmatpush3.msra.mxu0 %v1716_v22  ;;  %v1801_v54 = vld [vmem:[%s7997_s3 + $0x9c8] sm:$0xff] }
 0x15f   :  { %4972 = vmatpush3.msra.mxu1 %v1756_v8  ;;  %4954 = vmatprep.subr.mxu0 %v1731_v56  ;;  %v1745_v55 = vld [vmem:[%s7997_s3 + $0x808] sm:$0xff]  ;;  %v1760_v8 = vld [vmem:[%s7997_s3 + $0x880] sm:$0xff] }
 0x160   :  { %4973 = vmatprep.subr.mxu1 %v1771_v25  ;;  %4955 = vmatpush3.msra.mxu0 %v1715_v39  ;;  %v1785_v22 = vld [vmem:[%s7997_s3 + $0x948] sm:$0xff]  ;;  %v1800_v56 = vld [vmem:[%s7997_s3 + $0x9c0] sm:$0xff] }
 0x161   :  { %4974 = vmatpush3.msra.mxu1 %v1755_v62  ;;  %4956 = vmatprep.subr.mxu0 %v1730_v60  ;;  %v1744_v25 = vld [vmem:[%s7997_s3 + $0x800] sm:$0xff]  ;;  %v1799_v62 = vld [vmem:[%s7997_s3 + $0x9b8] sm:$0xff] }
 0x162   :  { %4975 = vmatprep.subr.mxu1 %v1770_v31  ;;  %4957 = vmatpush3.msra.mxu0 %v1714_v63  ;;  %v1784_v39 = vld [vmem:[%s7997_s3 + $0x940] sm:$0xff]  ;;  %v1839_v60 = vld [vmem:[%s7997_s3 + $0xaf8] sm:$0xff] }
 0x163   :  { %4976 = vmatpush3.msra.mxu1 %v1754_v0  ;;  %4958 = vmatprep.subr.mxu0 %v1729_v2  ;;  %v1783_v31 = vld [vmem:[%s7997_s3 + $0x938] sm:$0xff]  ;;  %v1798_v0 = vld [vmem:[%s7997_s3 + $0x9b0] sm:$0xff] }
 0x164   :  { %4977 = vmatprep.subr.mxu1 %v1769_v4  ;;  %4959 = vmatpush3.msra.mxu0 %v1713_v6  ;;  %v1823_v63 = vld [vmem:[%s7997_s3 + $0xa78] sm:$0xff]  ;;  %v1838_v2 = vld [vmem:[%s7997_s3 + $0xaf0] sm:$0xff]  ;;  %v1837_v6 = vld [vmem:[%s7997_s3 + $0xae8] sm:$0xff] }
 0x165   :  { %4978 = vmatpush3.msra.mxu1 %v1753_v7  ;;  %4960 = vmatprep.subr.mxu0 %v1728_v10  ;;  %v1822_v4 = vld [vmem:[%s7997_s3 + $0xa70] sm:$0xff]  ;;  %v1781_v7 = vld [vmem:[%s7997_s3 + $0x928] sm:$0xff] }
 0x166   :  { %4979 = vmatprep.subr.mxu1 %v1768_v14  ;;  %4961 = vmatpush3.msra.mxu0 %v1712_v17  ;;  %v1821_v10 = vld [vmem:[%s7997_s3 + $0xa68] sm:$0xff]  ;;  %v1796_v14 = vld [vmem:[%s7997_s3 + $0x9a0] sm:$0xff] }
 0x167   :  { %2441 = vmatprep.mubr.f32.mxu0 %v6074_v61  ;;  %4980 = vmatpush3.msra.mxu1 %v1752_v18  ;;  %v1806_v61 = vld [vmem:[%s7997_s3 + $0x9f0] sm:$0xff]  ;;  %v1780_v17 = vld [vmem:[%s7997_s3 + $0x920] sm:$0xff] }
 0x168   :  { %2442 = vmatmul.mubr.f32.vlgmr.msra.gmra.mxu0 %v6048_v53  ;;  %4981 = vmatprep.subr.mxu1 %v1767_v36  ;;  %v1765_v53 = vld [vmem:[%s7997_s3 + $0x8a8] sm:$0xff]  ;;  %v1820_v18 = vld [vmem:[%s7997_s3 + $0xa60] sm:$0xff]  ;;  %v1795_v36 = vld [vmem:[%s7997_s3 + $0x998] sm:$0xff] }
 0x169   :  { %5000 = vmatprep.subr.mxu0 %v1807_v21  ;;  %4982 = vmatpush3.msra.mxu1 %v1751_v26  ;;  %v1835_v21 = vld [vmem:[%s7997_s3 + $0xad8] sm:$0xff] }
 0x16a   :  { %5001 = vmatpush3.msra.mxu0 %v1791_v24  ;;  %4983 = vmatprep.subr.mxu1 %v1766_v29  ;;  %v1779_v26 = vld [vmem:[%s7997_s3 + $0x918] sm:$0xff]  ;;  %v1834_v29 = vld [vmem:[%s7997_s3 + $0xad0] sm:$0xff] }
 0x16b   :  { %5002 = vmatprep.subr.mxu0 %v1806_v61  ;;  %4984 = vmatpush3.msra.mxu1 %v1750_v59  ;;  %v1819_v24 = vld [vmem:[%s7997_s3 + $0xa58] sm:$0xff]  ;;  %v1778_v61 = vld [vmem:[%s7997_s3 + $0x910] sm:$0xff] }
 0x16c   :  { %5003 = vmatpush3.msra.mxu0 %v1790_v32  ;;  %v4568_v40 = vpop.f32.mrf.mxu0  ;;  %4985 = vmatprep.subr.mxu1 %v1765_v53  ;;  %v1818_v59 = vld [vmem:[%s7997_s3 + $0xa50] sm:$0xff]  ;;  %v1793_v32 = vld [vmem:[%s7997_s3 + $0x988] sm:$0xff] }
 0x16d   :  { %5004 = vmatprep.subr.mxu0 %v1805_v33  ;;  %4986 = vmatpush3.msra.mxu1 %v1749_v35  ;;  %v1833_v53 = vld [vmem:[%s7997_s3 + $0xac8] sm:$0xff]  ;;  %v1792_v35 = vld [vmem:[%s7997_s3 + $0x980] sm:$0xff] }
 0x16e   :  { %5005 = vmatpush3.msra.mxu0 %v1789_v15  ;;  %v4569_v20 = vpop.f32.mrf.mxu0  ;;  %4987 = vmatprep.subr.mxu1 %v1764_v37  ;;  %v1777_v33 = vld [vmem:[%s7997_s3 + $0x908] sm:$0xff]  ;;  %v1832_v15 = vld [vmem:[%s7997_s3 + $0xac0] sm:$0xff]  ;;  %v4603_v37 = vpop.f32.mrf.mxu1 }
 0x16f   :  { %5006 = vmatprep.subr.mxu0 %v1804_v38  ;;  %v4570_v58 = vadd.f32 %v4569_v20, %v4568_v40  ;;  %4988 = vmatpush3.msra.mxu1 %v1748_v41  ;;  %v1776_v38 = vld [vmem:[%s7997_s3 + $0x900] sm:$0xff]  ;;  %v1831_v41 = vld [vmem:[%s7997_s3 + $0xab8] sm:$0xff] }
 0x170   :  { %5007 = vmatpush3.msra.mxu0 %v1788_v43  ;;  %4989 = vmatprep.subr.mxu1 %v1763_v44  ;;  %v1816_v40 = vld [vmem:[%s7997_s3 + $0xa40] sm:$0xff]  ;;  %v1871_v43 = vld [vmem:[%s7997_s3 + $0xbf8] sm:$0xff]  ;;  %v4604_v20 = vpop.f32.mrf.mxu1 }
 0x171   :  { %5008 = vmatprep.subr.mxu0 %v1803_v45  ;;  %v7463_v3 = vadd.f32 %v4570_v58, %v1135_v11  ;;  %4990 = vmatpush3.msra.mxu1 %v1747_v9  ;;  %v1815_v44 = vld [vmem:[%s7997_s3 + $0xa38] sm:$0xff]  ;;  %v1830_v11 = vld [vmem:[%s7997_s3 + $0xab0] sm:$0xff]  ;;  %v1869_v58 = vld [vmem:[%s7997_s3 + $0xbe8] sm:$0xff] }
 0x172   :  { %5009 = vmatpush3.msra.mxu0 %v1787_v46  ;;  %4991 = vmatprep.subr.mxu1 %v1762_v48  ;;  %v1855_v45 = vld [vmem:[%s7997_s3 + $0xb78] sm:$0xff]  ;;  %v1814_v9 = vld [vmem:[%s7997_s3 + $0xa30] sm:$0xff]  ;;  %v4605_v48 = vadd.f32 %v4604_v20, %v4603_v37  ;;  %v1857_v20 = vld [vmem:[%s7997_s3 + $0xb88] sm:$0xff] }
 0x173   :  { %5010 = vmatprep.subr.mxu0 %v1802_v23  ;;  %4992 = vmatpush3.msra.mxu1 %v1746_v47  ;;  %v1854_v46 = vld [vmem:[%s7997_s3 + $0xb70] sm:$0xff]  ;;  %v1813_v23 = vld [vmem:[%s7997_s3 + $0xa28] sm:$0xff]  ;;  %v1859_v37 = vld [vmem:[%s7997_s3 + $0xb98] sm:$0xff] }
 0x174   :  { %5011 = vmatpush3.msra.mxu0 %v1786_v49  ;;  %4993 = vmatprep.subr.mxu1 %v1761_v52  ;;  %v1853_v47 = vld [vmem:[%s7997_s3 + $0xb68] sm:$0xff]  ;;  %v1828_v49 = vld [vmem:[%s7997_s3 + $0xaa0] sm:$0xff] }
 0x175   :  { %5012 = vmatprep.subr.mxu0 %v1801_v54  ;;  %4994 = vmatpush3.msra.mxu1 %v1745_v55  ;;  %v1868_v52 = vld [vmem:[%s7997_s3 + $0xbe0] sm:$0xff] }
 0x176   :  { %5013 = vmatpush3.msra.mxu0 %v1785_v22  ;;  %4995 = vmatprep.subr.mxu1 %v1760_v8  ;;  %v1812_v55 = vld [vmem:[%s7997_s3 + $0xa20] sm:$0xff]  ;;  %v1827_v8 = vld [vmem:[%s7997_s3 + $0xa98] sm:$0xff] }
 0x177   :  { %5014 = vmatprep.subr.mxu0 %v1800_v56  ;;  %4996 = vmatpush3.msra.mxu1 %v1744_v25  ;;  %v1852_v22 = vld [vmem:[%s7997_s3 + $0xb60] sm:$0xff]  ;;  %v1867_v56 = vld [vmem:[%s7997_s3 + $0xbd8] sm:$0xff] }
 0x178   :  { %2511 = vmatprep.mubr.f32.mxu1 %v6277_v27  ;;  %5015 = vmatpush3.msra.mxu0 %v1784_v39  ;;  %v1782_v27 = vld [vmem:[%s7997_s3 + $0x930] sm:$0xff]  ;;  %v1275_v39 = vadd.f32 %v4605_v48, %v7463_v3  ;;  %v2800_v48 = vld [vmem:[%s7999_s6] sm:$0xff] }
 0x179   :  { %2512 = vmatmul.mubr.f32.vlgmr.msra.gmra.mxu1 %v6246_v13  ;;  %5016 = vmatprep.subr.mxu0 %v1799_v62  ;;  %v1797_v13 = vld [vmem:[%s7997_s3 + $0x9a8] sm:$0xff]  ;;  %v1811_v62 = vld [vmem:[%s7997_s3 + $0xa18] sm:$0xff]  ;;  %v1866_v3 = vld [vmem:[%s7997_s3 + $0xbd0] sm:$0xff] }
 0x17a   :  { %5035 = vmatprep.subr.mxu1 %v1839_v60  ;;  %5017 = vmatpush3.msra.mxu0 %v1783_v31  ;;  %v1851_v60 = vld [vmem:[%s7997_s3 + $0xb58] sm:$0xff] }
 0x17b   :  { %5036 = vmatpush3.msra.mxu1 %v1823_v63  ;;  %5018 = vmatprep.subr.mxu0 %v1798_v0  ;;  %v1826_v63 = vld [vmem:[%s7997_s3 + $0xa90] sm:$0xff] }
 0x17c   :  { %5037 = vmatprep.subr.mxu1 %v1838_v2  ;;  %5019 = vmatpush3.msra.mxu0 %v1782_v27  ;;  %v1810_v0 = vld [vmem:[%s7997_s3 + $0xa10] sm:$0xff] }
 0x17d   :  { %5038 = vmatpush3.msra.mxu1 %v1822_v4  ;;  %5020 = vmatprep.subr.mxu0 %v1797_v13  ;;  %v1850_v2 = vld [vmem:[%s7997_s3 + $0xb50] sm:$0xff]  ;;  %v1825_v4 = vld [vmem:[%s7997_s3 + $0xa88] sm:$0xff] }
 0x17e   :  { %5039 = vmatprep.subr.mxu1 %v1837_v6  ;;  %5021 = vmatpush3.msra.mxu0 %v1781_v7  ;;  %v1865_v13 = vld [vmem:[%s7997_s3 + $0xbc8] sm:$0xff] }
 0x17f   :  { %5040 = vmatpush3.msra.mxu1 %v1821_v10  ;;  %5022 = vmatprep.subr.mxu0 %v1796_v14  ;;  %v1809_v7 = vld [vmem:[%s7997_s3 + $0xa08] sm:$0xff]  ;;  %v1824_v14 = vld [vmem:[%s7997_s3 + $0xa80] sm:$0xff] }
 0x180   :  { %5041 = vmatprep.subr.mxu1 %v1836_v16  ;;  %5023 = vmatpush3.msra.mxu0 %v1780_v17  ;;  %v1849_v10 = vld [vmem:[%s7997_s3 + $0xb48] sm:$0xff]  ;;  %v1864_v16 = vld [vmem:[%s7997_s3 + $0xbc0] sm:$0xff] }
 0x181   :  { %5042 = vmatpush3.msra.mxu1 %v1820_v18  ;;  %5024 = vmatprep.subr.mxu0 %v1795_v36  ;;  %v1808_v17 = vld [vmem:[%s7997_s3 + $0xa00] sm:$0xff] }
 0x182   :  { %5043 = vmatprep.subr.mxu1 %v1835_v21  ;;  %5025 = vmatpush3.msra.mxu0 %v1779_v26  ;;  %v1848_v18 = vld [vmem:[%s7997_s3 + $0xb40] sm:$0xff]  ;;  %v1863_v21 = vld [vmem:[%s7997_s3 + $0xbb8] sm:$0xff] }
 0x183   :  { %5044 = vmatpush3.msra.mxu1 %v1819_v24  ;;  %5026 = vmatprep.subr.mxu0 %v1794_v28  ;;  %v1847_v26 = vld [vmem:[%s7997_s3 + $0xb38] sm:$0xff]  ;;  %v1862_v28 = vld [vmem:[%s7997_s3 + $0xbb0] sm:$0xff] }
 0x184   :  { %5045 = vmatprep.subr.mxu1 %v1834_v29  ;;  %5027 = vmatpush3.msra.mxu0 %v1778_v61  ;;  %v1879_v24 = vld [vmem:[%s7997_s3 + $0xc38] sm:$0xff]  ;;  %v1878_v61 = vld [vmem:[%s7997_s3 + $0xc30] sm:$0xff] }
 0x185   :  { %5046 = vmatpush3.msra.mxu1 %v1818_v59  ;;  %5028 = vmatprep.subr.mxu0 %v1793_v32  ;;  %v1845_v59 = vld [vmem:[%s7997_s3 + $0xb28] sm:$0xff] }
 0x186   :  { %5047 = vmatprep.subr.mxu1 %v1833_v53  ;;  %5029 = vmatpush3.msra.mxu0 %v1777_v33  ;;  %v1877_v32 = vld [vmem:[%s7997_s3 + $0xc28] sm:$0xff]  ;;  %v1860_v53 = vld [vmem:[%s7997_s3 + $0xba0] sm:$0xff] }
 0x187   :  { %5048 = vmatpush3.msra.mxu1 %v1817_v34  ;;  %5030 = vmatprep.subr.mxu0 %v1792_v35  ;;  %v1844_v34 = vld [vmem:[%s7997_s3 + $0xb20] sm:$0xff] }
 0x188   :  { %5049 = vmatprep.subr.mxu1 %v1832_v15  ;;  %5031 = vmatpush3.msra.mxu0 %v1776_v38  ;;  %v1876_v35 = vld [vmem:[%s7997_s3 + $0xc20] sm:$0xff] }
 0x189   :  { %2581 = vmatprep.mubr.f32.mxu0 %v6287_v30  ;;  %5050 = vmatpush3.msra.mxu1 %v1816_v40  ;;  %v1870_v30 = vld [vmem:[%s7997_s3 + $0xbf0] sm:$0xff]  ;;  %v1843_v40 = vld [vmem:[%s7997_s3 + $0xb18] sm:$0xff] }
 0x18a   :  { %2582 = vmatmul.mubr.f32.vlgmr.msra.gmra.mxu0 %v6261_v19  ;;  %5051 = vmatprep.subr.mxu1 %v1831_v41  ;;  %v1829_v19 = vld [vmem:[%s7997_s3 + $0xaa8] sm:$0xff]  ;;  %v1875_v41 = vld [vmem:[%s7997_s3 + $0xc18] sm:$0xff] }
 0x18b   :  { %5070 = vmatprep.subr.mxu0 %v1871_v43  ;;  %5052 = vmatpush3.msra.mxu1 %v1815_v44  ;;  %v1858_v44 = vld [vmem:[%s7997_s3 + $0xb90] sm:$0xff] }
 0x18c   :  { %5071 = vmatpush3.msra.mxu0 %v1855_v45  ;;  %5053 = vmatprep.subr.mxu1 %v1830_v11  ;;  %v1842_v45 = vld [vmem:[%s7997_s3 + $0xb10] sm:$0xff] }
 0x18d   :  { %5072 = vmatprep.subr.mxu0 %v1870_v30  ;;  %5054 = vmatpush3.msra.mxu1 %v1814_v9  ;;  %v1874_v11 = vld [vmem:[%s7997_s3 + $0xc10] sm:$0xff]  ;;  %v1841_v30 = vld [vmem:[%s7997_s3 + $0xb08] sm:$0xff]  ;;  %v1856_v9 = vld [vmem:[%s7997_s3 + $0xb80] sm:$0xff] }
 0x18e   :  { %5073 = vmatpush3.msra.mxu0 %v1854_v46  ;;  %v4638_v54 = vpop.f32.mrf.mxu0  ;;  %5055 = vmatprep.subr.mxu1 %v1829_v19  ;;  %v1873_v46 = vld [vmem:[%s7997_s3 + $0xc08] sm:$0xff]  ;;  %v1840_v19 = vld [vmem:[%s7997_s3 + $0xb00] sm:$0xff] }
 0x18f   :  { %5074 = vmatprep.subr.mxu0 %v1869_v58  ;;  %5056 = vmatpush3.msra.mxu1 %v1813_v23  ;;  %v1872_v58 = vld [vmem:[%s7997_s3 + $0xc00] sm:$0xff]  ;;  %v2947_v23 = vcombine.high %v2800_v48, %v2800_v48 }
 0x190   :  { %5075 = vmatpush3.msra.mxu0 %v1853_v47  ;;  %v4639_v25 = vpop.f32.mrf.mxu0  ;;  %5057 = vmatprep.subr.mxu1 %v1828_v49  ;;  %v4673_v6 = vpop.f32.mrf.mxu1  ;;  %v2801_v49 = vld [vmem:[%s7999_s6 + $0x8] sm:$0xff] }
 0x191   :  { %5076 = vmatprep.subr.mxu0 %v1868_v52  ;;  %v4640_v31 = vadd.f32 %v4639_v25, %v4638_v54  ;;  %5058 = vmatpush3.msra.mxu1 %v1812_v55  ;;  %v2961_v47 = vrot.slane %v2947_v23, %v5364_v51  ;;  %v2964_v55 = vcombine.high %v2801_v49, %v2801_v49 }
 0x192   :  { %5077 = vmatpush3.msra.mxu0 %v1852_v22  ;;  %5059 = vmatprep.subr.mxu1 %v1827_v8  ;;  %v4674_v36 = vpop.f32.mrf.mxu1  ;;  %v7791_v22 = vrot.slane %v2801_v49, %v5364_v51 }
 0x193   :  { %5078 = vmatprep.subr.mxu0 %v1867_v56  ;;  %v1345_v27 = vadd.f32 %v4640_v31, %v1275_v39  ;;  %5060 = vmatpush3.msra.mxu1 %v1811_v62  ;;  %v4675_v29 = vadd.f32 %v4674_v36, %v4673_v6  ;;  %v2963_v54 = vcombine.high %v2961_v47, %v2961_v47 }
 0x194   :  { %5079 = vmatpush3.msra.mxu0 %v1851_v60  ;;  %5061 = vmatprep.subr.mxu1 %v1826_v63  ;;  %v7794_v8 = vrot.slane %v2964_v55, %v5364_v51  ;;  %v2979_v56 = vcombine.high %v7791_v22, %v7791_v22 }
 0x195   :  { %5080 = vmatprep.subr.mxu0 %v1866_v3  ;;  %5062 = vmatpush3.msra.mxu1 %v1810_v0  ;;  %v1415_v33 = vadd.f32 %v4675_v29, %v1345_v27 }
 0x196   :  { %5081 = vmatpush3.msra.mxu0 %v1850_v2  ;;  %5063 = vmatprep.subr.mxu1 %v1825_v4  ;;  %v2980_v25 = vcombine.high %v7794_v8, %v7794_v8 }
 0x197   :  { %5082 = vmatprep.subr.mxu0 %v1865_v13  ;;  %5064 = vmatpush3.msra.mxu1 %v1809_v7  ;;  %v4214_v7 = vld [vmem:[%s8000_s4] ss:$0 sm:$0xff] }
 0x198   :  { %5083 = vmatpush3.msra.mxu0 %v1849_v10  ;;  %5065 = vmatprep.subr.mxu1 %v1824_v14 }
 0x199   :  { %5084 = vmatprep.subr.mxu0 %v1864_v16  ;;  %5066 = vmatpush3.msra.mxu1 %v1808_v17 }
 0x19a   :  { %2651 = vmatprep.mubr.f32.mxu1 %v6490_v1  ;;  %5085 = vmatpush3.msra.mxu0 %v1848_v18  ;;  %v1846_v1 = vld [vmem:[%s7997_s3 + $0xb30] sm:$0xff] }
 0x19b   :  { %2652 = vmatmul.mubr.f32.vlgmr.msra.gmra.mxu1 %v6459_v50  ;;  %5086 = vmatprep.subr.mxu0 %v1863_v21  ;;  %v1861_v50 = vld [vmem:[%s7997_s3 + $0xba8] sm:$0xff] }
 0x19c   :  { %5135 = vmatprep.subr.mxu1 %v5176_v12  ;;  %5087 = vmatpush3.msra.mxu0 %v1847_v26 }
 0x19d   :  { %5136 = vmatpush3.msra.mxu1 %v1879_v24  ;;  %5088 = vmatprep.subr.mxu0 %v1862_v28 }
 0x19e   :  { %5137 = vmatprep.subr.mxu1 %v5176_v12  ;;  %5089 = vmatpush3.msra.mxu0 %v1846_v1 }
 0x19f   :  { %5138 = vmatpush3.msra.mxu1 %v1878_v61  ;;  %5090 = vmatprep.subr.mxu0 %v1861_v50 }
 0x1a0   :  { %5139 = vmatprep.subr.mxu1 %v5176_v12  ;;  %v1484_v15 = vpop.f32.mrf.mxu0  ;;  %5091 = vmatpush3.msra.mxu0 %v1845_v59 }
 0x1a1   :  { %5140 = vmatpush3.msra.mxu1 %v1877_v32  ;;  %v7730_v38 = vadd.f32 %v1484_v15, %v1415_v33  ;;  %5092 = vmatprep.subr.mxu0 %v1860_v53 }
 0x1a2   :  { %5141 = vmatprep.subr.mxu1 %v5176_v12  ;;  %v5134_v43 = vpop.f32.mrf.mxu0  ;;  %5093 = vmatpush3.msra.mxu0 %v1844_v34 }
 0x1a3   :  { %5142 = vmatpush3.msra.mxu1 %v1876_v35  ;;  %5094 = vmatprep.subr.mxu0 %v1859_v37 }
 0x1a4   :  { %5143 = vmatprep.subr.mxu1 %v5176_v12  ;;  %5095 = vmatpush3.msra.mxu0 %v1843_v40 }
 0x1a5   :  { %5144 = vmatpush3.msra.mxu1 %v1875_v41  ;;  %5096 = vmatprep.subr.mxu0 %v1858_v44 }
 0x1a6   :  { %5145 = vmatprep.subr.mxu1 %v5176_v12  ;;  %5097 = vmatpush3.msra.mxu0 %v1842_v45 }
 0x1a7   :  { %2721 = vmatprep.mubr.f32.mxu0 %v6500_v5  ;;  %5098 = vmatprep.subr.mxu0 %v1857_v20  ;;  %v5174_v5 = vld.sshfl [vmem:[%s7996_s0 + $0x30] sm:$0x3 pattern:$0x76325410] }
 0x1a8   :  { %5146 = vmatpush3.msra.mxu1 %v1874_v11  ;;  %5099 = vmatpush3.msra.mxu0 %v1841_v30 }
 0x1a9   :  { %5147 = vmatprep.subr.mxu1 %v5176_v12  ;;  %5100 = vmatprep.subr.mxu0 %v1856_v9 }
 0x1aa   :  { %5148 = vmatpush3.msra.mxu1 %v1873_v46  ;;  %5101 = vmatpush3.msra.mxu0 %v1840_v19  ;;  %v2802_v19 = vld [vmem:[%s7999_s6 + $0x10] sm:$0xff] }
 0x1ab   :  { %5149 = vmatprep.subr.mxu1 %v5176_v12  ;;  %2722 = vmatmul.mubr.f32.vlgmr.msra.gmra.mxu0 %v6474_v57  ;;  %v2954_v57 = vrot.slane %v2800_v48, %v5364_v51 }
 0x1ac   :  { %5150 = vmatpush3.msra.mxu1 %v1872_v58  ;;  %5151 = vmatprep.mubr.msk.f32.mxu1 %vm5177_vm1, %v5176_v12 }
 0x1ad   :  { %3175 = vmatprep.mubr.f32.mxu0 %v5176_v12  ;;  %5152 = vmatmul.mubr.msk.f32.vlgmr.msra.gmra.mxu1 %vm575_vm0, %v5174_v5  ;;  %v2962_v52 = vcombine.high %v2954_v57, %v2954_v57 }
 0x1ae   :  { %3246 = vmatprep.mubr.f32.mxu1 %v5176_v12  ;;  %4221 = vmatprep.subr.msk.mxu1 %vm3060_vm2, %v2963_v54  ;;  %v2797_v54 = vld [vmem:[%s8001_s5] sm:$0x3] }
 0x1af   :  { %4218 = vmatprep.subr.msk.mxu0 %vm3060_vm2, %v2962_v52  ;;  %4222 = vmatpush1.msk.msra.mxu1 %vm3060_vm2, %v2961_v47  ;;  %v2981_v47 = vcombine.high %v2802_v19, %v2802_v19  ;;  %v2803_v52 = vld [vmem:[%s7999_s6 + $0x18] sm:$0xff] }
 0x1b0   :  { %4219 = vmatpush1.msk.msra.mxu0 %vm3060_vm2, %v2954_v57  ;;  %4227 = vmatprep.subr.msk.mxu1 %vm3060_vm2, %v2980_v25 }
 0x1b1   :  { %4224 = vmatprep.subr.msk.mxu0 %vm3060_vm2, %v2979_v56  ;;  %v2988_v56 = vrot.slane %v2802_v19, %v5364_v51  ;;  %v2995_v25 = vrot.slane %v2981_v47, %v5364_v51 }
 0x1b2   :  { %v4717_v39 = vpop.f32.mrf.mxu1 }
 0x1b4   :  { %v4718_v62 = vpop.f32.mrf.mxu1 }
 0x1b5   :  { %v4719_v6 = vadd.f32 %v4718_v62, %v4717_v39  ;;  %v2998_v39 = vcombine.high %v2803_v52, %v2803_v52 }
 0x1b7   :  { %v1954_v17 = vadd.f32 %v4719_v6, %v4214_v7 }
 0x1c2   :  { %v4752_v60 = vpop.f32.mrf.mxu0 }
 0x1c4   :  { %v4753_v63 = vpop.f32.mrf.mxu0 }
 0x1c5   :  { %v4754_v14 = vadd.f32 %v4753_v63, %v4752_v60  ;;  %v2804_v60 = vld [vmem:[%s7999_s6 + $0x20] sm:$0xff]  ;;  %v3005_v63 = vrot.slane %v2803_v52, %v5364_v51 }
 0x1c7   :  { %v2024_v26 = vadd.f32 %v4754_v14, %v1954_v17 }
 0x1d3   :  { %v4787_v31 = vpop.f32.mrf.mxu1 }
 0x1d5   :  { %v4788_v3 = vpop.f32.mrf.mxu1 }
 0x1d6   :  { %v4789_v18 = vadd.f32 %v4788_v3, %v4787_v31  ;;  %v2996_v3 = vcombine.high %v2988_v56, %v2988_v56 }
 0x1d8   :  { %v2094_v29 = vadd.f32 %v4789_v18, %v2024_v26  ;;  %v7885_v26 = vsub.s32 2, %v5337_v42 }
 0x1e4   :  { %v4822_v0 = vpop.f32.mrf.mxu0 }
 0x1e6   :  { %v4823_v27 = vpop.f32.mrf.mxu0 }
 0x1e7   :  { %v4824_v24 = vadd.f32 %v4823_v27, %v4822_v0  ;;  %v2997_v0 = vcombine.high %v2995_v25, %v2995_v25  ;;  %v3015_v27 = vcombine.high %v2804_v60, %v2804_v60 }
 0x1e9   :  { %v2164_v50 = vadd.f32 %v4824_v24, %v2094_v29  ;;  %v3029_v7 = vrot.slane %v3015_v27, %v5364_v51  ;;  %v2807_v24 = vld [vmem:[%s8002_s7] sm:$0xff]  ;;  %v7894_v29 = vsub.s32 3, %v5337_v42 }
 0x1f5   :  { %v4857_v2 = vpop.f32.mrf.mxu1 }
 0x1f7   :  { %v4858_v4 = vpop.f32.mrf.mxu1 }
 0x1f8   :  { %v4859_v1 = vadd.f32 %v4858_v4, %v4857_v2  ;;  %v3012_v2 = vrot.slane %v2998_v39, %v5364_v51  ;;  %v2805_v4 = vld [vmem:[%s7999_s6 + $0x28] sm:$0xff] }
 0x1f9   :  { %v3039_v14 = vrot.slane %v2805_v4, %v5364_v51 }
 0x1fa   :  { %v2234_v33 = vadd.f32 %v4859_v1, %v2164_v50  ;;  %v3014_v6 = vcombine.high %v3012_v2, %v3012_v2  ;;  %v2826_v1 = vrot.slane %v2807_v24, %v7885_v26  ;;  %v7902_v50 = vsub.s32 6, %v5337_v42 }
 0x1fb   :  { %v3047_v17 = vcombine.high %v3039_v14, %v3039_v14 }
 0x206   :  { %v4892_v13 = vpop.f32.mrf.mxu0 }
 0x208   :  { %v4893_v16 = vpop.f32.mrf.mxu0 }
 0x209   :  { %v4894_v59 = vadd.f32 %v4893_v16, %v4892_v13  ;;  %v3022_v13 = vrot.slane %v2804_v60, %v5364_v51 }
 0x20b   :  { %v2304_v15 = vadd.f32 %v4894_v59, %v2234_v33 }
 0x217   :  { %v4927_v10 = vpop.f32.mrf.mxu1 }
 0x219   :  { %v4928_v36 = vpop.f32.mrf.mxu1 }
 0x21a   :  { %v4929_v34 = vadd.f32 %v4928_v36, %v4927_v10  ;;  %v3032_v10 = vcombine.high %v2805_v4, %v2805_v4  ;;  %v4217_v36 = vld.sshfl [vmem:[%s7999_s6 + $0x30] sm:$0x3 pattern:$0x76325410] }
 0x21b   :  { %v7940_v4 = vld [vmem:[%s8002_s7 + $0x10] sm:$0xff] }
 0x21c   :  { %v2374_v41 = vadd.f32 %v4929_v34, %v2304_v15  ;;  %v3046_v16 = vrot.slane %v3032_v10, %v5364_v51  ;;  %v7907_v34 = vsub.s32 5, %v5337_v42 }
 0x21e   :  { %v3048_v18 = vcombine.high %v3046_v16, %v3046_v16 }
 0x228   :  { %v4962_v21 = vpop.f32.mrf.mxu0 }
 0x22a   :  { %v4963_v61 = vpop.f32.mrf.mxu0 }
 0x22b   :  { %v4964_v37 = vadd.f32 %v4963_v61, %v4962_v21  ;;  %v7882_v21 = vsub.s32 0, %v5337_v42  ;;  %v7899_v61 = vsub.s32 4, %v5337_v42 }
 0x22d   :  { %v2444_v45 = vadd.f32 %v4964_v37, %v2374_v41 }
 0x239   :  { %v4997_v28 = vpop.f32.mrf.mxu1 }
 0x23b   :  { %v4998_v32 = vpop.f32.mrf.mxu1 }
 0x23c   :  { %v4999_v43 = vadd.f32 %v4998_v32, %v4997_v28  ;;  %v7891_v28 = vsub.s32 1, %v5337_v42  ;;  %v2830_v32 = vrot.slane %v2807_v24, %v7894_v29 }
 0x23e   :  { %v2514_v11 = vadd.f32 %v4999_v43, %v2444_v45  ;;  %v2822_v59 = vrot.slane %v2807_v24, %v7891_v28  ;;  %v2842_v45 = vrot.slane %v2807_v24, %v7902_v50 }
 0x24a   :  { %v5032_v53 = vpop.f32.mrf.mxu0 }
 0x24c   :  { %v5033_v40 = vpop.f32.mrf.mxu0 }
 0x24d   :  { %v5034_v20 = vadd.f32 %v5033_v40, %v5032_v53  ;;  %v7915_v40 = vld [vmem:[%s8002_s7 + $0x8] sm:$0xff] }
 0x24e   :  { %v2850_v19 = vrot.slane %v7915_v40, %v7882_v21  ;;  %v2874_v60 = vrot.slane %v7915_v40, %v7902_v50 }
 0x24f   :  { %v2584_v46 = vadd.f32 %v5034_v20, %v2514_v11 }
 0x25b   :  { %v5067_v35 = vpop.f32.mrf.mxu1 }
 0x25d   :  { %v5068_v44 = vpop.f32.mrf.mxu1 }
 0x25e   :  { %v5069_v30 = vadd.f32 %v5068_v44, %v5067_v35  ;;  %v7910_v35 = vsub.s32 7, %v5337_v42  ;;  %v2834_v44 = vrot.slane %v2807_v24, %v7899_v61  ;;  %v2838_v42 = vrot.slane %v2807_v24, %v7907_v34 }
 0x260   :  { %v2654_v48 = vadd.f32 %v5069_v30, %v2584_v46  ;;  %v2846_v46 = vrot.slane %v2807_v24, %v7910_v35  ;;  %v2878_v27 = vrot.slane %v7915_v40, %v7910_v35 }
 0x26b   :  { %v5102_v9 = vpop.f32.mrf.mxu0 }
 0x26d   :  { %v5103_v58 = vpop.f32.mrf.mxu0  ;;  %v2793_v5 = vpop.f32.mrf.mxu1 }
 0x26e   :  { %v5104_v23 = vadd.f32 %v5103_v58, %v5102_v9  ;;  %v2858_v58 = vrot.slane %v7915_v40, %v7885_v26 }
 0x26f   :  { %v5153_v57 = vpop.f32.mrf.mxu1 }
 0x270   :  { %v2724_v49 = vadd.f32 %v5104_v23, %v2654_v48 }
 0x272   :  { %v2794_v55 = vadd.f32 %v2793_v5, %v2724_v49 }
 0x274   :  { %v2798_v62 = vmul.f32 %v2797_v54, %v2794_v55  ;;  %v2854_v55 = vrot.slane %v7915_v40, %v7891_v28 }
 0x276   :  { %v2799_v31 = vadd.f32 %v2798_v62, %v7730_v38  ;;  %v3013_v38 = vcombine.high %v3005_v63, %v3005_v63  ;;  %v2866_v62 = vrot.slane %v7915_v40, %v7899_v61 }
 0x278   :  { %4220 = vmatmul.mubr.msk.f32.vlgmr.msra.gmra.mxu0 %vm3056_vm3, %v2799_v31  ;;  %4223 = vmatmul.mubr.msk.f32.vlgmr.msra.gmra.mxu1 %vm3056_vm3, %v2799_v31 }
 0x279   :  { %4225 = vmatpush1.msk.msra.mxu0 %vm3060_vm2, %v7791_v22  ;;  %4228 = vmatpush1.msk.msra.mxu1 %vm3060_vm2, %v7794_v8  ;;  %v3030_v22 = vcombine.high %v3022_v13, %v3022_v13  ;;  %v3031_v8 = vcombine.high %v3029_v7, %v3029_v7 }
 0x27a   :  { %3317 = vmatprep.mubr.f32.mxu0 %v5176_v12  ;;  %3388 = vmatprep.mubr.f32.mxu1 %v5176_v12 }
 0x27b   :  { %4230 = vmatprep.subr.msk.mxu0 %vm3060_vm2, %v2996_v3  ;;  %4233 = vmatprep.subr.msk.mxu1 %vm3060_vm2, %v2997_v0 }
 0x27c   :  { %4226 = vmatmul.mubr.msk.f32.vlgmr.msra.gmra.mxu0 %vm3056_vm3, %v2799_v31  ;;  %4229 = vmatmul.mubr.msk.f32.vlgmr.msra.gmra.mxu1 %vm3056_vm3, %v2799_v31 }
 0x27d   :  { %4231 = vmatpush1.msk.msra.mxu0 %vm3060_vm2, %v2988_v56  ;;  %4234 = vmatpush1.msk.msra.mxu1 %vm3060_vm2, %v2995_v25  ;;  %v2862_v56 = vrot.slane %v7915_v40, %v7894_v29 }
 0x27e   :  { %3459 = vmatprep.mubr.f32.mxu0 %v5176_v12  ;;  %3530 = vmatprep.mubr.f32.mxu1 %v5176_v12 }
 0x27f   :  { %4236 = vmatprep.subr.msk.mxu0 %vm3060_vm2, %v3013_v38  ;;  %4239 = vmatprep.subr.msk.mxu1 %vm3060_vm2, %v3014_v6 }
 0x280   :  { %4232 = vmatmul.mubr.msk.f32.vlgmr.msra.gmra.mxu0 %vm3056_vm3, %v2799_v31  ;;  %4235 = vmatmul.mubr.msk.f32.vlgmr.msra.gmra.mxu1 %vm3056_vm3, %v2799_v31 }
 0x281   :  { %4237 = vmatpush1.msk.msra.mxu0 %vm3060_vm2, %v3005_v63  ;;  %4240 = vmatpush1.msk.msra.mxu1 %vm3060_vm2, %v3012_v2  ;;  %v2870_v2 = vrot.slane %v7915_v40, %v7907_v34 }
 0x282   :  { %3601 = vmatprep.mubr.f32.mxu0 %v5176_v12  ;;  %3672 = vmatprep.mubr.f32.mxu1 %v5176_v12 }
 0x283   :  { %4242 = vmatprep.subr.msk.mxu0 %vm3060_vm2, %v3030_v22  ;;  %4245 = vmatprep.subr.msk.mxu1 %vm3060_vm2, %v3031_v8 }
 0x284   :  { %4238 = vmatmul.mubr.msk.f32.vlgmr.msra.gmra.mxu0 %vm3056_vm3, %v2799_v31  ;;  %4241 = vmatmul.mubr.msk.f32.vlgmr.msra.gmra.mxu1 %vm3056_vm3, %v2799_v31 }
 0x285   :  { %4243 = vmatpush1.msk.msra.mxu0 %vm3060_vm2, %v3022_v13  ;;  %4246 = vmatpush1.msk.msra.mxu1 %vm3060_vm2, %v3029_v7 }
 0x286   :  { %3743 = vmatprep.mubr.f32.mxu0 %v5176_v12  ;;  %3814 = vmatprep.mubr.f32.mxu1 %v5176_v12 }
 0x287   :  { %4248 = vmatprep.subr.msk.mxu0 %vm3060_vm2, %v3047_v17  ;;  %4251 = vmatprep.subr.msk.mxu1 %vm3060_vm2, %v3048_v18 }
 0x288   :  { %4244 = vmatmul.mubr.msk.f32.vlgmr.msra.gmra.mxu0 %vm3056_vm3, %v2799_v31  ;;  %4247 = vmatmul.mubr.msk.f32.vlgmr.msra.gmra.mxu1 %vm3056_vm3, %v2799_v31 }
 0x289   :  { %4249 = vmatpush1.msk.msra.mxu0 %vm3060_vm2, %v3039_v14  ;;  %4252 = vmatpush1.msk.msra.mxu1 %vm3060_vm2, %v3046_v16 }
 0x28a   :  { %3885 = vmatprep.mubr.f32.mxu0 %v5176_v12  ;;  %3956 = vmatprep.mubr.f32.mxu1 %v5176_v12 }
 0x28b   :  { %5154 = vmatprep.subr.mxu0 %v5176_v12 }
 0x28c   :  { %4250 = vmatmul.mubr.msk.f32.vlgmr.msra.gmra.mxu0 %vm3056_vm3, %v2799_v31  ;;  %4253 = vmatmul.mubr.msk.f32.vlgmr.msra.gmra.mxu1 %vm3056_vm3, %v2799_v31 }
 0x28d   :  { %5155 = vmatpush3.msk.msra.mxu0 %vm3060_vm2, %v4217_v36  ;;  %5156 = vmatprep.mubr.msk.f32.mxu0 %vm5177_vm1, %v5176_v12  ;;  %v2818_v12 = vrot.slane %v2807_v24, %v7882_v21  ;;  %v2882_v24 = vrot.slane %v7940_v4, %v7882_v21 }
 0x290   :  { %5157 = vmatmul.mubr.msk.f32.vlgmr.msra.gmra.mxu0 %vm3056_vm3, %v2799_v31 }
 0x338   :  { %v3177_v53 = vpop.f32.mrf.mxu0  ;;  %v3248_v33 = vpop.f32.mrf.mxu1 }
 0x339   :  { %v3178_v15 = vadd.f32 %v3177_v53, %v2818_v12  ;;  %v3249_v37 = vadd.f32 %v3248_v33, %v2826_v1  ;;  %v2890_v12 = vrot.slane %v7940_v4, %v7885_v26 }
 0x33a   :  { %v3179_v41 = vpop.f32.mrf.mxu0  ;;  %v3250_v43 = vpop.f32.mrf.mxu1 }
 0x33b   :  { %v3180_v20 = vadd.f32 %v3179_v41, %v2822_v59  ;;  %v3251_v11 = vadd.f32 %v3250_v43, %v2830_v32  ;;  %v4033_v5 = vmax.f32 %v3178_v15, 0.0  ;;  %v4035_v48 = vmax.f32 %v3249_v37, 0.0 }
 0x33c   :  { %v3319_v30 = vpop.f32.mrf.mxu0  ;;  %v3390_v9 = vpop.f32.mrf.mxu1  ;;  %v2886_v15 = vrot.slane %v7940_v4, %v7891_v28  ;;  %v2894_v28 = vrot.slane %v7940_v4, %v7894_v29 }
 0x33d   :  { %v4034_v23 = vmax.f32 %v3180_v20, 0.0  ;;  %v4036_v57 = vmax.f32 %v3251_v11, 0.0  ;;  %v3320_v47 = vadd.f32 %v3319_v30, %v2834_v44  ;;  %v3391_v49 = vadd.f32 %v3390_v9, %v2842_v45 }
 0x33e   :  { %v3321_v52 = vpop.f32.mrf.mxu0  ;;  %v3392_v54 = vpop.f32.mrf.mxu1 }
 0x33f   :  { %v4083_v25 = vcombine.low %v4033_v5, %v4034_v23  ;;  %v4084_v39 = vcombine.low %v4035_v48, %v4036_v57  ;;  %v3322_v31 = vadd.f32 %v3321_v52, %v2838_v42  ;;  %v3393_v63 = vadd.f32 %v3392_v54, %v2846_v46 }
 0x340   :  { %v3461_v3 = vpop.f32.mrf.mxu0  ;;  %v3532_v0 = vpop.f32.mrf.mxu1  ;;  %v4037_v10 = vmax.f32 %v3320_v47, 0.0  ;;  %v4039_v22 = vmax.f32 %v3391_v49, 0.0  ;;  %v2898_v42 = vrot.slane %v7940_v4, %v7899_v61  ;;  %v2906_v23 = vrot.slane %v7940_v4, %v7902_v50 }
 0x341   :  { %v4091_v38 = vrot.slane %v4083_v25, %v5364_v51  ;;  %v4098_v13 = vrot.slane %v4084_v39, %v5364_v51  ;;  %v3462_v6 = vadd.f32 %v3461_v3, %v2850_v19  ;;  %v3533_v7 = vadd.f32 %v3532_v0, %v2858_v58 }
 0x342   :  { %v4038_v8 = vmax.f32 %v3322_v31, 0.0  ;;  %v4040_v14 = vmax.f32 %v3393_v63, 0.0  ;;  %v3463_v16 = vpop.f32.mrf.mxu0  ;;  %v3534_v17 = vpop.f32.mrf.mxu1  ;;  %v2902_v50 = vrot.slane %v7940_v4, %v7907_v34 }
 0x343   :  { %v4099_v18 = vcombine.low %v4091_v38, %v4098_v13  ;;  %v3464_v36 = vadd.f32 %v3463_v16, %v2854_v55  ;;  %v3535_v32 = vadd.f32 %v3534_v17, %v2862_v56  ;;  %v4041_v37 = vmax.f32 %v3462_v6, 0.0 }
 0x344   :  { %v4100_v1 = vcombine.low %v4037_v10, %v4038_v8  ;;  %v4101_v59 = vcombine.low %v4039_v22, %v4040_v14  ;;  %v3603_v53 = vpop.f32.mrf.mxu0  ;;  %v3674_v33 = vpop.f32.mrf.mxu1  ;;  %v4043_v40 = vmax.f32 %v3533_v7, 0.0 }
 0x345   :  { %4199 = vst [vmem:[%s8003_s8] sm:$0xff] %v4099_v18  ;;  %v4042_v41 = vmax.f32 %v3464_v36, 0.0  ;;  %v3604_v43 = vadd.f32 %v3603_v53, %v2866_v62  ;;  %v4044_v44 = vmax.f32 %v3535_v32, 0.0  ;;  %v3675_v45 = vadd.f32 %v3674_v33, %v2874_v60 }
 0x346   :  { %v4108_v21 = vrot.slane %v4100_v1, %v5364_v51  ;;  %v4115_v26 = vrot.slane %v4101_v59, %v5364_v51  ;;  %v3605_v20 = vpop.f32.mrf.mxu0  ;;  %v3676_v11 = vpop.f32.mrf.mxu1 }
 0x347   :  { %v4117_v30 = vcombine.low %v4041_v37, %v4042_v41  ;;  %v3606_v9 = vadd.f32 %v3605_v20, %v2870_v2  ;;  %v4118_v19 = vcombine.low %v4043_v40, %v4044_v44  ;;  %v3677_v58 = vadd.f32 %v3676_v11, %v2878_v27 }
 0x348   :  { %v4116_v46 = vcombine.low %v4108_v21, %v4115_v26  ;;  %v3745_v5 = vpop.f32.mrf.mxu0  ;;  %v3816_v48 = vpop.f32.mrf.mxu1  ;;  %v4045_v47 = vmax.f32 %v3604_v43, 0.0  ;;  %v4047_v61 = vmax.f32 %v3675_v45, 0.0  ;;  %v2910_v2 = vrot.slane %v7940_v4, %v7910_v35  ;;  %v4216_v35 = vld [vmem:[%s8002_s7 + $0x18] ss:$0 sm:$0xff] }
 0x349   :  { %v4125_v57 = vrot.slane %v4117_v30, %v5364_v51  ;;  %v4046_v49 = vmax.f32 %v3606_v9, 0.0  ;;  %v3746_v52 = vadd.f32 %v3745_v5, %v2882_v24  ;;  %v4132_v29 = vrot.slane %v4118_v19, %v5364_v51 }
 0x34a   :  { %4200 = vst [vmem:[%s8003_s8 + $0x8] sm:$0xff] %v4116_v46  ;;  %v4048_v54 = vmax.f32 %v3677_v58, 0.0  ;;  %v3817_v55 = vadd.f32 %v3816_v48, %v2890_v12  ;;  %v3747_v56 = vpop.f32.mrf.mxu0  ;;  %v3818_v25 = vpop.f32.mrf.mxu1 }
 0x34b   :  { %v4134_v39 = vcombine.low %v4045_v47, %v4046_v49  ;;  %v3748_v62 = vadd.f32 %v3747_v56, %v2886_v15  ;;  %v4133_v60 = vcombine.low %v4125_v57, %v4132_v29  ;;  %v3819_v63 = vadd.f32 %v3818_v25, %v2894_v28 }
 0x34c   :  { %v4135_v31 = vcombine.low %v4047_v61, %v4048_v54  ;;  %v3887_v3 = vpop.f32.mrf.mxu0  ;;  %v3958_v0 = vpop.f32.mrf.mxu1  ;;  %v4049_v38 = vmax.f32 %v3746_v52, 0.0  ;;  %v4051_v34 = vmax.f32 %v3817_v55, 0.0 }
 0x34d   :  { %v4142_v27 = vrot.slane %v4134_v39, %v5364_v51  ;;  %v4050_v13 = vmax.f32 %v3748_v62, 0.0  ;;  %v3888_v6 = vadd.f32 %v3887_v3, %v2898_v42  ;;  %4201 = vst [vmem:[%s8003_s8 + $0x10] sm:$0xff] %v4133_v60  ;;  %v4052_v10 = vmax.f32 %v3819_v63, 0.0 }
 0x34e   :  { %v4149_v7 = vrot.slane %v4135_v31, %v5364_v51  ;;  %v3959_v22 = vadd.f32 %v3958_v0, %v2906_v23  ;;  %v3889_v8 = vpop.f32.mrf.mxu0  ;;  %v3960_v14 = vpop.f32.mrf.mxu1 }
 0x34f   :  { %v4151_v4 = vcombine.low %v4049_v38, %v4050_v13  ;;  %v3890_v16 = vadd.f32 %v3889_v8, %v2902_v50  ;;  %v4152_v18 = vcombine.low %v4051_v34, %v4052_v10  ;;  %v3961_v36 = vadd.f32 %v3960_v14, %v2910_v2 }
 0x350   :  { %v4150_v17 = vcombine.low %v4142_v27, %v4149_v7  ;;  %v4029_v24 = vpop.f32.mrf.mxu0  ;;  %v4053_v1 = vmax.f32 %v3888_v6, 0.0  ;;  %v4055_v33 = vmax.f32 %v3959_v22, 0.0 }
 0x351   :  { %v4159_v12 = vrot.slane %v4151_v4, %v5364_v51  ;;  %v4054_v59 = vmax.f32 %v3890_v16, 0.0  ;;  %v4030_v32 = vadd.f32 %v4216_v35, %v4029_v24  ;;  %v4166_v53 = vrot.slane %v4152_v18, %v5364_v51 }
 0x352   :  { %4202 = vst [vmem:[%s8003_s8 + $0x18] sm:$0xff] %v4150_v17  ;;  %v4056_v15 = vmax.f32 %v3961_v36, 0.0  ;;  %v5158_v37 = vpop.f32.mrf.mxu0 }
 0x353   :  { %v4168_v40 = vcombine.low %v4053_v1, %v4054_v59  ;;  %v4057_v41 = vmax.f32 %v4030_v32, 0.0  ;;  %v4167_v43 = vcombine.low %v4159_v12, %v4166_v53 }
 0x354   :  { %v4169_v21 = vcombine.low %v4055_v33, %v4056_v15 }
 0x355   :  { %v4176_v26 = vrot.slane %v4168_v40, %v5364_v51  ;;  %v4191_v44 = vrot.slane %v4057_v41, %v5364_v51  ;;  %4203 = vst [vmem:[%s8003_s8 + $0x20] sm:$0xff] %v4167_v43 }
 0x356   :  { %v4183_v45 = vrot.slane %v4169_v21, %v5364_v51 }
 0x357   :  { %4206 = vst.msk [vmem:[%s8003_s8 + $0x30] sm:$0x3] %vm4205_vm4, %v4191_v44 }
 0x358   :  { %v4184_v20 = vcombine.low %v4176_v26, %v4183_v45 }
 0x35a   :  { %4204 = vst [vmem:[%s8003_s8 + $0x28] sm:$0xff] %v4184_v20 }

// kernel: vae_forward.9
= control target key start
LH: loop header
LB: loop body
LE: loop exit
PB: predicated region body
PF: predicated region fallthrough
CT: control target
= control target key end

     0   :  { %s1971_s12 = smov 0   ;;  %s1973_s13 = smov 0   ;;  %s2407_s0 = inlined_call_operand.vmem [shape: bf16[392,288], index: 0, kind: input, shape index: {}]   ;;  %s2408_s1 = inlined_call_operand.vmem [shape: bf16[288,4], index: 1, kind: input, shape index: {}]   ;;  %s2409_s2 = inlined_call_operand.vmem [shape: f32[1,4], index: 2, kind: input, shape index: {}]   ;;  %s2410_s3 = inlined_call_operand.vmem [shape: f32[392,4], index: 3, kind: output, shape index: {}]  }
   0x1   :  { %s1975_s14 = smov 0  }
   0x2 LB: > { %s1984_s15 = sadd.s32 4294967295, %s1917_s14   ;;  %s1986_s16 = sadd.s32 1, %s1917_s14   ;;  %s1917_s14 = sphi %s1975_s14, %s2419_s14   ;;  %s1913_s13 = sphi %s1973_s13, %s2418_s13   ;;  %s1909_s12 = sphi %s1971_s12, %s2417_s12  }
   0x3   : > { %s85_s17 = ssub.s32 %s1917_s14, %s1986_s16  ;;  %s88_s18 = sadd.s32 1, %s1913_s13 }
   0x4   : > { %p86_p0 = scmp.eq.s32.totalorder %s85_s17, 0  ;;  %p98_p1 = scmp.ne.s32.totalorder %s1913_s13, %s1909_s12 }
   0x5   : > { %p99_p2 = scmp.eq.s32.totalorder %s1984_s15, 1  ;;  %p1403_p3 = scmp.ge.s32.totalorder %s1917_s14, 1 }
   0x6   : > { %s1994_s19 = scalar_select %p86_p0, %s1913_s13, %s88_s18  }
   0x7   : > { %p1996_p4 = por %p99_p2, %p98_p1  ;;  %p149_p5 = scmp.lt.s32.totalorder %s1917_s14, 3 }
   0x9   : > { %p150_p6 = pnand %p1403_p3, %p149_p5 }
   0xa   : > { %s2004_s23 = sshll.u32 (!%p150_p6), %s1984_s15, 5  ;;  %s175_s22 = sand.u32 (!%p150_p6), 1, %s1909_s12  }
   0xb   : > { %153 = sbr.rel (%p150_p6) target bundleno = 391 (0x187), region = 32  ;;  %p184_p7 = scmp.lt.s32.totalorder (!%p150_p6), %s2004_s23, 48 }
  0x10   : > { %v1781_v0 = vld [vmem:[%s2408_s1 + $0x78] sm:$0xff]   ;;  %v1783_v2 = vld [vmem:[%s2408_s1 + $0x70] sm:$0xff]   ;;  %v1785_v4 = vld [vmem:[%s2408_s1 + $0x68] sm:$0xff]   ;;  %s185_s5 = scalar_select %p184_p7, %s2004_s23, 48  ;;  %vm656_vm0 = vcmask 261120   ;;  %vm1027_vm1 = vcmask 31744  }
  0x11   : > { %v1782_v1 = vld [vmem:[%s2408_s1 + $0x38] sm:$0xff]   ;;  %1510 = vmatprep.subr.bf16.mxu0 %v1781_v0  ;;  %1676 = vmatprep.subr.bf16.mxu1 %v1781_v0  ;;  %v1784_v3 = vld [vmem:[%s2408_s1 + $0x30] sm:$0xff]   ;;  %v1786_v5 = vld [vmem:[%s2408_s1 + $0x28] sm:$0xff]   ;;  %s1068_s27 = ssub.s32 (%p1996_p4), 49, %s2004_s23  ;;  %s1507_s28 = sshll.u32 (%p1996_p4), %s1984_s15, 8 }
  0x12   : > { %1511 = vmatpush3.bf16.msra.mxu0 %v1782_v1  ;;  %1684 = vmatpush3.bf16.msra.mxu1 %v1782_v1  ;;  %v1787_v6 = vld [vmem:[%s2408_s1 + $0x60] sm:$0xff]   ;;  %s1692_s10 = smul.u32 12, %s185_s5  ;;  %v1789_v8 = vld [vmem:[%s2408_s1 + $0x58] sm:$0xff]   ;;  %v1791_v10 = vld [vmem:[%s2408_s1 + $0x50] sm:$0xff]   ;;  %p1069_p8 = scmp.lt.s32.totalorder (%p1996_p4), %s1068_s27, 32 }
  0x13   : > { %1512 = vmatprep.subr.bf16.mxu0 %v1783_v2  ;;  %1677 = vmatprep.subr.bf16.mxu1 %v1783_v2  ;;  %v1788_v7 = vld [vmem:[%s2408_s1 + $0x20] sm:$0xff]   ;;  %v1790_v9 = vld [vmem:[%s2408_s1 + $0x18] sm:$0xff]   ;;  %v1792_v13 = vld [vmem:[%s2408_s1 + $0x10] sm:$0xff]   ;;  %s2275_s4 = scalar_lea.vmem (%p1996_p4), %s2410_s3, %s1507_s28  }
  0x14   : > { %s2035_s24 = scalar_lea.vmem %s2407_s0, %s1692_s10  ;;  %v1793_v14 = vld [vmem:[%s2408_s1 + $0x48] sm:$0xff]   ;;  %v1795_v16 = vld [vmem:[%s2408_s1 + $0x40] sm:$0xff]  }
  0x15   : > { %v1799_v11 = vld [vmem:[%s2035_s24 + $0x4] ss:$12 sps:$4 sm:$0xff]   ;;  %v1794_v15 = vld [vmem:[%s2408_s1 + $0x8] sm:$0xff]   ;;  %v1810_v26 = vld [vmem:[%s2035_s24 + $0x34] ss:$12 sps:$4 sm:$0xff]  }
  0x16   : > { %1513 = vmatpush3.bf16.msra.mxu0 %v1784_v3  ;;  %1685 = vmatpush3.bf16.msra.mxu1 %v1784_v3  ;;  %v1802_v12 = vld [vmem:[%s2035_s24 + $0x124] ss:$12 sps:$4 sm:$0xff]   ;;  %v1803_v18 = vld [vmem:[%s2408_s1 + $0x88] sm:$0xff]   ;;  %v1812_v27 = vld [vmem:[%s2035_s24 + $0x154] ss:$12 sps:$4 sm:$0xff]  }
  0x17   : > { %1514 = vmatprep.subr.bf16.mxu0 %v1785_v4  ;;  %1678 = vmatprep.subr.bf16.mxu1 %v1785_v4  ;;  %v1796_v17 = vld [vmem:[%s2408_s1] sm:$0xff]   ;;  %v1804_v21 = vld [vmem:[%s2035_s24 + $0x1c] ss:$12 sps:$4 sm:$0xff]   ;;  %v1817_v30 = vld [vmem:[%s2035_s24 + $0x4c] ss:$12 sps:$4 sm:$0xff]  }
  0x18   : > { %737 = vmatprep.mubr.bf16.mxu0 %v1799_v11  ;;  %833 = vmatprep.mubr.bf16.mxu1 %v1802_v12  ;;  %v1797_v19 = vld [vmem:[%s2035_s24] ss:$12 sps:$4 sm:$0xff]   ;;  %v1806_v22 = vld [vmem:[%s2035_s24 + $0x13c] ss:$12 sps:$4 sm:$0xff]   ;;  %v1808_v24 = vld [vmem:[%s2035_s24 + $0x18] ss:$12 sps:$4 sm:$0xff]  }
  0x19   : > { %v1800_v20 = vld [vmem:[%s2035_s24 + $0x120] ss:$12 sps:$4 sm:$0xff]   ;;  %v1809_v25 = vld [vmem:[%s2035_s24 + $0x138] ss:$12 sps:$4 sm:$0xff]   ;;  %v1814_v28 = vld [vmem:[%s2035_s24 + $0x30] ss:$12 sps:$4 sm:$0xff]  }
  0x1a   : > { %1515 = vmatpush3.bf16.msra.mxu0 %v1786_v5  ;;  %1686 = vmatpush3.bf16.msra.mxu1 %v1786_v5  ;;  %v1816_v23 = vld [vmem:[%s2408_s1 + $0x80] sm:$0xff]   ;;  %v1815_v29 = vld [vmem:[%s2035_s24 + $0x150] ss:$12 sps:$4 sm:$0xff]   ;;  %v1819_v31 = vld [vmem:[%s2035_s24 + $0x16c] ss:$12 sps:$4 sm:$0xff]  }
  0x1b   : > { %1516 = vmatprep.subr.bf16.mxu0 %v1787_v6  ;;  %1679 = vmatprep.subr.bf16.mxu1 %v1787_v6  ;;  %v1821_v32 = vld [vmem:[%s2035_s24 + $0x48] ss:$12 sps:$4 sm:$0xff]   ;;  %v1823_v34 = vld [vmem:[%s2035_s24 + $0x64] ss:$12 sps:$4 sm:$0xff]   ;;  %v1826_v36 = vld [vmem:[%s2035_s24 + $0x60] ss:$12 sps:$4 sm:$0xff]  }
  0x1c   : > { %v1822_v33 = vld [vmem:[%s2035_s24 + $0x168] ss:$12 sps:$4 sm:$0xff]   ;;  %v1827_v37 = vld [vmem:[%s2035_s24 + $0x20] ss:$12 sps:$4 sm:$0xff]   ;;  %v1830_v39 = vld [vmem:[%s2035_s24 + $0x38] ss:$12 sps:$4 sm:$0xff]  }
  0x1d   : > { %v1825_v35 = vld [vmem:[%s2035_s24 + $0x8] ss:$12 sps:$4 sm:$0xff]   ;;  %v1831_v40 = vld [vmem:[%s2035_s24 + $0x78] ss:$12 sps:$4 sm:$0xff]   ;;  %v1832_v41 = vld [vmem:[%s2035_s24 + $0x50] ss:$12 sps:$4 sm:$0xff]  }
  0x1e   : > { %1517 = vmatpush3.bf16.msra.mxu0 %v1788_v7  ;;  %1687 = vmatpush3.bf16.msra.mxu1 %v1788_v7  ;;  %v1828_v38 = vld [vmem:[%s2035_s24 + $0x7c] ss:$12 sps:$4 sm:$0xff]   ;;  %v1833_v42 = vld [vmem:[%s2035_s24 + $0x94] ss:$12 sps:$4 sm:$0xff]   ;;  %v1838_v46 = vld [vmem:[%s2035_s24 + $0xac] ss:$12 sps:$4 sm:$0xff]  }
  0x1f   : > { %1518 = vmatprep.subr.bf16.mxu0 %v1789_v8  ;;  %1680 = vmatprep.subr.bf16.mxu1 %v1789_v8  ;;  %v1835_v43 = vld [vmem:[%s2035_s24 + $0x68] ss:$12 sps:$4 sm:$0xff]   ;;  %v1836_v44 = vld [vmem:[%s2035_s24 + $0x90] ss:$12 sps:$4 sm:$0xff]   ;;  %v1837_v45 = vld [vmem:[%s2035_s24 + $0x80] ss:$12 sps:$4 sm:$0xff]  }
  0x20   : > { %v1840_v47 = vld [vmem:[%s2035_s24 + $0x98] ss:$12 sps:$4 sm:$0xff]   ;;  %v1841_v48 = vld [vmem:[%s2035_s24 + $0xa8] ss:$12 sps:$4 sm:$0xff]   ;;  %v1842_v49 = vld [vmem:[%s2035_s24 + $0xb0] ss:$12 sps:$4 sm:$0xff]  }
  0x21   : > { %v1843_v50 = vld [vmem:[%s2035_s24 + $0xc4] ss:$12 sps:$4 sm:$0xff]   ;;  %v1845_v51 = vld [vmem:[%s2035_s24 + $0xc8] ss:$12 sps:$4 sm:$0xff]   ;;  %v1846_v52 = vld [vmem:[%s2035_s24 + $0xc0] ss:$12 sps:$4 sm:$0xff]  }
  0x22   : > { %1519 = vmatpush3.bf16.msra.mxu0 %v1790_v9  ;;  %1688 = vmatpush3.bf16.msra.mxu1 %v1790_v9  ;;  %v1847_v53 = vld [vmem:[%s2035_s24 + $0xe0] ss:$12 sps:$4 sm:$0xff]   ;;  %v1848_v54 = vld [vmem:[%s2035_s24 + $0xdc] ss:$12 sps:$4 sm:$0xff]   ;;  %v1850_v55 = vld [vmem:[%s2035_s24 + $0xf8] ss:$12 sps:$4 sm:$0xff]  }
  0x23   : > { %1520 = vmatprep.subr.bf16.mxu0 %v1791_v10  ;;  %1681 = vmatprep.subr.bf16.mxu1 %v1791_v10  ;;  %v1851_v56 = vld [vmem:[%s2035_s24 + $0xd8] ss:$12 sps:$4 sm:$0xff]   ;;  %v1852_v57 = vld [vmem:[%s2035_s24 + $0x110] ss:$12 sps:$4 sm:$0xff]   ;;  %v1853_v58 = vld [vmem:[%s2035_s24 + $0xf4] ss:$12 sps:$4 sm:$0xff]  }
  0x24   : > { %v1855_v59 = vld [vmem:[%s2035_s24 + $0x128] ss:$12 sps:$4 sm:$0xff]   ;;  %v1856_v60 = vld [vmem:[%s2035_s24 + $0xf0] ss:$12 sps:$4 sm:$0xff]   ;;  %v1857_v61 = vld [vmem:[%s2035_s24 + $0x140] ss:$12 sps:$4 sm:$0xff]  }
  0x25   : > { %v1858_v62 = vld [vmem:[%s2035_s24 + $0x10c] ss:$12 sps:$4 sm:$0xff]   ;;  %v1861_v0 = vld [vmem:[%s2035_s24 + $0x108] ss:$12 sps:$4 sm:$0xff]   ;;  %v1862_v1 = vld [vmem:[%s2035_s24 + $0x170] ss:$12 sps:$4 sm:$0xff]  }
  0x26   : > { %1521 = vmatpush3.bf16.msra.mxu0 %v1792_v13  ;;  %1689 = vmatpush3.bf16.msra.mxu1 %v1792_v13  ;;  %v1860_v63 = vld [vmem:[%s2035_s24 + $0x158] ss:$12 sps:$4 sm:$0xff]   ;;  %s1404_s24 = sshll.u32 %s175_s22, 8 }
  0x27   : > { %1522 = vmatprep.subr.bf16.mxu0 %v1793_v14  ;;  %1682 = vmatprep.subr.bf16.mxu1 %v1793_v14  ;;  %s2156_s12 = scalar_lea.vmem [#allocation2], %s1404_s24  }
  0x2a   : > { %1523 = vmatpush3.bf16.msra.mxu0 %v1794_v15  ;;  %1690 = vmatpush3.bf16.msra.mxu1 %v1794_v15 }
  0x2b   : > { %1524 = vmatprep.subr.bf16.mxu0 %v1795_v16  ;;  %1683 = vmatprep.subr.bf16.mxu1 %v1795_v16 }
  0x2e   : > { %1525 = vmatpush3.bf16.msra.mxu0 %v1796_v17  ;;  %1691 = vmatpush3.bf16.msra.mxu1 %v1796_v17 }
  0x2f   : > { %1640 = vmatprep.subr.bf16.mxu1 %v1803_v18 }
  0x31   : > { %738 = vmatmul.mubr.bf16.vlgmr.msra.gmra.mxu0 %v1797_v19  ;;  %834 = vmatmul.mubr.bf16.vlgmr.msra.gmra.mxu1 %v1800_v20 }
  0x32   : > { %1641 = vmatpush3.bf16.msra.mxu1 %v1803_v18  ;;  %745 = vmatprep.mubr.bf16.mxu0 %v1804_v21 }
  0x33   : > { %841 = vmatprep.mubr.bf16.mxu1 %v1806_v22  ;;  %1642 = vmatprep.subr.bf16.mxu1 %v1816_v23 }
  0x36   : > { %1643 = vmatpush3.bf16.msra.mxu1 %v1816_v23 }
  0x39   : > { %746 = vmatmul.mubr.bf16.gmra.mxu0 %v1808_v24  ;;  %842 = vmatmul.mubr.bf16.gmra.mxu1 %v1809_v25 }
  0x3a   : > { %753 = vmatprep.mubr.bf16.mxu0 %v1810_v26  ;;  %849 = vmatprep.mubr.bf16.mxu1 %v1812_v27 }
  0x41   : > { %754 = vmatmul.mubr.bf16.gmra.mxu0 %v1814_v28  ;;  %850 = vmatmul.mubr.bf16.gmra.mxu1 %v1815_v29 }
  0x42   : > { %761 = vmatprep.mubr.bf16.mxu0 %v1817_v30  ;;  %857 = vmatprep.mubr.bf16.mxu1 %v1819_v31 }
  0x49   : > { %762 = vmatmul.mubr.bf16.gmra.mxu0 %v1821_v32  ;;  %858 = vmatmul.mubr.bf16.gmra.mxu1 %v1822_v33 }
  0x4a   : > { %769 = vmatprep.mubr.bf16.mxu0 %v1823_v34  ;;  %1644 = vmatprep.mubr.msk.bf16.mxu1 %vm656_vm0, %v1825_v35 }
  0x51   : > { %770 = vmatmul.mubr.bf16.gmra.mxu0 %v1826_v36  ;;  %1645 = vmatmul.mubr.msk.bf16.vlgmr.msra.gmra.mxu1 %vm656_vm0, %v1827_v37 }
  0x52   : > { %777 = vmatprep.mubr.bf16.mxu0 %v1828_v38  ;;  %1648 = vmatprep.mubr.msk.bf16.mxu1 %vm656_vm0, %v1830_v39 }
  0x59   : > { %778 = vmatmul.mubr.bf16.gmra.mxu0 %v1831_v40  ;;  %1649 = vmatmul.mubr.msk.bf16.gmra.mxu1 %vm656_vm0, %v1832_v41 }
  0x5a   : > { %785 = vmatprep.mubr.bf16.mxu0 %v1833_v42  ;;  %1652 = vmatprep.mubr.msk.bf16.mxu1 %vm656_vm0, %v1835_v43  ;;  %v2152_v42 = vld [vmem:[%s2409_s2] ss:$0 sm:$0xff] }
  0x61   : > { %786 = vmatmul.mubr.bf16.gmra.mxu0 %v1836_v44  ;;  %1653 = vmatmul.mubr.msk.bf16.gmra.mxu1 %vm656_vm0, %v1837_v45 }
  0x62   : > { %793 = vmatprep.mubr.bf16.mxu0 %v1838_v46  ;;  %1656 = vmatprep.mubr.msk.bf16.mxu1 %vm656_vm0, %v1840_v47 }
  0x69   : > { %794 = vmatmul.mubr.bf16.gmra.mxu0 %v1841_v48  ;;  %1657 = vmatmul.mubr.msk.bf16.gmra.mxu1 %vm656_vm0, %v1842_v49 }
  0x6a   : > { %801 = vmatprep.mubr.bf16.mxu0 %v1843_v50  ;;  %1660 = vmatprep.mubr.msk.bf16.mxu1 %vm656_vm0, %v1845_v51 }
  0x71   : > { %802 = vmatmul.mubr.bf16.gmra.mxu0 %v1846_v52  ;;  %1661 = vmatmul.mubr.msk.bf16.gmra.mxu1 %vm656_vm0, %v1847_v53 }
  0x72   : > { %809 = vmatprep.mubr.bf16.mxu0 %v1848_v54  ;;  %1664 = vmatprep.mubr.msk.bf16.mxu1 %vm656_vm0, %v1850_v55 }
  0x79   : > { %810 = vmatmul.mubr.bf16.gmra.mxu0 %v1851_v56  ;;  %1665 = vmatmul.mubr.msk.bf16.gmra.mxu1 %vm656_vm0, %v1852_v57 }
  0x7a   : > { %817 = vmatprep.mubr.bf16.mxu0 %v1853_v58  ;;  %1668 = vmatprep.mubr.msk.bf16.mxu1 %vm656_vm0, %v1855_v59 }
  0x81   : > { %818 = vmatmul.mubr.bf16.gmra.mxu0 %v1856_v60  ;;  %1669 = vmatmul.mubr.msk.bf16.gmra.mxu1 %vm656_vm0, %v1857_v61 }
  0x82   : > { %825 = vmatprep.mubr.bf16.mxu0 %v1858_v62  ;;  %1672 = vmatprep.mubr.msk.bf16.mxu1 %vm656_vm0, %v1860_v63 }
  0x89   : > { %826 = vmatmul.mubr.bf16.gmra.mxu0 %v1861_v0  ;;  %1673 = vmatmul.mubr.msk.bf16.gmra.mxu1 %vm656_vm0, %v1862_v1 }
  0xf1   : > { %v1526_v2 = vpop.f32.mrf.mxu0  ;;  %v1598_v3 = vpop.f32.mrf.mxu1 }
  0xf3   : > { %v1527_v4 = vpop.f32.mrf.mxu0  ;;  %v1599_v5 = vpop.f32.mrf.mxu1 }
  0xf4   : > { %v2128_v6 = vadd.f32 %v1599_v5, %v1598_v3  ;;  %v1528_v39 = vadd.f32 %v1527_v4, %v1526_v2 }
  0xf5   : > { %v1529_v7 = vpop.f32.mrf.mxu0  ;;  %v1601_v8 = vpop.f32.mrf.mxu1 }
  0xf6   : > { %v740_v49 = vadd.f32 %v1528_v39, %v2152_v42 }
  0xf7   : > { %v1530_v9 = vpop.f32.mrf.mxu0  ;;  %v1602_v10 = vpop.f32.mrf.mxu1 }
  0xf8   : > { %v2130_v11 = vadd.f32 %v1602_v10, %v1601_v8  ;;  %v1531_v47 = vadd.f32 %v1530_v9, %v1529_v7 }
  0xf9   : > { %v1532_v12 = vpop.f32.mrf.mxu0  ;;  %v1604_v13 = vpop.f32.mrf.mxu1 }
  0xfa   : > { %v743_v59 = vadd.f32 %v1531_v47, %v2152_v42 }
  0xfb   : > { %v1533_v14 = vpop.f32.mrf.mxu0  ;;  %v1605_v15 = vpop.f32.mrf.mxu1 }
  0xfc   : > { %v2132_v16 = vadd.f32 %v1605_v15, %v1604_v13  ;;  %v1534_v36 = vadd.f32 %v1533_v14, %v1532_v12 }
  0xfd   : > { %v1535_v17 = vpop.f32.mrf.mxu0  ;;  %v1607_v18 = vpop.f32.mrf.mxu1 }
  0xfe   : > { %v748_v44 = vadd.f32 %v1534_v36, %v2152_v42 }
  0xff   : > { %v1536_v19 = vpop.f32.mrf.mxu0  ;;  %v1608_v20 = vpop.f32.mrf.mxu1 }
 0x100   : > { %v2134_v21 = vadd.f32 %v1608_v20, %v1607_v18  ;;  %v1537_v43 = vadd.f32 %v1536_v19, %v1535_v17 }
 0x101   : > { %v1538_v22 = vpop.f32.mrf.mxu0  ;;  %v1610_v23 = vpop.f32.mrf.mxu1 }
 0x102   : > { %v751_v54 = vadd.f32 %v1537_v43, %v2152_v42 }
 0x103   : > { %v1539_v24 = vpop.f32.mrf.mxu0  ;;  %v1611_v25 = vpop.f32.mrf.mxu1 }
 0x104   : > { %v2136_v26 = vadd.f32 %v1611_v25, %v1610_v23  ;;  %v1540_v57 = vadd.f32 %v1539_v24, %v1538_v22 }
 0x105   : > { %v1541_v27 = vpop.f32.mrf.mxu0  ;;  %v1613_v28 = vpop.f32.mrf.mxu1 }
 0x106   : > { %v756_v5 = vadd.f32 %v1540_v57, %v2152_v42 }
 0x107   : > { %v1542_v29 = vpop.f32.mrf.mxu0  ;;  %v1614_v30 = vpop.f32.mrf.mxu1 }
 0x108   : > { %v2138_v31 = vadd.f32 %v1614_v30, %v1613_v28  ;;  %v1543_v3 = vadd.f32 %v1542_v29, %v1541_v27 }
 0x109   : > { %v1544_v32 = vpop.f32.mrf.mxu0  ;;  %v2140_v33 = vpop.f32.mrf.mxu1 }
 0x10a   : > { %v759_v18 = vadd.f32 %v1543_v3, %v2152_v42 }
 0x10b   : > { %v1545_v34 = vpop.f32.mrf.mxu0  ;;  %v2142_v35 = vpop.f32.mrf.mxu1 }
 0x10c   : > { %v1546_v52 = vadd.f32 %v1545_v34, %v1544_v32 }
 0x10d   : > { %v1547_v37 = vpop.f32.mrf.mxu0  ;;  %v2145_v38 = vpop.f32.mrf.mxu1 }
 0x10e   : > { %v764_v0 = vadd.f32 %v1546_v52, %v2152_v42 }
 0x10f   : > { %v1548_v40 = vpop.f32.mrf.mxu0  ;;  %v2147_v41 = vpop.f32.mrf.mxu1 }
 0x110   : > { %v1549_v62 = vadd.f32 %v1548_v40, %v1547_v37 }
 0x111   : > { %v1550_v45 = vpop.f32.mrf.mxu0  ;;  %v1646_v46 = vpop.f32.mrf.mxu1 }
 0x112   : > { %v909_v48 = vadd.f32 %v1646_v46, %v748_v44  ;;  %v767_v12 = vadd.f32 %v1549_v62, %v2152_v42 }
 0x113   : > { %v1551_v50 = vpop.f32.mrf.mxu0  ;;  %v900_v51 = vpop.f32.mrf.mxu1 }
 0x114   : > { %1030 = vst.msk [vmem:[%s2156_s12 + $0x10] sm:$0xff] %vm1027_vm1, %v909_v48  ;;  %v901_v53 = vadd.f32 %v900_v51, %v740_v49  ;;  %v1552_v15 = vadd.f32 %v1551_v50, %v1550_v45 }
 0x115   : > { %v1553_v55 = vpop.f32.mrf.mxu0  ;;  %v1647_v56 = vpop.f32.mrf.mxu1 }
 0x116   : > { %1028 = vst.msk [vmem:[%s2156_s12] sm:$0xff] %vm1027_vm1, %v901_v53  ;;  %v912_v58 = vadd.f32 %v1647_v56, %v751_v54  ;;  %v772_v30 = vadd.f32 %v1552_v15, %v2152_v42 }
 0x117   : > { %v1554_v60 = vpop.f32.mrf.mxu0  ;;  %v903_v61 = vpop.f32.mrf.mxu1 }
 0x118   : > { %1031 = vst.msk [vmem:[%s2156_s12 + $0x18] sm:$0xff] %vm1027_vm1, %v912_v58  ;;  %v904_v63 = vadd.f32 %v903_v61, %v743_v59  ;;  %v1555_v28 = vadd.f32 %v1554_v60, %v1553_v55 }
 0x119   : > { %v1556_v1 = vpop.f32.mrf.mxu0  ;;  %v1650_v2 = vpop.f32.mrf.mxu1 }
 0x11a   : > { %1029 = vst.msk [vmem:[%s2156_s12 + $0x8] sm:$0xff] %vm1027_vm1, %v904_v63  ;;  %v925_v4 = vadd.f32 %v1650_v2, %v764_v0  ;;  %v775_v45 = vadd.f32 %v1555_v28, %v2152_v42 }
 0x11b   : > { %v1557_v7 = vpop.f32.mrf.mxu0  ;;  %v916_v8 = vpop.f32.mrf.mxu1 }
 0x11c   : > { %1034 = vst.msk [vmem:[%s2156_s12 + $0x30] sm:$0xff] %vm1027_vm1, %v925_v4  ;;  %v1558_v9 = vadd.f32 %v1557_v7, %v1556_v1  ;;  %v917_v10 = vadd.f32 %v916_v8, %v756_v5 }
 0x11d   : > { %v1559_v13 = vpop.f32.mrf.mxu0  ;;  %v1651_v14 = vpop.f32.mrf.mxu1 }
 0x11e   : > { %1032 = vst.msk [vmem:[%s2156_s12 + $0x20] sm:$0xff] %vm1027_vm1, %v917_v10  ;;  %v928_v17 = vadd.f32 %v1651_v14, %v767_v12  ;;  %v780_v24 = vadd.f32 %v1558_v9, %v2152_v42 }
 0x11f   : > { %v1560_v19 = vpop.f32.mrf.mxu0  ;;  %v919_v20 = vpop.f32.mrf.mxu1 }
 0x120   : > { %1035 = vst.msk [vmem:[%s2156_s12 + $0x38] sm:$0xff] %vm1027_vm1, %v928_v17  ;;  %v1561_v22 = vadd.f32 %v1560_v19, %v1559_v13  ;;  %v920_v23 = vadd.f32 %v919_v20, %v759_v18 }
 0x121   : > { %v1562_v25 = vpop.f32.mrf.mxu0  ;;  %v1654_v27 = vpop.f32.mrf.mxu1 }
 0x122   : > { %1033 = vst.msk [vmem:[%s2156_s12 + $0x28] sm:$0xff] %vm1027_vm1, %v920_v23  ;;  %v941_v29 = vadd.f32 %v1654_v27, %v780_v24  ;;  %v783_v37 = vadd.f32 %v1561_v22, %v2152_v42 }
 0x123   : > { %v1563_v32 = vpop.f32.mrf.mxu0  ;;  %v932_v34 = vpop.f32.mrf.mxu1 }
 0x124   : > { %1038 = vst.msk [vmem:[%s2156_s12 + $0x50] sm:$0xff] %vm1027_vm1, %v941_v29  ;;  %v933_v36 = vadd.f32 %v932_v34, %v772_v30  ;;  %v1564_v43 = vadd.f32 %v1563_v32, %v1562_v25 }
 0x125   : > { %v1565_v39 = vpop.f32.mrf.mxu0  ;;  %v1655_v40 = vpop.f32.mrf.mxu1 }
 0x126   : > { %1036 = vst.msk [vmem:[%s2156_s12 + $0x40] sm:$0xff] %vm1027_vm1, %v933_v36  ;;  %v944_v44 = vadd.f32 %v1655_v40, %v783_v37  ;;  %v788_v52 = vadd.f32 %v1564_v43, %v2152_v42 }
 0x127   : > { %v1566_v46 = vpop.f32.mrf.mxu0  ;;  %v935_v47 = vpop.f32.mrf.mxu1 }
 0x128   : > { %1039 = vst.msk [vmem:[%s2156_s12 + $0x58] sm:$0xff] %vm1027_vm1, %v944_v44  ;;  %v936_v48 = vadd.f32 %v935_v47, %v775_v45  ;;  %v1567_v51 = vadd.f32 %v1566_v46, %v1565_v39  ;;  %v844_v39 = vadd.f32 %v2132_v16, %v2152_v42  ;;  %v836_v46 = vadd.f32 %v2128_v6, %v2152_v42 }
 0x129   : > { %v1568_v49 = vpop.f32.mrf.mxu0  ;;  %v1658_v50 = vpop.f32.mrf.mxu1  ;;  %v1618_v47 = vadd.f32 %v2142_v35, %v2140_v33  ;;  %v839_v35 = vadd.f32 %v2130_v11, %v2152_v42 }
 0x12a   : > { %1037 = vst.msk [vmem:[%s2156_s12 + $0x48] sm:$0xff] %vm1027_vm1, %v936_v48  ;;  %v791_v60 = vadd.f32 %v1567_v51, %v2152_v42 }
 0x12b   : > { %v1569_v53 = vpop.f32.mrf.mxu0  ;;  %v948_v54 = vpop.f32.mrf.mxu1 }
 0x12c   : > { %v1570_v55 = vadd.f32 %v1569_v53, %v1568_v49  ;;  %v949_v56 = vadd.f32 %v948_v54, %v788_v52  ;;  %v847_v52 = vadd.f32 %v2134_v21, %v2152_v42  ;;  %v1621_v21 = vadd.f32 %v2147_v41, %v2145_v38 }
 0x12d   : > { %v1571_v57 = vpop.f32.mrf.mxu0  ;;  %v1659_v58 = vpop.f32.mrf.mxu1 }
 0x12e   : > { %v796_v59 = vadd.f32 %v1570_v55, %v2152_v42  ;;  %1040 = vst.msk [vmem:[%s2156_s12 + $0x60] sm:$0xff] %vm1027_vm1, %v949_v56 }
 0x12f   : > { %v1572_v61 = vpop.f32.mrf.mxu0  ;;  %v951_v62 = vpop.f32.mrf.mxu1 }
 0x130   : > { %v957_v63 = vadd.f32 %v1658_v50, %v796_v59  ;;  %v1573_v0 = vadd.f32 %v1572_v61, %v1571_v57  ;;  %v952_v1 = vadd.f32 %v951_v62, %v791_v60  ;;  %v860_v57 = vadd.f32 %v1618_v47, %v2152_v42 }
 0x131   : > { %v1574_v2 = vpop.f32.mrf.mxu0  ;;  %v1662_v3 = vpop.f32.mrf.mxu1 }
 0x132   : > { %1042 = vst.msk [vmem:[%s2156_s12 + $0x70] sm:$0xff] %vm1027_vm1, %v957_v63  ;;  %v799_v4 = vadd.f32 %v1573_v0, %v2152_v42  ;;  %1041 = vst.msk [vmem:[%s2156_s12 + $0x68] sm:$0xff] %vm1027_vm1, %v952_v1  ;;  %v852_v0 = vadd.f32 %v2136_v26, %v2152_v42 }
 0x133   : > { %v1575_v5 = vpop.f32.mrf.mxu0  ;;  %v964_v7 = vpop.f32.mrf.mxu1 }
 0x134   : > { %v960_v8 = vadd.f32 %v1659_v58, %v799_v4  ;;  %v1576_v9 = vadd.f32 %v1575_v5, %v1574_v2  ;;  %v863_v4 = vadd.f32 %v1621_v21, %v2152_v42 }
 0x135   : > { %v1577_v10 = vpop.f32.mrf.mxu0  ;;  %v1663_v12 = vpop.f32.mrf.mxu1 }
 0x136   : > { %1043 = vst.msk [vmem:[%s2156_s12 + $0x78] sm:$0xff] %vm1027_vm1, %v960_v8  ;;  %v804_v13 = vadd.f32 %v1576_v9, %v2152_v42  ;;  %v855_v9 = vadd.f32 %v2138_v31, %v2152_v42 }
 0x137   : > { %v1578_v14 = vpop.f32.mrf.mxu0  ;;  %v967_v15 = vpop.f32.mrf.mxu1 }
 0x138   : > { %v965_v17 = vadd.f32 %v964_v7, %v804_v13  ;;  %v1579_v18 = vadd.f32 %v1578_v14, %v1577_v10 }
 0x139   : > { %v1580_v19 = vpop.f32.mrf.mxu0  ;;  %v2205_v20 = vpop.f32.mrf.mxu1 }
 0x13a   : > { %1044 = vst.msk [vmem:[%s2156_s12 + $0x80] sm:$0xff] %vm1027_vm1, %v965_v17  ;;  %v807_v22 = vadd.f32 %v1579_v18, %v2152_v42 }
 0x13b   : > { %v1581_v23 = vpop.f32.mrf.mxu0  ;;  %v980_v24 = vpop.f32.mrf.mxu1 }
 0x13c   : > { %v968_v25 = vadd.f32 %v967_v15, %v807_v22  ;;  %v1582_v27 = vadd.f32 %v1581_v23, %v1580_v19 }
 0x13d   : > { %v1583_v28 = vpop.f32.mrf.mxu0  ;;  %v2210_v29 = vpop.f32.mrf.mxu1 }
 0x13e   : > { %1045 = vst.msk [vmem:[%s2156_s12 + $0x88] sm:$0xff] %vm1027_vm1, %v968_v25  ;;  %v812_v30 = vadd.f32 %v1582_v27, %v2152_v42 }
 0x13f   : > { %v1584_v32 = vpop.f32.mrf.mxu0  ;;  %v983_v34 = vpop.f32.mrf.mxu1 }
 0x140   : > { %v973_v36 = vadd.f32 %v1662_v3, %v812_v30  ;;  %v1585_v37 = vadd.f32 %v1584_v32, %v1583_v28 }
 0x141   : > { %v1586_v40 = vpop.f32.mrf.mxu0  ;;  %v1670_v43 = vpop.f32.mrf.mxu1 }
 0x142   : > { %1046 = vst.msk [vmem:[%s2156_s12 + $0x90] sm:$0xff] %vm1027_vm1, %v973_v36  ;;  %v815_v44 = vadd.f32 %v1585_v37, %v2152_v42  ;;  %v1005_v45 = vadd.f32 %v1670_v43, %v844_v39 }
 0x143   : > { %v1587_v48 = vpop.f32.mrf.mxu0  ;;  %v996_v49 = vpop.f32.mrf.mxu1 }
 0x144   : > { %v976_v50 = vadd.f32 %v1663_v12, %v815_v44  ;;  %1054 = vst.msk [vmem:[%s2156_s12 + $0xd0] sm:$0xff] %vm1027_vm1, %v1005_v45  ;;  %v1588_v16 = vadd.f32 %v1587_v48, %v1586_v40  ;;  %v997_v51 = vadd.f32 %v996_v49, %v836_v46 }
 0x145   : > { %v1589_v53 = vpop.f32.mrf.mxu0  ;;  %v1671_v54 = vpop.f32.mrf.mxu1 }
 0x146   : > { %1047 = vst.msk [vmem:[%s2156_s12 + $0x98] sm:$0xff] %vm1027_vm1, %v976_v50  ;;  %v820_v6 = vadd.f32 %v1588_v16, %v2152_v42  ;;  %1052 = vst.msk [vmem:[%s2156_s12 + $0xc0] sm:$0xff] %vm1027_vm1, %v997_v51  ;;  %v1008_v33 = vadd.f32 %v1671_v54, %v847_v52 }
 0x147   : > { %v1590_v55 = vpop.f32.mrf.mxu0  ;;  %v999_v56 = vpop.f32.mrf.mxu1 }
 0x148   : > { %v981_v58 = vadd.f32 %v980_v24, %v820_v6  ;;  %1055 = vst.msk [vmem:[%s2156_s12 + $0xd8] sm:$0xff] %vm1027_vm1, %v1008_v33  ;;  %v1591_v59 = vadd.f32 %v1590_v55, %v1589_v53  ;;  %v1000_v60 = vadd.f32 %v999_v56, %v839_v35 }
 0x149   : > { %v1592_v61 = vpop.f32.mrf.mxu0  ;;  %v1674_v62 = vpop.f32.mrf.mxu1 }
 0x14a   : > { %1048 = vst.msk [vmem:[%s2156_s12 + $0xa0] sm:$0xff] %vm1027_vm1, %v981_v58  ;;  %v823_v11 = vadd.f32 %v1591_v59, %v2152_v42  ;;  %1053 = vst.msk [vmem:[%s2156_s12 + $0xc8] sm:$0xff] %vm1027_vm1, %v1000_v60  ;;  %v1021_v63 = vadd.f32 %v1674_v62, %v860_v57 }
 0x14b   : > { %v1593_v38 = vpop.f32.mrf.mxu0  ;;  %v1012_v41 = vpop.f32.mrf.mxu1 }
 0x14c   : > { %v984_v1 = vadd.f32 %v983_v34, %v823_v11  ;;  %1058 = vst.msk [vmem:[%s2156_s12 + $0xf0] sm:$0xff] %vm1027_vm1, %v1021_v63  ;;  %v1594_v2 = vadd.f32 %v1593_v38, %v1592_v61  ;;  %v1013_v3 = vadd.f32 %v1012_v41, %v852_v0 }
 0x14d   : > { %v1595_v5 = vpop.f32.mrf.mxu0  ;;  %v1675_v7 = vpop.f32.mrf.mxu1 }
 0x14e   : > { %1049 = vst.msk [vmem:[%s2156_s12 + $0xa8] sm:$0xff] %vm1027_vm1, %v984_v1  ;;  %v828_v8 = vadd.f32 %v1594_v2, %v2152_v42  ;;  %1056 = vst.msk [vmem:[%s2156_s12 + $0xe0] sm:$0xff] %vm1027_vm1, %v1013_v3  ;;  %v1024_v26 = vadd.f32 %v1675_v7, %v863_v4 }
 0x14f   : > { %v1596_v10 = vpop.f32.mrf.mxu0  ;;  %v1015_v12 = vpop.f32.mrf.mxu1 }
 0x150   : > { %v989_v13 = vadd.f32 %v2205_v20, %v828_v8  ;;  %1059 = vst.msk [vmem:[%s2156_s12 + $0xf8] sm:$0xff] %vm1027_vm1, %v1024_v26  ;;  %v1597_v14 = vadd.f32 %v1596_v10, %v1595_v5  ;;  %v1016_v15 = vadd.f32 %v1015_v12, %v855_v9 }
 0x152   : > { %1050 = vst.msk [vmem:[%s2156_s12 + $0xb0] sm:$0xff] %vm1027_vm1, %v989_v13  ;;  %v831_v17 = vadd.f32 %v1597_v14, %v2152_v42  ;;  %1057 = vst.msk [vmem:[%s2156_s12 + $0xe8] sm:$0xff] %vm1027_vm1, %v1016_v15  ;;  %1066 = sbr.rel (!%p1996_p4) target bundleno = 391 (0x187), region = 36 }
 0x154   : > { %v992_v18 = vadd.f32 %v2210_v29, %v831_v17 }
 0x156   : > { %1051 = vst.msk [vmem:[%s2156_s12 + $0xb8] sm:$0xff] %vm1027_vm1, %v992_v18 }
 0x157   : > { %s2421_s27 = smov (!%p1069_p8, %s1068_s27), 32 }
 0x158   : > { %s1492_s5 = sshll.u32 %s2421_s27, 7 }
 0x159   : > { %p1495_p9 = scmp.eq.s32.totalorder %s1492_s5, 0 }
 0x15a   : > { %s2281_s6 = sshrl.u32 (!%p1495_p9), %s2421_s27, 5 }
 0x15b   : > { %1077 = sbr.rel (%p1495_p9) target bundleno = 391 (0x187), region = 40  ;;  %p1496_p10 = scmp.le.s32.totalorder (!%p1495_p9), %s2281_s6, 0 }
 0x160   : > { %1356 = sbr.rel (%p1496_p10) target bundleno = 374 (0x176), region = 116  ;;  %s2412_s15 = smov (!%p1496_p10), %s2275_s4 }
 0x161   : > { %s2413_s20 = smov (!%p1496_p10), %s2156_s12  ;;  %s2290_s23 = smov (!%p1496_p10), 0  }
 0x162   : > { %s2292_s7 = smov (!%p1496_p10), 0  }
 0x165 LB: >> { %v1202_v31 = vld [vmem:[%s1925_s20] sm:$0xff]  ;;  %v1204_v42 = vld [vmem:[%s1925_s20 + $0x8] sm:$0xff]  ;;  %v1206_v19 = vld [vmem:[%s1925_s20 + $0x10] sm:$0xff]  ;;  %s1266_s8 = sadd.s32 1, %s1929_s23  ;;  %s1196_s7 = sadd.s32 1, %s1933_s7   ;;  %s1933_s7 = sphi %s2292_s7, %s1196_s7   ;;  %s1929_s23 = sphi %s2290_s23, %s2416_s23   ;;  %s1925_s20 = sphi %s2413_s20, %s2415_s20   ;;  %s1921_s15 = sphi %s2412_s15, %s2414_s15  }
 0x166   : >> { %1203 = vst [vmem:[%s1921_s15] sm:$0xff] %v1202_v31  ;;  %1205 = vst [vmem:[%s1921_s15 + $0x8] sm:$0xff] %v1204_v42  ;;  %v1208_v20 = vld [vmem:[%s1925_s20 + $0x18] sm:$0xff]  ;;  %v1210_v22 = vld [vmem:[%s1925_s20 + $0x20] sm:$0xff]  ;;  %p1267_p11 = scmp.ge.s32.totalorder %s1266_s8, %s2281_s6  ;;  %p1195_p12 = scmp.ge.s32.totalorder %s1196_s7, %s2281_s6 }
 0x167   : >> { %1207 = vst [vmem:[%s1921_s15 + $0x10] sm:$0xff] %v1206_v19  ;;  %v1212_v23 = vld [vmem:[%s1925_s20 + $0x28] sm:$0xff]  ;;  %1209 = vst [vmem:[%s1921_s15 + $0x18] sm:$0xff] %v1208_v20  ;;  %v1214_v24 = vld [vmem:[%s1925_s20 + $0x30] sm:$0xff] }
 0x168   : >> { %1211 = vst [vmem:[%s1921_s15 + $0x20] sm:$0xff] %v1210_v22  ;;  %1213 = vst [vmem:[%s1921_s15 + $0x28] sm:$0xff] %v1212_v23  ;;  %v1216_v25 = vld [vmem:[%s1925_s20 + $0x38] sm:$0xff]  ;;  %v1218_v27 = vld [vmem:[%s1925_s20 + $0x40] sm:$0xff]  ;;  %s2423_s8 = smov (%p1267_p11, %s1266_s8), 0 }
 0x169   : >> { %1215 = vst [vmem:[%s1921_s15 + $0x30] sm:$0xff] %v1214_v24  ;;  %1217 = vst [vmem:[%s1921_s15 + $0x38] sm:$0xff] %v1216_v25  ;;  %v1220_v28 = vld [vmem:[%s1925_s20 + $0x48] sm:$0xff]  ;;  %v1222_v29 = vld [vmem:[%s1925_s20 + $0x50] sm:$0xff]  ;;  %s1497_s9 = sshll.u32 %s2423_s8, 8  ;;  %s2416_s23 = smov %s2423_s8 }
 0x16a   : >> { %1219 = vst [vmem:[%s1921_s15 + $0x40] sm:$0xff] %v1218_v27  ;;  %v1224_v30 = vld [vmem:[%s1925_s20 + $0x58] sm:$0xff]  ;;  %1221 = vst [vmem:[%s1921_s15 + $0x48] sm:$0xff] %v1220_v28  ;;  %v1226_v32 = vld [vmem:[%s1925_s20 + $0x60] sm:$0xff]  ;;  %s2348_s10 = scalar_lea.vmem %s2156_s12, %s1497_s9 [#allocation2]   ;;  %s1272_s11 = scalar_lea.vmem %s2275_s4, %s1497_s9  }
 0x16b   : >> { %1223 = vst [vmem:[%s1921_s15 + $0x50] sm:$0xff] %v1222_v29  ;;  %1225 = vst [vmem:[%s1921_s15 + $0x58] sm:$0xff] %v1224_v30  ;;  %v1228_v34 = vld [vmem:[%s1925_s20 + $0x68] sm:$0xff]  ;;  %v1230_v36 = vld [vmem:[%s1925_s20 + $0x70] sm:$0xff] }
 0x16c   : >> { %1227 = vst [vmem:[%s1921_s15 + $0x60] sm:$0xff] %v1226_v32  ;;  %1229 = vst [vmem:[%s1921_s15 + $0x68] sm:$0xff] %v1228_v34  ;;  %v1232_v37 = vld [vmem:[%s1925_s20 + $0x78] sm:$0xff]  ;;  %v1234_v39 = vld [vmem:[%s1925_s20 + $0x80] sm:$0xff] }
 0x16d   : >> { %1231 = vst [vmem:[%s1921_s15 + $0x70] sm:$0xff] %v1230_v36  ;;  %v1236_v40 = vld [vmem:[%s1925_s20 + $0x88] sm:$0xff]  ;;  %1233 = vst [vmem:[%s1921_s15 + $0x78] sm:$0xff] %v1232_v37  ;;  %v1238_v43 = vld [vmem:[%s1925_s20 + $0x90] sm:$0xff] }
 0x16e   : >> { %1235 = vst [vmem:[%s1921_s15 + $0x80] sm:$0xff] %v1234_v39  ;;  %1237 = vst [vmem:[%s1921_s15 + $0x88] sm:$0xff] %v1236_v40  ;;  %v1240_v44 = vld [vmem:[%s1925_s20 + $0x98] sm:$0xff]  ;;  %v1242_v45 = vld [vmem:[%s1925_s20 + $0xa0] sm:$0xff] }
 0x16f   : >> { %1239 = vst [vmem:[%s1921_s15 + $0x90] sm:$0xff] %v1238_v43  ;;  %1241 = vst [vmem:[%s1921_s15 + $0x98] sm:$0xff] %v1240_v44  ;;  %v1244_v46 = vld [vmem:[%s1925_s20 + $0xa8] sm:$0xff]  ;;  %v1246_v47 = vld [vmem:[%s1925_s20 + $0xb0] sm:$0xff] }
 0x170   : >> { %1243 = vst [vmem:[%s1921_s15 + $0xa0] sm:$0xff] %v1242_v45  ;;  %v1248_v48 = vld [vmem:[%s1925_s20 + $0xb8] sm:$0xff]  ;;  %1245 = vst [vmem:[%s1921_s15 + $0xa8] sm:$0xff] %v1244_v46  ;;  %v1250_v49 = vld [vmem:[%s1925_s20 + $0xc0] sm:$0xff] }
 0x171   : >> { %1247 = vst [vmem:[%s1921_s15 + $0xb0] sm:$0xff] %v1246_v47  ;;  %1249 = vst [vmem:[%s1921_s15 + $0xb8] sm:$0xff] %v1248_v48  ;;  %v1252_v50 = vld [vmem:[%s1925_s20 + $0xc8] sm:$0xff]  ;;  %v1254_v16 = vld [vmem:[%s1925_s20 + $0xd0] sm:$0xff]  ;;  %1198 = sbr.rel (!%p1195_p12) target bundleno = 357 (0x165), region = 122 }
 0x172   : >> { %1251 = vst [vmem:[%s1921_s15 + $0xc0] sm:$0xff] %v1250_v49  ;;  %1253 = vst [vmem:[%s1921_s15 + $0xc8] sm:$0xff] %v1252_v50  ;;  %v1256_v51 = vld [vmem:[%s1925_s20 + $0xd8] sm:$0xff]  ;;  %v1258_v52 = vld [vmem:[%s1925_s20 + $0xe0] sm:$0xff] }
 0x173   : >> { %1255 = vst [vmem:[%s1921_s15 + $0xd0] sm:$0xff] %v1254_v16  ;;  %v1260_v53 = vld [vmem:[%s1925_s20 + $0xe8] sm:$0xff]  ;;  %1257 = vst [vmem:[%s1921_s15 + $0xd8] sm:$0xff] %v1256_v51  ;;  %v1262_v54 = vld [vmem:[%s1925_s20 + $0xf0] sm:$0xff] }
 0x174   : >> { %1259 = vst [vmem:[%s1921_s15 + $0xe0] sm:$0xff] %v1258_v52  ;;  %1261 = vst [vmem:[%s1921_s15 + $0xe8] sm:$0xff] %v1260_v53  ;;  %v1264_v6 = vld [vmem:[%s1925_s20 + $0xf8] sm:$0xff]  ;;  %s2415_s20 = smov %s2348_s10 }
 0x175   : >> { %1263 = vst [vmem:[%s1921_s15 + $0xf0] sm:$0xff] %v1262_v54  ;;  %1265 = vst [vmem:[%s1921_s15 + $0xf8] sm:$0xff] %v1264_v6  ;;  %s2414_s15 = smov %s1272_s11 }
 0x176 PF: > { %s2389_s14 = sand.u32 31, %s2421_s27   ;;  %s1508_s17 = sshll.u32 %s2281_s6, 8 }
 0x177   : > { %s1277_s18 = scalar_lea.vmem %s2156_s12, %s1508_s17 [#allocation2]   ;;  %s1279_s21 = scalar_lea.vmem %s2275_s4, %s1508_s17  }
 0x178   : > { %p1502_p13 = scmp.le.s32.totalorder %s2389_s14, 0 }
 0x179   : > { %s1935_s22 = smov (!%p1502_p13), %s1279_s21   ;;  %s1939_s24 = smov (!%p1502_p13), %s1277_s18  }
 0x17a   : > { %1370 = sbr.rel (%p1502_p13) target bundleno = 391 (0x187), region = 127  ;;  %s1943_s25 = smov (!%p1502_p13), 0  }
 0x17b   : > { %s1947_s26 = smov (!%p1502_p13), 0  }
 0x17f LB: >> { %v1289_v33 = vld [vmem:[%s1941_s24] sm:$0xff]  ;;  %s1291_s27 = sadd.s32 1, %s1945_s25  ;;  %s1283_s26 = sadd.s32 1, %s1949_s26   ;;  %s1949_s26 = sphi %s1947_s26, %s1283_s26   ;;  %s1945_s25 = sphi %s1943_s25, %s1944_s25   ;;  %s1941_s24 = sphi %s1939_s24, %s1296_s24   ;;  %s1937_s22 = sphi %s1935_s22, %s1297_s22  }
 0x180   : >> { %1290 = vst [vmem:[%s1937_s22] sm:$0xff] %v1289_v33  ;;  %p1292_p0 = scmp.ge.s32.totalorder %s1291_s27, %s2389_s14  ;;  %p1282_p1 = scmp.ge.s32.totalorder %s1283_s26, %s2389_s14 }
 0x182   : >> { %s2425_s27 = smov (%p1292_p0, %s1291_s27), 0  ;;  %1285 = sbr.rel (!%p1282_p1) target bundleno = 383 (0x17f), region = 133 }
 0x183   : >> { %s1503_s12 = sshll.u32 %s2425_s27, 3  ;;  %s1944_s25 = smov %s2425_s27  }
 0x184   : >> { %s1296_s24 = scalar_lea.vmem %s1277_s18, %s1503_s12 [#allocation2]   ;;  %s1297_s22 = scalar_lea.vmem %s1279_s21, %s1503_s12  }
 0x187 PF: > { %p10_p2 = scmp.ge.s32.totalorder %s1986_s16, 4   ;;  %s2417_s12 = smov %s1913_s13 }
 0x188   : > { %s2418_s13 = smov %s1994_s19  ;;  %s2419_s14 = smov %s1986_s16 }
 0x189   :  { %12 = sbr.rel (!%p10_p2) target bundleno = 2 (0x2), region = 144 }

</bundles_post_ra>
